<compile_context>
chip_gen: v5e
topology: v5e:2x2
jax: 0.10.0
libtpu: 0.0.40
codegen_flags: <defaults>
</compile_context>

<pallas_src>
import jax
import jax.numpy as jnp
import numpy as np
from jax import lax
from jax.experimental import pallas as pl
from jax.experimental.pallas import tpu as pltpu


# Static geometry for 28x28 single-channel input (matches the PyTorch module).
KH = KW = 5
H1, W1 = 28, 28                              # conv1 input
OH1 = H1 - KH + 1                            # 24
PH1, PW1, C1 = OH1 // 2, OH1 // 2, 6         # 12, 12, 6   (after 2x2 pool)
OH2 = PH1 - KH + 1                           # 8
PH2, PW2, C2 = OH2 // 2, OH2 // 2, 16        # 4, 4, 16
LANE = 128                                   # lane-padded conv column width
NPAD = 128                                   # lane-padded MLP width
F1, F2, F3 = 120, 84, 26                     # true fc widths

# Matmul-operand dtype.  f32 matches the f32 reference at 1e-4.  On v6e/v7x set
# to jnp.bfloat16 for ~2x MXU throughput (relax the test tolerance to ~1e-2);
# biases / ReLU / pool maxes stay f32 either way (v5e has no bf16 VPU).
MM_DTYPE = jnp.float32


# ----------------------------------------------------------------------------
# Fused Pallas kernel: B_TILE images per grid step.
# ----------------------------------------------------------------------------
def lenet_kernel(x_ref, b1_ref, cb1_ref, b2_ref, cb2_ref,
                 w1_ref, fb1_ref, w2_ref, fb2_ref, w3_ref, fb3_ref,
                 o_ref, m1s_ref, m2s_ref):
    f32 = jnp.float32
    mmt = b1_ref.dtype
    bt = x_ref.shape[0]

    # ---- conv1: ONE fused banded matmul (kh + width-pool parity folded) -----
    xp = x_ref[...]                                      # (BT, 28, 128), cols>=28 are 0
    lhs1 = jnp.concatenate([xp[:, kh:kh + OH1, :] for kh in range(KH)],
                           axis=-1).reshape(bt * OH1, KH * LANE)   # (BT*24, 640)
    z1 = jnp.dot(lhs1.astype(mmt), b1_ref[...],
                 preferred_element_type=f32)             # (BT*24, 256)
    # width pool (even/odd parity column blocks) then bias + ReLU (monotone).
    m1 = jnp.maximum(jnp.maximum(z1[:, :LANE], z1[:, LANE:]) + cb1_ref[...], 0.0)
    # One dense store; the height pool happens on the strided reads below.
    m1s_ref[...] = m1.reshape(bt, OH1, LANE)             # (BT, 24, 128)

    # ---- conv2: same fused scheme; 2x2 height pool via stride-2 loads -------
    pieces = []
    for kh in range(KH):
        even = m1s_ref[:, pl.ds(2 * kh, OH2, stride=2), :]      # rows 2(kh+t)
        odd = m1s_ref[:, pl.ds(2 * kh + 1, OH2, stride=2), :]   # rows 2(kh+t)+1
        pieces.append(jnp.maximum(even, odd))                   # (BT, 8, 128)
    lhs2 = jnp.concatenate(pieces, axis=-1).reshape(bt * OH2, KH * LANE)
    z2 = jnp.dot(lhs2.astype(mmt), b2_ref[...],
                 preferred_element_type=f32)             # (BT*8, 256)
    m2 = jnp.maximum(jnp.maximum(z2[:, :LANE], z2[:, LANE:]) + cb2_ref[...], 0.0)
    m2s_ref[...] = m2.reshape(bt, OH2, LANE)             # (BT, 8, 128)

    # ---- MLP head (torch.flatten folded into fc1's row permutation) ---------
    feats = jnp.concatenate(
        [jnp.maximum(m2s_ref[:, 2 * i, :], m2s_ref[:, 2 * i + 1, :])
         for i in range(PH2)], axis=-1)                  # (BT, 512)
    h = jnp.maximum(jnp.dot(feats.astype(mmt), w1_ref[...],
                            preferred_element_type=f32) + fb1_ref[...], 0.0)
    h = jnp.maximum(jnp.dot(h.astype(mmt), w2_ref[...],
                            preferred_element_type=f32) + fb2_ref[...], 0.0)
    o_ref[...] = jnp.dot(h.astype(mmt), w3_ref[...],
                         preferred_element_type=f32) + fb3_ref[...]   # (BT, 128)


# ----------------------------------------------------------------------------
# Trace-time weight transforms (tiny, batch-independent).
# ----------------------------------------------------------------------------
def _conv1_band(c1w):
    """(6,1,5,5) torch conv1 weight -> (KH*128, 2*128) fused band matrix.

    band[kh*128 + w, p*128 + (j*C1+co)] = c1w[co, 0, kh, w-(2j+p)]  (else 0),
    so lhs1 @ band gives conv1 output at width 2j+p in parity block p.
    """
    KH_i, P_i, J_i, K_i, CO_i = np.meshgrid(
        np.arange(KH), np.arange(2), np.arange(PW1), np.arange(KW),
        np.arange(C1), indexing="ij")
    rows = (KH_i * LANE + 2 * J_i + P_i + K_i).ravel()
    cols = (P_i * LANE + J_i * C1 + CO_i).ravel()
    vals = c1w[:, 0][CO_i.ravel(), KH_i.ravel(), K_i.ravel()]
    band = jnp.zeros((KH * LANE, 2 * LANE), jnp.float32).at[rows, cols].set(vals)
    return band.astype(MM_DTYPE)


def _conv2_band(c2w):
    """(16,6,5,5) torch conv2 weight -> (KH*128, 2*128) fused band matrix."""
    KH_i, P_i, J_i, K_i, CI_i, CO_i = np.meshgrid(
        np.arange(KH), np.arange(2), np.arange(PW2), np.arange(KW),
        np.arange(C1), np.arange(C2), indexing="ij")
    rows = (KH_i * LANE + (2 * J_i + P_i + K_i) * C1 + CI_i).ravel()
    cols = (P_i * LANE + J_i * C2 + CO_i).ravel()
    vals = c2w[CO_i.ravel(), CI_i.ravel(), KH_i.ravel(), K_i.ravel()]
    band = jnp.zeros((KH * LANE, 2 * LANE), jnp.float32).at[rows, cols].set(vals)
    return band.astype(MM_DTYPE)


def _mlp_weights(f1w, f1b, f2w, f2b, f3w, f3b):
    """Fold the NCHW channel-major flatten into fc1 and pad everything to 128."""
    w1t = jnp.pad(f1w.T, ((0, 0), (0, NPAD - F1)))              # (256, 128)
    I_i, J_i, CO_i = np.meshgrid(np.arange(PH2), np.arange(PW2), np.arange(C2),
                                 indexing="ij")
    src = (CO_i * (PH2 * PW2) + I_i * PW2 + J_i).reshape(PH2, PW2 * C2)
    w1p = w1t[src]                                              # (4, 64, 128)
    w1p = jnp.pad(w1p, ((0, 0), (0, LANE - PW2 * C2), (0, 0)))  # (4, 128, 128)
    w1cat = w1p.reshape(PH2 * LANE, NPAD)                       # (512, 128)
    w2p = jnp.zeros((NPAD, NPAD), jnp.float32).at[:F1, :F2].set(f2w.T)
    w3p = jnp.zeros((NPAD, NPAD), jnp.float32).at[:F2, :F3].set(f3w.T)
    fb1 = jnp.pad(f1b, (0, NPAD - F1)).reshape(1, NPAD)
    fb2 = jnp.pad(f2b, (0, NPAD - F2)).reshape(1, NPAD)
    fb3 = jnp.pad(f3b, (0, NPAD - F3)).reshape(1, NPAD)
    return (w1cat.astype(MM_DTYPE), fb1, w2p.astype(MM_DTYPE), fb2,
            w3p.astype(MM_DTYPE), fb3)


# ----------------------------------------------------------------------------
# Wrapper: one fused pallas_call, B_TILE images per grid step.
# ----------------------------------------------------------------------------
def net_forward(x_nchw, params, *, b_tile=32):
    (c1w, c1b, c2w, c2b, f1w, f1b, f2w, f2b, f3w, f3b) = params
    B = x_nchw.shape[0]
    x = x_nchw.reshape(B, H1, W1).astype(jnp.float32)           # Cin = 1

    # Batch tile: >=8 and a multiple of 8 (sublane-dense output store); pick it
    # for MXU M, not memory (a b_tile=128 step still uses only a few MiB of
    # VMEM).  On v7x pick b_tile so the grid length is >=2 and both TensorCores
    # get work from the "parallel" batch axis.
    bt = int(min(b_tile, max(8, ((B + 7) // 8) * 8)))
    Bp = ((B + bt - 1) // bt) * bt
    # Pad batch to a tile multiple and width to 128 lanes (band rows for the
    # padded lanes are zero, so the padding never leaks into real outputs).
    x = jnp.pad(x, ((0, Bp - B), (0, 0), (0, LANE - W1)))       # (Bp, 28, 128)

    band1 = _conv1_band(c1w)                                    # (640, 256)
    band2 = _conv2_band(c2w)                                    # (640, 256)
    cb1 = jnp.pad(jnp.tile(c1b, PW1), (0, LANE - PW1 * C1)).reshape(1, LANE)
    cb2 = jnp.pad(jnp.tile(c2b, PW2), (0, LANE - PW2 * C2)).reshape(1, LANE)
    w1cat, fb1, w2p, fb2, w3p, fb3 = _mlp_weights(f1w, f1b, f2w, f2b, f3w, f3b)

    def const_spec(arr):
        # Constant block index -> stays resident in VMEM, no re-DMA per step.
        zeros = (0,) * arr.ndim
        return pl.BlockSpec(arr.shape, lambda i, _z=zeros: _z)

    out = pl.pallas_call(
        lenet_kernel,
        out_shape=jax.ShapeDtypeStruct((Bp, NPAD), jnp.float32),
        grid=(Bp // bt,),
        in_specs=[
            pl.BlockSpec((bt, H1, LANE), lambda i: (i, 0, 0)),  # image tile
            const_spec(band1), const_spec(cb1),
            const_spec(band2), const_spec(cb2),
            const_spec(w1cat), const_spec(fb1),
            const_spec(w2p), const_spec(fb2),
            const_spec(w3p), const_spec(fb3),
        ],
        out_specs=pl.BlockSpec((bt, NPAD), lambda i: (i, 0)),   # dense store
        scratch_shapes=[pltpu.VMEM((bt, OH1, LANE), jnp.float32),
                        pltpu.VMEM((bt, OH2, LANE), jnp.float32)],
        compiler_params=pltpu.CompilerParams(
            dimension_semantics=("parallel",),       # v7x: split tiles over TCs
            vmem_limit_bytes=32 * 1024 * 1024),
    )(x, band1, cb1, band2, cb2, w1cat, fb1, w2p, fb2, w3p, fb3)

    return out[:B, :F3]                                         # (B, 26)


# ----------------------------------------------------------------------------
# Pure-JAX reference (for correctness check)
# ----------------------------------------------------------------------------
def reference_forward(x_nchw, params):
    (c1w, c1b, c2w, c2b, f1w, f1b, f2w, f2b, f3w, f3b) = params
    x = jnp.transpose(x_nchw, (0, 2, 3, 1))
    dn = ('NHWC', 'HWIO', 'NHWC')

    y = lax.conv_general_dilated(x, jnp.transpose(c1w, (2, 3, 1, 0)), (1, 1),
                                 'VALID', dimension_numbers=dn) + c1b
    y = jnp.maximum(y, 0.0)
    y = lax.reduce_window(y, -jnp.inf, lax.max, (1, 2, 2, 1), (1, 2, 2, 1), 'VALID')

    y = lax.conv_general_dilated(y, jnp.transpose(c2w, (2, 3, 1, 0)), (1, 1),
                                 'VALID', dimension_numbers=dn) + c2b
    y = jnp.maximum(y, 0.0)
    y = lax.reduce_window(y, -jnp.inf, lax.max, (1, 2, 2, 1), (1, 2, 2, 1), 'VALID')

    B = y.shape[0]
    feat = jnp.transpose(y, (0, 3, 1, 2)).reshape(B, -1)        # torch.flatten
    h = jnp.maximum(feat @ f1w.T + f1b, 0.0)
    h = jnp.maximum(h @ f2w.T + f2b, 0.0)
    return h @ f3w.T + f3b


# ----------------------------------------------------------------------------
# main
# ----------------------------------------------------------------------------
if __name__ == "__main__":
    key = jax.random.PRNGKey(0)
    ks = jax.random.split(key, 11)

    # Deterministic synthetic parameters (PyTorch layouts: conv (Cout,Cin,KH,KW),
    # linear (out,in)); fc1_input_dim = 16*4*4 = 256 for 28x28 input.
    params = (
        jax.random.normal(ks[0], (6, 1, 5, 5), jnp.float32) * 0.1,
        jax.random.normal(ks[1], (6,), jnp.float32) * 0.1,
        jax.random.normal(ks[2], (16, 6, 5, 5), jnp.float32) * 0.1,
        jax.random.normal(ks[3], (16,), jnp.float32) * 0.1,
        jax.random.normal(ks[4], (120, 256), jnp.float32) * 0.05,
        jax.random.normal(ks[5], (120,), jnp.float32) * 0.05,
        jax.random.normal(ks[6], (84, 120), jnp.float32) * 0.05,
        jax.random.normal(ks[7], (84,), jnp.float32) * 0.05,
        jax.random.normal(ks[8], (26, 84), jnp.float32) * 0.05,
        jax.random.normal(ks[9], (26,), jnp.float32) * 0.05,
    )

    # Small deterministic input consistent with the module: (B=2, C=1, 28, 28).
    x = jax.random.normal(ks[10], (2, 1, 28, 28), jnp.float32)

    out = jax.jit(net_forward)(x, params)
    out = jax.block_until_ready(out)
    assert out.shape == (2, 26), out.shape

    ref = jax.block_until_ready(reference_forward(x, params))
    np.testing.assert_allclose(np.asarray(out), np.asarray(ref), rtol=1e-4, atol=1e-4)

    print("KERNEL_OK")
</pallas_src>

<mosaic_0001>
module attributes {stable_mosaic.version = 11 : i64} {
  func.func @lenet_kernel(%arg0: i32, %arg1: memref<8x28x128xf32, #tpu.memory_space<vmem>>, %arg2: memref<640x256xf32, #tpu.memory_space<vmem>>, %arg3: memref<1x128xf32, #tpu.memory_space<vmem>>, %arg4: memref<640x256xf32, #tpu.memory_space<vmem>>, %arg5: memref<1x128xf32, #tpu.memory_space<vmem>>, %arg6: memref<512x128xf32, #tpu.memory_space<vmem>>, %arg7: memref<1x128xf32, #tpu.memory_space<vmem>>, %arg8: memref<128x128xf32, #tpu.memory_space<vmem>>, %arg9: memref<1x128xf32, #tpu.memory_space<vmem>>, %arg10: memref<128x128xf32, #tpu.memory_space<vmem>>, %arg11: memref<1x128xf32, #tpu.memory_space<vmem>>, %arg12: memref<8x128xf32, #tpu.memory_space<vmem>>, %arg13: memref<8x24x128xf32, #tpu.memory_space<vmem>>, %arg14: memref<8x8x128xf32, #tpu.memory_space<vmem>>) attributes {dimension_semantics = [#tpu.dimension_semantics<parallel>], iteration_bounds = array<i64: 1>, scalar_prefetch = 0 : i64, scratch_operands = 2 : i64, tpu.core_type = #tpu.core_type<tc>, window_params = [{transform_indices = @transform_0, window_bounds = array<i64: 8, 28, 128>}, {pipeline_mode = #tpu.pipeline_mode<synchronous>, transform_indices = @transform_1, window_bounds = array<i64: 640, 256>}, {pipeline_mode = #tpu.pipeline_mode<synchronous>, transform_indices = @transform_2, window_bounds = array<i64: 1, 128>}, {pipeline_mode = #tpu.pipeline_mode<synchronous>, transform_indices = @transform_3, window_bounds = array<i64: 640, 256>}, {pipeline_mode = #tpu.pipeline_mode<synchronous>, transform_indices = @transform_4, window_bounds = array<i64: 1, 128>}, {pipeline_mode = #tpu.pipeline_mode<synchronous>, transform_indices = @transform_5, window_bounds = array<i64: 512, 128>}, {pipeline_mode = #tpu.pipeline_mode<synchronous>, transform_indices = @transform_6, window_bounds = array<i64: 1, 128>}, {pipeline_mode = #tpu.pipeline_mode<synchronous>, transform_indices = @transform_7, window_bounds = array<i64: 128, 128>}, {pipeline_mode = #tpu.pipeline_mode<synchronous>, transform_indices = @transform_8, window_bounds = array<i64: 1, 128>}, {pipeline_mode = #tpu.pipeline_mode<synchronous>, transform_indices = @transform_9, window_bounds = array<i64: 128, 128>}, {pipeline_mode = #tpu.pipeline_mode<synchronous>, transform_indices = @transform_10, window_bounds = array<i64: 1, 128>}, {transform_indices = @transform_11, window_bounds = array<i64: 8, 128>}]} {
    %c0 = arith.constant 0 : index
    %c0_0 = arith.constant 0 : index
    %c0_1 = arith.constant 0 : index
    %0 = vector.load %arg1[%c0, %c0_0, %c0_1] : memref<8x28x128xf32, #tpu.memory_space<vmem>>, vector<8x28x128xf32>
    %1 = vector.extract_strided_slice %0 {offsets = [0, 0, 0], sizes = [8, 24, 128], strides = [1, 1, 1]} : vector<8x28x128xf32> to vector<8x24x128xf32>
    %2 = vector.extract_strided_slice %0 {offsets = [0, 1, 0], sizes = [8, 24, 128], strides = [1, 1, 1]} : vector<8x28x128xf32> to vector<8x24x128xf32>
    %3 = vector.extract_strided_slice %0 {offsets = [0, 2, 0], sizes = [8, 24, 128], strides = [1, 1, 1]} : vector<8x28x128xf32> to vector<8x24x128xf32>
    %4 = vector.extract_strided_slice %0 {offsets = [0, 3, 0], sizes = [8, 24, 128], strides = [1, 1, 1]} : vector<8x28x128xf32> to vector<8x24x128xf32>
    %5 = vector.extract_strided_slice %0 {offsets = [0, 4, 0], sizes = [8, 24, 128], strides = [1, 1, 1]} : vector<8x28x128xf32> to vector<8x24x128xf32>
    %6 = tpu.concatenate %1, %2, %3, %4, %5 in 2 : vector<8x24x128xf32>, vector<8x24x128xf32>, vector<8x24x128xf32>, vector<8x24x128xf32>, vector<8x24x128xf32> -> vector<8x24x640xf32>
    %7 = vector.shape_cast %6 : vector<8x24x640xf32> to vector<192x640xf32>
    %c0_2 = arith.constant 0 : index
    %c0_3 = arith.constant 0 : index
    %8 = vector.load %arg2[%c0_2, %c0_3] : memref<640x256xf32, #tpu.memory_space<vmem>>, vector<640x256xf32>
    %cst = arith.constant dense<0.000000e+00> : vector<192x256xf32>
    %9 = tpu.matmul %7, %8, %cst {dimension_numbers = #tpu.dot_dimension_numbers<[1], [0], [0], [1], [0, 0, 1, 1], [], []>} : vector<192x640xf32>, vector<640x256xf32>, vector<192x256xf32> -> vector<192x256xf32>
    %10 = vector.extract_strided_slice %9 {offsets = [0, 0], sizes = [192, 128], strides = [1, 1]} : vector<192x256xf32> to vector<192x128xf32>
    %11 = vector.extract_strided_slice %9 {offsets = [0, 128], sizes = [192, 128], strides = [1, 1]} : vector<192x256xf32> to vector<192x128xf32>
    %12 = arith.maximumf %10, %11 : vector<192x128xf32>
    %c0_4 = arith.constant 0 : index
    %c0_5 = arith.constant 0 : index
    %13 = vector.load %arg3[%c0_4, %c0_5] : memref<1x128xf32, #tpu.memory_space<vmem>>, vector<1x128xf32>
    %14 = vector.broadcast %13 : vector<1x128xf32> to vector<192x128xf32>
    %15 = arith.addf %12, %14 : vector<192x128xf32>
    %cst_6 = arith.constant 0.000000e+00 : f32
    %16 = vector.broadcast %cst_6 : f32 to vector<192x128xf32>
    %17 = arith.maximumf %15, %16 : vector<192x128xf32>
    %18 = vector.shape_cast %17 : vector<192x128xf32> to vector<8x24x128xf32>
    %c0_7 = arith.constant 0 : index
    %c0_8 = arith.constant 0 : index
    %c0_9 = arith.constant 0 : index
    %19 = vector.load %arg13[%c0_7, %c0_8, %c0_9] : memref<8x24x128xf32, #tpu.memory_space<vmem>>, vector<8x24x128xf32>
    tpu.vector_store %arg13[%c0_7, %c0_8, %c0_9], %18 {strides = array<i32>} : memref<8x24x128xf32, #tpu.memory_space<vmem>>, vector<8x24x128xf32>,
    %c0_10 = arith.constant 0 : index
    %c0_11 = arith.constant 0 : index
    %c0_12 = arith.constant 0 : index
    %20 = tpu.strided_load %arg13[%c0_10, %c0_11, %c0_12] {strides = array<i32: 1, 2, 1>} : memref<8x24x128xf32, #tpu.memory_space<vmem>>, vector<8x8x128xf32>
    %c0_13 = arith.constant 0 : index
    %c1 = arith.constant 1 : index
    %c0_14 = arith.constant 0 : index
    %21 = tpu.strided_load %arg13[%c0_13, %c1, %c0_14] {strides = array<i32: 1, 2, 1>} : memref<8x24x128xf32, #tpu.memory_space<vmem>>, vector<8x8x128xf32>
    %22 = arith.maximumf %20, %21 : vector<8x8x128xf32>
    %c0_15 = arith.constant 0 : index
    %c2 = arith.constant 2 : index
    %c0_16 = arith.constant 0 : index
    %23 = tpu.strided_load %arg13[%c0_15, %c2, %c0_16] {strides = array<i32: 1, 2, 1>} : memref<8x24x128xf32, #tpu.memory_space<vmem>>, vector<8x8x128xf32>
    %c0_17 = arith.constant 0 : index
    %c3 = arith.constant 3 : index
    %c0_18 = arith.constant 0 : index
    %24 = tpu.strided_load %arg13[%c0_17, %c3, %c0_18] {strides = array<i32: 1, 2, 1>} : memref<8x24x128xf32, #tpu.memory_space<vmem>>, vector<8x8x128xf32>
    %25 = arith.maximumf %23, %24 : vector<8x8x128xf32>
    %c0_19 = arith.constant 0 : index
    %c4 = arith.constant 4 : index
    %c0_20 = arith.constant 0 : index
    %26 = tpu.strided_load %arg13[%c0_19, %c4, %c0_20] {strides = array<i32: 1, 2, 1>} : memref<8x24x128xf32, #tpu.memory_space<vmem>>, vector<8x8x128xf32>
    %c0_21 = arith.constant 0 : index
    %c5 = arith.constant 5 : index
    %c0_22 = arith.constant 0 : index
    %27 = tpu.strided_load %arg13[%c0_21, %c5, %c0_22] {strides = array<i32: 1, 2, 1>} : memref<8x24x128xf32, #tpu.memory_space<vmem>>, vector<8x8x128xf32>
    %28 = arith.maximumf %26, %27 : vector<8x8x128xf32>
    %c0_23 = arith.constant 0 : index
    %c6 = arith.constant 6 : index
    %c0_24 = arith.constant 0 : index
    %29 = tpu.strided_load %arg13[%c0_23, %c6, %c0_24] {strides = array<i32: 1, 2, 1>} : memref<8x24x128xf32, #tpu.memory_space<vmem>>, vector<8x8x128xf32>
    %c0_25 = arith.constant 0 : index
    %c7 = arith.constant 7 : index
    %c0_26 = arith.constant 0 : index
    %30 = tpu.strided_load %arg13[%c0_25, %c7, %c0_26] {strides = array<i32: 1, 2, 1>} : memref<8x24x128xf32, #tpu.memory_space<vmem>>, vector<8x8x128xf32>
    %31 = arith.maximumf %29, %30 : vector<8x8x128xf32>
    %c0_27 = arith.constant 0 : index
    %c8 = arith.constant 8 : index
    %c0_28 = arith.constant 0 : index
    %32 = tpu.strided_load %arg13[%c0_27, %c8, %c0_28] {strides = array<i32: 1, 2, 1>} : memref<8x24x128xf32, #tpu.memory_space<vmem>>, vector<8x8x128xf32>
    %c0_29 = arith.constant 0 : index
    %c9 = arith.constant 9 : index
    %c0_30 = arith.constant 0 : index
    %33 = tpu.strided_load %arg13[%c0_29, %c9, %c0_30] {strides = array<i32: 1, 2, 1>} : memref<8x24x128xf32, #tpu.memory_space<vmem>>, vector<8x8x128xf32>
    %34 = arith.maximumf %32, %33 : vector<8x8x128xf32>
    %35 = tpu.concatenate %22, %25, %28, %31, %34 in 2 : vector<8x8x128xf32>, vector<8x8x128xf32>, vector<8x8x128xf32>, vector<8x8x128xf32>, vector<8x8x128xf32> -> vector<8x8x640xf32>
    %36 = vector.shape_cast %35 : vector<8x8x640xf32> to vector<64x640xf32>
    %c0_31 = arith.constant 0 : index
    %c0_32 = arith.constant 0 : index
    %37 = vector.load %arg4[%c0_31, %c0_32] : memref<640x256xf32, #tpu.memory_space<vmem>>, vector<640x256xf32>
    %cst_33 = arith.constant dense<0.000000e+00> : vector<64x256xf32>
    %38 = tpu.matmul %36, %37, %cst_33 {dimension_numbers = #tpu.dot_dimension_numbers<[1], [0], [0], [1], [0, 0, 1, 1], [], []>} : vector<64x640xf32>, vector<640x256xf32>, vector<64x256xf32> -> vector<64x256xf32>
    %39 = vector.extract_strided_slice %38 {offsets = [0, 0], sizes = [64, 128], strides = [1, 1]} : vector<64x256xf32> to vector<64x128xf32>
    %40 = vector.extract_strided_slice %38 {offsets = [0, 128], sizes = [64, 128], strides = [1, 1]} : vector<64x256xf32> to vector<64x128xf32>
    %41 = arith.maximumf %39, %40 : vector<64x128xf32>
    %c0_34 = arith.constant 0 : index
    %c0_35 = arith.constant 0 : index
    %42 = vector.load %arg5[%c0_34, %c0_35] : memref<1x128xf32, #tpu.memory_space<vmem>>, vector<1x128xf32>
    %43 = vector.broadcast %42 : vector<1x128xf32> to vector<64x128xf32>
    %44 = arith.addf %41, %43 : vector<64x128xf32>
    %cst_36 = arith.constant 0.000000e+00 : f32
    %45 = vector.broadcast %cst_36 : f32 to vector<64x128xf32>
    %46 = arith.maximumf %44, %45 : vector<64x128xf32>
    %47 = vector.shape_cast %46 : vector<64x128xf32> to vector<8x8x128xf32>
    %c0_37 = arith.constant 0 : index
    %c0_38 = arith.constant 0 : index
    %c0_39 = arith.constant 0 : index
    %48 = vector.load %arg14[%c0_37, %c0_38, %c0_39] : memref<8x8x128xf32, #tpu.memory_space<vmem>>, vector<8x8x128xf32>
    tpu.vector_store %arg14[%c0_37, %c0_38, %c0_39], %47 {strides = array<i32>} : memref<8x8x128xf32, #tpu.memory_space<vmem>>, vector<8x8x128xf32>,
    %c0_40 = arith.constant 0 : index
    %c0_41 = arith.constant 0 : index
    %c0_42 = arith.constant 0 : index
    %49 = vector.load %arg14[%c0_40, %c0_41, %c0_42] : memref<8x8x128xf32, #tpu.memory_space<vmem>>, vector<8x1x128xf32>
    %50 = vector.shape_cast %49 : vector<8x1x128xf32> to vector<8x128xf32>
    %c0_43 = arith.constant 0 : index
    %c1_44 = arith.constant 1 : index
    %c0_45 = arith.constant 0 : index
    %51 = vector.load %arg14[%c0_43, %c1_44, %c0_45] : memref<8x8x128xf32, #tpu.memory_space<vmem>>, vector<8x1x128xf32>
    %52 = vector.shape_cast %51 : vector<8x1x128xf32> to vector<8x128xf32>
    %53 = arith.maximumf %50, %52 : vector<8x128xf32>
    %c0_46 = arith.constant 0 : index
    %c2_47 = arith.constant 2 : index
    %c0_48 = arith.constant 0 : index
    %54 = vector.load %arg14[%c0_46, %c2_47, %c0_48] : memref<8x8x128xf32, #tpu.memory_space<vmem>>, vector<8x1x128xf32>
    %55 = vector.shape_cast %54 : vector<8x1x128xf32> to vector<8x128xf32>
    %c0_49 = arith.constant 0 : index
    %c3_50 = arith.constant 3 : index
    %c0_51 = arith.constant 0 : index
    %56 = vector.load %arg14[%c0_49, %c3_50, %c0_51] : memref<8x8x128xf32, #tpu.memory_space<vmem>>, vector<8x1x128xf32>
    %57 = vector.shape_cast %56 : vector<8x1x128xf32> to vector<8x128xf32>
    %58 = arith.maximumf %55, %57 : vector<8x128xf32>
    %c0_52 = arith.constant 0 : index
    %c4_53 = arith.constant 4 : index
    %c0_54 = arith.constant 0 : index
    %59 = vector.load %arg14[%c0_52, %c4_53, %c0_54] : memref<8x8x128xf32, #tpu.memory_space<vmem>>, vector<8x1x128xf32>
    %60 = vector.shape_cast %59 : vector<8x1x128xf32> to vector<8x128xf32>
    %c0_55 = arith.constant 0 : index
    %c5_56 = arith.constant 5 : index
    %c0_57 = arith.constant 0 : index
    %61 = vector.load %arg14[%c0_55, %c5_56, %c0_57] : memref<8x8x128xf32, #tpu.memory_space<vmem>>, vector<8x1x128xf32>
    %62 = vector.shape_cast %61 : vector<8x1x128xf32> to vector<8x128xf32>
    %63 = arith.maximumf %60, %62 : vector<8x128xf32>
    %c0_58 = arith.constant 0 : index
    %c6_59 = arith.constant 6 : index
    %c0_60 = arith.constant 0 : index
    %64 = vector.load %arg14[%c0_58, %c6_59, %c0_60] : memref<8x8x128xf32, #tpu.memory_space<vmem>>, vector<8x1x128xf32>
    %65 = vector.shape_cast %64 : vector<8x1x128xf32> to vector<8x128xf32>
    %c0_61 = arith.constant 0 : index
    %c7_62 = arith.constant 7 : index
    %c0_63 = arith.constant 0 : index
    %66 = vector.load %arg14[%c0_61, %c7_62, %c0_63] : memref<8x8x128xf32, #tpu.memory_space<vmem>>, vector<8x1x128xf32>
    %67 = vector.shape_cast %66 : vector<8x1x128xf32> to vector<8x128xf32>
    %68 = arith.maximumf %65, %67 : vector<8x128xf32>
    %69 = tpu.concatenate %53, %58, %63, %68 in 1 : vector<8x128xf32>, vector<8x128xf32>, vector<8x128xf32>, vector<8x128xf32> -> vector<8x512xf32>
    %c0_64 = arith.constant 0 : index
    %c0_65 = arith.constant 0 : index
    %70 = vector.load %arg6[%c0_64, %c0_65] : memref<512x128xf32, #tpu.memory_space<vmem>>, vector<512x128xf32>
    %cst_66 = arith.constant dense<0.000000e+00> : vector<8x128xf32>
    %71 = tpu.matmul %69, %70, %cst_66 {dimension_numbers = #tpu.dot_dimension_numbers<[1], [0], [0], [1], [0, 0, 1, 1], [], []>} : vector<8x512xf32>, vector<512x128xf32>, vector<8x128xf32> -> vector<8x128xf32>
    %c0_67 = arith.constant 0 : index
    %c0_68 = arith.constant 0 : index
    %72 = vector.load %arg7[%c0_67, %c0_68] : memref<1x128xf32, #tpu.memory_space<vmem>>, vector<1x128xf32>
    %73 = vector.broadcast %72 : vector<1x128xf32> to vector<8x128xf32>
    %74 = arith.addf %71, %73 : vector<8x128xf32>
    %cst_69 = arith.constant 0.000000e+00 : f32
    %75 = vector.broadcast %cst_69 : f32 to vector<8x128xf32>
    %76 = arith.maximumf %74, %75 : vector<8x128xf32>
    %c0_70 = arith.constant 0 : index
    %c0_71 = arith.constant 0 : index
    %77 = vector.load %arg8[%c0_70, %c0_71] : memref<128x128xf32, #tpu.memory_space<vmem>>, vector<128x128xf32>
    %cst_72 = arith.constant dense<0.000000e+00> : vector<8x128xf32>
    %78 = tpu.matmul %76, %77, %cst_72 {dimension_numbers = #tpu.dot_dimension_numbers<[1], [0], [0], [1], [0, 0, 1, 1], [], []>} : vector<8x128xf32>, vector<128x128xf32>, vector<8x128xf32> -> vector<8x128xf32>
    %c0_73 = arith.constant 0 : index
    %c0_74 = arith.constant 0 : index
    %79 = vector.load %arg9[%c0_73, %c0_74] : memref<1x128xf32, #tpu.memory_space<vmem>>, vector<1x128xf32>
    %80 = vector.broadcast %79 : vector<1x128xf32> to vector<8x128xf32>
    %81 = arith.addf %78, %80 : vector<8x128xf32>
    %cst_75 = arith.constant 0.000000e+00 : f32
    %82 = vector.broadcast %cst_75 : f32 to vector<8x128xf32>
    %83 = arith.maximumf %81, %82 : vector<8x128xf32>
    %c0_76 = arith.constant 0 : index
    %c0_77 = arith.constant 0 : index
    %84 = vector.load %arg10[%c0_76, %c0_77] : memref<128x128xf32, #tpu.memory_space<vmem>>, vector<128x128xf32>
    %cst_78 = arith.constant dense<0.000000e+00> : vector<8x128xf32>
    %85 = tpu.matmul %83, %84, %cst_78 {dimension_numbers = #tpu.dot_dimension_numbers<[1], [0], [0], [1], [0, 0, 1, 1], [], []>} : vector<8x128xf32>, vector<128x128xf32>, vector<8x128xf32> -> vector<8x128xf32>
    %c0_79 = arith.constant 0 : index
    %c0_80 = arith.constant 0 : index
    %86 = vector.load %arg11[%c0_79, %c0_80] : memref<1x128xf32, #tpu.memory_space<vmem>>, vector<1x128xf32>
    %87 = vector.broadcast %86 : vector<1x128xf32> to vector<8x128xf32>
    %88 = arith.addf %85, %87 : vector<8x128xf32>
    %c0_81 = arith.constant 0 : index
    %c0_82 = arith.constant 0 : index
    %89 = vector.load %arg12[%c0_81, %c0_82] : memref<8x128xf32, #tpu.memory_space<vmem>>, vector<8x128xf32>
    tpu.vector_store %arg12[%c0_81, %c0_82], %88 {strides = array<i32>} : memref<8x128xf32, #tpu.memory_space<vmem>>, vector<8x128xf32>,
    return
  }
  func.func @transform_0(%arg0: i32) -> (i32, i32, i32) {
    %c0_i32 = arith.constant 0 : i32
    %c0_i32_0 = arith.constant 0 : i32
    %c0_i32_1 = arith.constant 0 : i32
    return %arg0, %c0_i32, %c0_i32_0 : i32, i32, i32
  }
  func.func @transform_1(%arg0: i32) -> (i32, i32) {
    %c0_i32 = arith.constant 0 : i32
    %c0_i32_0 = arith.constant 0 : i32
    %c0_i32_1 = arith.constant 0 : i32
    return %c0_i32, %c0_i32_0 : i32, i32
  }
  func.func @transform_2(%arg0: i32) -> (i32, i32) {
    %c0_i32 = arith.constant 0 : i32
    %c0_i32_0 = arith.constant 0 : i32
    %c0_i32_1 = arith.constant 0 : i32
    return %c0_i32, %c0_i32_0 : i32, i32
  }
  func.func @transform_3(%arg0: i32) -> (i32, i32) {
    %c0_i32 = arith.constant 0 : i32
    %c0_i32_0 = arith.constant 0 : i32
    %c0_i32_1 = arith.constant 0 : i32
    return %c0_i32, %c0_i32_0 : i32, i32
  }
  func.func @transform_4(%arg0: i32) -> (i32, i32) {
    %c0_i32 = arith.constant 0 : i32
    %c0_i32_0 = arith.constant 0 : i32
    %c0_i32_1 = arith.constant 0 : i32
    return %c0_i32, %c0_i32_0 : i32, i32
  }
  func.func @transform_5(%arg0: i32) -> (i32, i32) {
    %c0_i32 = arith.constant 0 : i32
    %c0_i32_0 = arith.constant 0 : i32
    %c0_i32_1 = arith.constant 0 : i32
    return %c0_i32, %c0_i32_0 : i32, i32
  }
  func.func @transform_6(%arg0: i32) -> (i32, i32) {
    %c0_i32 = arith.constant 0 : i32
    %c0_i32_0 = arith.constant 0 : i32
    %c0_i32_1 = arith.constant 0 : i32
    return %c0_i32, %c0_i32_0 : i32, i32
  }
  func.func @transform_7(%arg0: i32) -> (i32, i32) {
    %c0_i32 = arith.constant 0 : i32
    %c0_i32_0 = arith.constant 0 : i32
    %c0_i32_1 = arith.constant 0 : i32
    return %c0_i32, %c0_i32_0 : i32, i32
  }
  func.func @transform_8(%arg0: i32) -> (i32, i32) {
    %c0_i32 = arith.constant 0 : i32
    %c0_i32_0 = arith.constant 0 : i32
    %c0_i32_1 = arith.constant 0 : i32
    return %c0_i32, %c0_i32_0 : i32, i32
  }
  func.func @transform_9(%arg0: i32) -> (i32, i32) {
    %c0_i32 = arith.constant 0 : i32
    %c0_i32_0 = arith.constant 0 : i32
    %c0_i32_1 = arith.constant 0 : i32
    return %c0_i32, %c0_i32_0 : i32, i32
  }
  func.func @transform_10(%arg0: i32) -> (i32, i32) {
    %c0_i32 = arith.constant 0 : i32
    %c0_i32_0 = arith.constant 0 : i32
    %c0_i32_1 = arith.constant 0 : i32
    return %c0_i32, %c0_i32_0 : i32, i32
  }
  func.func @transform_11(%arg0: i32) -> (i32, i32) {
    %c0_i32 = arith.constant 0 : i32
    %c0_i32_0 = arith.constant 0 : i32
    return %arg0, %c0_i32 : i32, i32
  }
}

</mosaic_0001>

<bundles_post_ra>
// kernel: tile.14
= control target key start
LH: loop header
LB: loop body
LE: loop exit
PB: predicated region body
PF: predicated region fallthrough
CT: control target
= control target key end

     0   :  { %s99_s10 = smov 66   ;;  %s100_s11 = smov 54   ;;  %vm3_vm0 = vcmask 48128   ;;  %vm9_vm1 = vcmask 589328   ;;  %vm15_vm2 = vcmask 540128   ;;  %vm21_vm3 = vcmask 490928   ;;  %s159_s0 = inlined_call_operand.vmem [shape: f32[12,6], index: 0, kind: input, shape index: {}]   ;;  %s160_s1 = inlined_call_operand.vmem [shape: f32[72], index: 1, kind: output, shape index: {}]  }
   0x1   :  { %v77_v0 = vld [vmem:[%s159_s0 + $0xb] sm:$0x1]   ;;  %v79_v1 = vld [vmem:[%s159_s0 + $0x9] sm:$0x1]   ;;  %v81_v2 = vld [vmem:[%s159_s0 + $0x7] sm:$0x1]  }
   0x2   :  { %7 = vrot.lane.b32.xlu0 %v77_v0, %s99_s10  ;;  %19 = vrot.lane.b32.xlu1 %v79_v1, %s100_s11  ;;  %s101_s14 = smov 42   ;;  %v78_v3 = vld [vmem:[%s159_s0 + $0xa] sm:$0x1]   ;;  %v80_v4 = vld [vmem:[%s159_s0 + $0x8] sm:$0x1]   ;;  %s102_s19 = smov 60  }
   0x3   :  { %31 = vrot.lane.b32.xlu2 %v81_v2, %s101_s14  ;;  %s103_s20 = smov 48   ;;  %v82_v5 = vld [vmem:[%s159_s0 + $0x6] sm:$0x1]   ;;  %s104_s23 = smov 36   ;;  %v83_v6 = vld [vmem:[%s159_s0 + $0x5] sm:$0x1]  }
   0x4   :  { %v84_v7 = vld [vmem:[%s159_s0 + $0x4] sm:$0x1]   ;;  %s105_s28 = smov 30   ;;  %s106_s29 = smov 24   ;;  %v85_v8 = vld [vmem:[%s159_s0 + $0x3] sm:$0x1]  }
   0x5   :  { %s107_s3 = smov 18   ;;  %v86_v9 = vld [vmem:[%s159_s0 + $0x2] sm:$0x1]   ;;  %v87_v10 = vld [vmem:[%s159_s0 + $0x1] sm:$0x1]   ;;  %s108_s8 = smov 12  }
   0x6   :  { %s109_s9 = smov 6   ;;  %v2_v11 = vld [vmem:[%s159_s0] sm:$0x1]   ;;  %vm27_vm4 = vcmask 441728   ;;  %vm33_vm5 = vcmask 392528   ;;  %vm39_vm6 = vcmask 343328  }
   0x7   :  { %4 = vst.msk [vmem:[#allocation0] sm:$0x1] %vm3_vm0, %v2_v11   ;;  %vm45_vm7 = vcmask 294128   ;;  %vm51_vm8 = vcmask 244928   ;;  %vm57_vm9 = vcmask 195728   ;;  %vm63_vm10 = vcmask 146528  }
   0x8   :  { %vm69_vm11 = vcmask 97328  }
   0xa   :  { %13 = vrot.lane.b32.xlu0 %v78_v3, %s102_s19  ;;  %25 = vrot.lane.b32.xlu1 %v80_v4, %s103_s20 }
   0xb   :  { %37 = vrot.lane.b32.xlu2 %v82_v5, %s104_s23 }
  0x12   :  { %43 = vrot.lane.b32.xlu0 %v83_v6, %s105_s28  ;;  %49 = vrot.lane.b32.xlu1 %v84_v7, %s106_s29 }
  0x13   :  { %55 = vrot.lane.b32.xlu2 %v85_v8, %s107_s3 }
  0x1a   :  { %61 = vrot.lane.b32.xlu0 %v86_v9, %s108_s8  ;;  %67 = vrot.lane.b32.xlu1 %v87_v10, %s109_s9 }
  0x5d   :  { %v32_v12 = vpop.permute.xlu2 %31  }
  0x65   :  { %v38_v13 = vpop.permute.xlu2 %37  }
  0x6d   :  { %v56_v14 = vpop.permute.xlu2 %55  }
  0x74   :  { %v8_v15 = vpop.permute.xlu0 %7   ;;  %v20_v16 = vpop.permute.xlu1 %19  }
  0x75   :  { %10 = vst.msk [vmem:[#allocation0] sm:$0x1] %vm9_vm1, %v8_v15  }
  0x7c   :  { %v14_v17 = vpop.permute.xlu0 %13   ;;  %v26_v18 = vpop.permute.xlu1 %25  }
  0x7d   :  { %16 = vst.msk [vmem:[#allocation0] sm:$0x1] %vm15_vm2, %v14_v17  }
  0x7e   :  { %22 = vst.msk [vmem:[#allocation0] sm:$0x1] %vm21_vm3, %v20_v16  }
  0x7f   :  { %28 = vst.msk [vmem:[#allocation0] sm:$0x1] %vm27_vm4, %v26_v18  }
  0x80   :  { %34 = vst.msk [vmem:[#allocation0] sm:$0x1] %vm33_vm5, %v32_v12  }
  0x81   :  { %40 = vst.msk [vmem:[#allocation0] sm:$0x1] %vm39_vm6, %v38_v13  }
  0x84   :  { %v44_v19 = vpop.permute.xlu0 %43   ;;  %v50_v20 = vpop.permute.xlu1 %49  }
  0x85   :  { %46 = vst.msk [vmem:[#allocation0] sm:$0x1] %vm45_vm7, %v44_v19  }
  0x86   :  { %52 = vst.msk [vmem:[#allocation0] sm:$0x1] %vm51_vm8, %v50_v20  }
  0x87   :  { %58 = vst.msk [vmem:[#allocation0] sm:$0x1] %vm57_vm9, %v56_v14  }
  0x8c   :  { %v62_v21 = vpop.permute.xlu0 %61   ;;  %v68_v22 = vpop.permute.xlu1 %67  }
  0x8d   :  { %64 = vst.msk [vmem:[#allocation0] sm:$0x1] %vm63_vm10, %v62_v21  }
  0x8e   :  { %70 = vst.msk [vmem:[#allocation0] sm:$0x1] %vm69_vm11, %v68_v22  }
  0x95   :  { %v73_v23 = vld [vmem:[#allocation0] sm:$0x1] }
  0x96   :  { %76 = vst [vmem:[%s160_s1] sm:$0x1] %v73_v23 }

// kernel: tile.13
= control target key start
LH: loop header
LB: loop body
LE: loop exit
PB: predicated region body
PF: predicated region fallthrough
CT: control target
= control target key end

     0   :  { %s28_s0 = inlined_call_operand.vmem [shape: f32[6], index: 0, kind: input, shape index: {}]   ;;  %s29_s1 = inlined_call_operand.vmem [shape: f32[12,6], index: 1, kind: output, shape index: {}]  }
   0x1   :  { %v4_v0 = vld [vmem:[%s28_s0] ss:$0 sm:$0xff] }
   0x2   :  { %5 = vst [vmem:[%s29_s1] sm:$0xff] %v4_v0 }
   0x3   :  { %8 = vst [vmem:[%s29_s1 + $0x8] sm:$0xff] %v4_v0 }

// kernel: tile.18
= control target key start
LH: loop header
LB: loop body
LE: loop exit
PB: predicated region body
PF: predicated region fallthrough
CT: control target
= control target key end

     0   :  { %s22_s0 = inlined_call_operand.vmem [shape: f32[16], index: 0, kind: input, shape index: {}]   ;;  %s23_s1 = inlined_call_operand.vmem [shape: f32[4,16], index: 1, kind: output, shape index: {}]  }
   0x1   :  { %v4_v0 = vld [vmem:[%s22_s0] ss:$0 sm:$0xff] }
   0x2   :  { %5 = vst [vmem:[%s23_s1] sm:$0xf] %v4_v0 }

// kernel: tile.19
= control target key start
LH: loop header
LB: loop body
LE: loop exit
PB: predicated region body
PF: predicated region fallthrough
CT: control target
= control target key end

     0   :  { %s37_s8 = smov 16   ;;  %s38_s9 = smov 32   ;;  %vm7_vm0 = vcmask 130048   ;;  %vm13_vm1 = vcmask 523648   ;;  %vm19_vm2 = vcmask 392448   ;;  %vm25_vm3 = vcmask 261248   ;;  %s55_s0 = inlined_call_operand.vmem [shape: f32[4,16], index: 0, kind: input, shape index: {}]   ;;  %s56_s1 = inlined_call_operand.vmem [shape: f32[64], index: 1, kind: output, shape index: {}]  }
   0x1   :  { %v4_v0 = vld [vmem:[%s55_s0] sm:$0xf]  ;;  %s36_s0 = smov 48  }
   0x2   :  { %5 = vst [vmem:[#allocation1] sm:$0xf] %v4_v0 }
   0x9   :  { %v10_v1 = vld [vmem:[#allocation1 + $0x3] sm:$0x1]   ;;  %v22_v2 = vld [vmem:[#allocation1 + $0x1] sm:$0x1]   ;;  %v16_v3 = vld [vmem:[#allocation1 + $0x2] sm:$0x1]  }
   0xa   :  { %11 = vrot.lane.b32.xlu0 %v10_v1, %s36_s0  ;;  %23 = vrot.lane.b32.xlu1 %v22_v2, %s37_s8  ;;  %v6_v4 = vld [vmem:[#allocation1] sm:$0x1]  }
   0xb   :  { %8 = vst.msk [vmem:[#allocation0] sm:$0x1] %vm7_vm0, %v6_v4  }
  0x12   :  { %17 = vrot.lane.b32.xlu0 %v16_v3, %s38_s9 }
  0x7c   :  { %v12_v5 = vpop.permute.xlu0 %11   ;;  %v24_v6 = vpop.permute.xlu1 %23  }
  0x7d   :  { %14 = vst.msk [vmem:[#allocation0] sm:$0x1] %vm13_vm1, %v12_v5  }
  0x84   :  { %v18_v7 = vpop.permute.xlu0 %17  }
  0x85   :  { %20 = vst.msk [vmem:[#allocation0] sm:$0x1] %vm19_vm2, %v18_v7  }
  0x86   :  { %26 = vst.msk [vmem:[#allocation0] sm:$0x1] %vm25_vm3, %v24_v6  }
  0x8d   :  { %v29_v8 = vld [vmem:[#allocation0] sm:$0x1] }
  0x8e   :  { %32 = vst [vmem:[%s56_s1] sm:$0x1] %v29_v8 }

// kernel: net_forward.1
= control target key start
LH: loop header
LB: loop body
LE: loop exit
PB: predicated region body
PF: predicated region fallthrough
CT: control target
= control target key end

     0   :  { %vm102_vm0 = vcmask 1046528   ;;  %vm183_vm1 = vcmask 1045504   ;;  %vm264_vm2 = vcmask 1044480   ;;  %vm345_vm3 = vcmask 1043456   ;;  %s5562_s1 = inlined_call_operand.vmem [shape: f32[640,256], index: 1, kind: input, shape index: {}]   ;;  %s5563_s0 = inlined_call_operand.vmem [shape: f32[8,28,128], index: 0, kind: input, shape index: {}]   ;;  %s5564_s2 = inlined_call_operand.vmem [shape: f32[1,128], index: 2, kind: input, shape index: {}]   ;;  %s5565_s3 = inlined_call_operand.vmem [shape: f32[640,256], index: 3, kind: input, shape index: {}]   ;;  %s5566_s4 = inlined_call_operand.vmem [shape: f32[1,128], index: 4, kind: input, shape index: {}]   ;;  %s5567_s6 = inlined_call_operand.vmem [shape: f32[1,128], index: 6, kind: input, shape index: {}]   ;;  %s5568_s5 = inlined_call_operand.vmem [shape: f32[512,128], index: 5, kind: input, shape index: {}]   ;;  %s5569_s7 = inlined_call_operand.vmem [shape: f32[128,128], index: 7, kind: input, shape index: {}]   ;;  %s5570_s8 = inlined_call_operand.vmem [shape: f32[1,128], index: 8, kind: input, shape index: {}]   ;;  %s5571_s9 = inlined_call_operand.vmem [shape: f32[128,128], index: 9, kind: input, shape index: {}]   ;;  %s5572_s10 = inlined_call_operand.vmem [shape: f32[1,128], index: 10, kind: input, shape index: {}]   ;;  %s5573_s11 = inlined_call_operand.vmem [shape: f32[8,128], index: 11, kind: output, shape index: {}]  }
   0x1   :  { %v456_v0 = vld [vmem:[%s5562_s1 + $0xf0] sm:$0xff]  ;;  %v454_v3 = vld [vmem:[%s5562_s1 + $0xe0] sm:$0xff]  ;;  %v3048_v52 = vld [vmem:[%s5563_s0 + $0x8] sm:$0xff]  ;;  %vm2486_vm4 = vcmask 1041409   ;;  %vm2489_vm5 = vcmask 1042434   ;;  %vm2492_vm6 = vcmask 1043459  }
   0x2   :  { %v488_v1 = vld [vmem:[%s5562_s1 + $0x1f0] sm:$0xff]  ;;  %586 = vmatpush.msra.mxu0 %v456_v0  ;;  %v486_v4 = vld [vmem:[%s5562_s1 + $0x1e0] sm:$0xff]  ;;  %v104_v60 = vrot.slane %v3048_v52, 1  ;;  %v185_v0 = vrot.slane %v3048_v52, 2  ;;  %vm2495_vm7 = vcmask 1044484   ;;  %vm2498_vm8 = vcmask 1045509  }
   0x3   :  { %v520_v2 = vld [vmem:[%s5562_s1 + $0x2f0] sm:$0xff]  ;;  %675 = vmatpush.msra.mxu1 %v488_v1  ;;  %v518_v5 = vld [vmem:[%s5562_s1 + $0x2e0] sm:$0xff]  ;;  %vm2501_vm9 = vcmask 1046534   ;;  %vm2504_vm10 = vcmask 1047559  }
   0x4   :  { %764 = vmatpush.msra.mxu2 %v520_v2  ;;  %v552_v6 = vld [vmem:[%s5562_s1 + $0x3f0] sm:$0xff]  ;;  %587 = vmatpush.msra.mxu0 %v454_v3  ;;  %v550_v10 = vld [vmem:[%s5562_s1 + $0x3e0] sm:$0xff] }
   0x5   :  { %v452_v7 = vld [vmem:[%s5562_s1 + $0xd0] sm:$0xff]  ;;  %676 = vmatpush.msra.mxu1 %v486_v4  ;;  %853 = vmatpush.msra.mxu3 %v552_v6  ;;  %v450_v11 = vld [vmem:[%s5562_s1 + $0xc0] sm:$0xff]  ;;  %v266_v6 = vrot.slane %v3048_v52, 3 }
   0x6   :  { %v484_v8 = vld [vmem:[%s5562_s1 + $0x1d0] sm:$0xff]  ;;  %765 = vmatpush.msra.mxu2 %v518_v5  ;;  %v482_v12 = vld [vmem:[%s5562_s1 + $0x1c0] sm:$0xff]  ;;  %588 = vmatpush.msra.mxu0 %v452_v7 }
   0x7   :  { %v516_v9 = vld [vmem:[%s5562_s1 + $0x2d0] sm:$0xff]  ;;  %677 = vmatpush.msra.mxu1 %v484_v8  ;;  %v514_v13 = vld [vmem:[%s5562_s1 + $0x2c0] sm:$0xff]  ;;  %854 = vmatpush.msra.mxu3 %v550_v10 }
   0x8   :  { %v548_v14 = vld [vmem:[%s5562_s1 + $0x3d0] sm:$0xff]  ;;  %766 = vmatpush.msra.mxu2 %v516_v9  ;;  %589 = vmatpush.msra.mxu0 %v450_v11  ;;  %v546_v18 = vld [vmem:[%s5562_s1 + $0x3c0] sm:$0xff] }
   0x9   :  { %v448_v15 = vld [vmem:[%s5562_s1 + $0xb0] sm:$0xff]  ;;  %678 = vmatpush.msra.mxu1 %v482_v12  ;;  %855 = vmatpush.msra.mxu3 %v548_v14  ;;  %v446_v19 = vld [vmem:[%s5562_s1 + $0xa0] sm:$0xff]  ;;  %v457_v12 = vld [vmem:[%s5562_s1 + $0xf8] sm:$0xff] }
   0xa   :  { %v480_v16 = vld [vmem:[%s5562_s1 + $0x1b0] sm:$0xff]  ;;  %767 = vmatpush.msra.mxu2 %v514_v13  ;;  %v478_v20 = vld [vmem:[%s5562_s1 + $0x1a0] sm:$0xff]  ;;  %590 = vmatpush.msra.mxu0 %v448_v15 }
   0xb   :  { %v512_v17 = vld [vmem:[%s5562_s1 + $0x2b0] sm:$0xff]  ;;  %679 = vmatpush.msra.mxu1 %v480_v16  ;;  %v510_v21 = vld [vmem:[%s5562_s1 + $0x2a0] sm:$0xff]  ;;  %856 = vmatpush.msra.mxu3 %v546_v18  ;;  %v455_v16 = vld [vmem:[%s5562_s1 + $0xe8] sm:$0xff] }
   0xc   :  { %v544_v22 = vld [vmem:[%s5562_s1 + $0x3b0] sm:$0xff]  ;;  %768 = vmatpush.msra.mxu2 %v512_v17  ;;  %591 = vmatpush.msra.mxu0 %v446_v19  ;;  %v542_v26 = vld [vmem:[%s5562_s1 + $0x3a0] sm:$0xff]  ;;  %v453_v19 = vld [vmem:[%s5562_s1 + $0xd8] sm:$0xff] }
   0xd   :  { %v444_v23 = vld [vmem:[%s5562_s1 + $0x90] sm:$0xff]  ;;  %680 = vmatpush.msra.mxu1 %v478_v20  ;;  %857 = vmatpush.msra.mxu3 %v544_v22  ;;  %v442_v27 = vld [vmem:[%s5562_s1 + $0x80] sm:$0xff] }
   0xe   :  { %v476_v24 = vld [vmem:[%s5562_s1 + $0x190] sm:$0xff]  ;;  %769 = vmatpush.msra.mxu2 %v510_v21  ;;  %v474_v28 = vld [vmem:[%s5562_s1 + $0x180] sm:$0xff]  ;;  %592 = vmatpush.msra.mxu0 %v444_v23 }
   0xf   :  { %v508_v25 = vld [vmem:[%s5562_s1 + $0x290] sm:$0xff]  ;;  %681 = vmatpush.msra.mxu1 %v476_v24  ;;  %v506_v29 = vld [vmem:[%s5562_s1 + $0x280] sm:$0xff]  ;;  %858 = vmatpush.msra.mxu3 %v542_v26  ;;  %v3142_v24 = vld [vmem:[%s5563_s0 + $0x18] sm:$0xf] }
  0x10   :  { %v540_v30 = vld [vmem:[%s5562_s1 + $0x390] sm:$0xff]  ;;  %770 = vmatpush.msra.mxu2 %v508_v25  ;;  %593 = vmatpush.msra.mxu0 %v442_v27  ;;  %v538_v34 = vld [vmem:[%s5562_s1 + $0x380] sm:$0xff]  ;;  %v451_v25 = vld [vmem:[%s5562_s1 + $0xc8] sm:$0xff]  ;;  %v108_v27 = vrot.slane %v3142_v24, 1 }
  0x11   :  { %v440_v31 = vld [vmem:[%s5562_s1 + $0x70] sm:$0xff]  ;;  %682 = vmatpush.msra.mxu1 %v474_v28  ;;  %859 = vmatpush.msra.mxu3 %v540_v30  ;;  %v438_v35 = vld [vmem:[%s5562_s1 + $0x60] sm:$0xff]  ;;  %v189_v28 = vrot.slane %v3142_v24, 2 }
  0x12   :  { %v472_v32 = vld [vmem:[%s5562_s1 + $0x170] sm:$0xff]  ;;  %771 = vmatpush.msra.mxu2 %v506_v29  ;;  %v470_v36 = vld [vmem:[%s5562_s1 + $0x160] sm:$0xff]  ;;  %594 = vmatpush.msra.mxu0 %v440_v31  ;;  %v270_v29 = vrot.slane %v3142_v24, 3 }
  0x13   :  { %v504_v33 = vld [vmem:[%s5562_s1 + $0x270] sm:$0xff]  ;;  %683 = vmatpush.msra.mxu1 %v472_v32  ;;  %v502_v37 = vld [vmem:[%s5562_s1 + $0x260] sm:$0xff]  ;;  %860 = vmatpush.msra.mxu3 %v538_v34 }
  0x14   :  { %v536_v38 = vld [vmem:[%s5562_s1 + $0x370] sm:$0xff]  ;;  %772 = vmatpush.msra.mxu2 %v504_v33  ;;  %595 = vmatpush.msra.mxu0 %v438_v35  ;;  %v534_v42 = vld [vmem:[%s5562_s1 + $0x360] sm:$0xff]  ;;  %v3171_v33 = vld [vmem:[%s5563_s0 + $0x28] sm:$0xff] }
  0x15   :  { %v436_v39 = vld [vmem:[%s5562_s1 + $0x50] sm:$0xff]  ;;  %684 = vmatpush.msra.mxu1 %v470_v36  ;;  %861 = vmatpush.msra.mxu3 %v536_v38  ;;  %v434_v43 = vld [vmem:[%s5562_s1 + $0x40] sm:$0xff]  ;;  %v111_v36 = vrot.slane %v3171_v33, 1 }
  0x16   :  { %v468_v40 = vld [vmem:[%s5562_s1 + $0x150] sm:$0xff]  ;;  %773 = vmatpush.msra.mxu2 %v502_v37  ;;  %v466_v44 = vld [vmem:[%s5562_s1 + $0x140] sm:$0xff]  ;;  %596 = vmatpush.msra.mxu0 %v436_v39  ;;  %v192_v39 = vrot.slane %v3171_v33, 2 }
  0x17   :  { %v500_v41 = vld [vmem:[%s5562_s1 + $0x250] sm:$0xff]  ;;  %685 = vmatpush.msra.mxu1 %v468_v40  ;;  %v498_v45 = vld [vmem:[%s5562_s1 + $0x240] sm:$0xff]  ;;  %862 = vmatpush.msra.mxu3 %v534_v42  ;;  %v449_v40 = vld [vmem:[%s5562_s1 + $0xb8] sm:$0xff]  ;;  %v273_v42 = vrot.slane %v3171_v33, 3 }
  0x18   :  { %v532_v46 = vld [vmem:[%s5562_s1 + $0x350] sm:$0xff]  ;;  %774 = vmatpush.msra.mxu2 %v500_v41  ;;  %597 = vmatpush.msra.mxu0 %v434_v43  ;;  %v530_v50 = vld [vmem:[%s5562_s1 + $0x340] sm:$0xff] }
  0x19   :  { %v432_v47 = vld [vmem:[%s5562_s1 + $0x30] sm:$0xff]  ;;  %686 = vmatpush.msra.mxu1 %v466_v44  ;;  %v38_v51 = vld [vmem:[%s5563_s0] sm:$0xff]  ;;  %863 = vmatpush.msra.mxu3 %v532_v46 }
  0x1a   :  { %v464_v48 = vld [vmem:[%s5562_s1 + $0x130] sm:$0xff]  ;;  %775 = vmatpush.msra.mxu2 %v498_v45  ;;  %v430_v53 = vld [vmem:[%s5562_s1 + $0x20] sm:$0xff]  ;;  %598 = vmatpush.msra.mxu0 %v432_v47  ;;  %v103_v59 = vrot.slane %v38_v51, 1  ;;  %v184_v63 = vrot.slane %v38_v51, 2  ;;  %v265_v5 = vrot.slane %v38_v51, 3 }
  0x1b   :  { %v496_v49 = vld [vmem:[%s5562_s1 + $0x230] sm:$0xff]  ;;  %v462_v54 = vld [vmem:[%s5562_s1 + $0x120] sm:$0xff]  ;;  %687 = vmatpush.msra.mxu1 %v464_v48  ;;  %864 = vmatpush.msra.mxu3 %v530_v50  ;;  %v447_v50 = vld [vmem:[%s5562_s1 + $0xa8] sm:$0xff] }
  0x1c   :  { %v494_v55 = vld [vmem:[%s5562_s1 + $0x220] sm:$0xff]  ;;  %v528_v56 = vld [vmem:[%s5562_s1 + $0x330] sm:$0xff]  ;;  %776 = vmatpush.msra.mxu2 %v496_v49  ;;  %599 = vmatpush.msra.mxu0 %v430_v53  ;;  %v3090_v7 = vsel %vm102_vm0, %v103_v59, %v104_v60  ;;  %v3093_v8 = vsel %vm183_vm1, %v184_v63, %v185_v0  ;;  %v3111_v13 = vsel %vm264_vm2, %v265_v5, %v266_v6  ;;  %v445_v5 = vld [vmem:[%s5562_s1 + $0x98] sm:$0xff] }
  0x1d   :  { %v428_v57 = vld [vmem:[%s5562_s1 + $0x10] sm:$0xff]  ;;  %688 = vmatpush.msra.mxu1 %v462_v54  ;;  %v526_v62 = vld [vmem:[%s5562_s1 + $0x320] sm:$0xff]  ;;  %865 = vmatpush.msra.mxu3 %v528_v56  ;;  %5633 = vst [vmem:[#allocation4_spill] sm:$0xff] %v3111_v13  ;;  %v3228_v54 = vld [vmem:[%s5563_s0 + $0x38] sm:$0xf] }
  0x1e   :  { %v460_v58 = vld [vmem:[%s5562_s1 + $0x110] sm:$0xff]  ;;  %777 = vmatpush.msra.mxu2 %v494_v55  ;;  %v426_v1 = vld [vmem:[%s5562_s1] sm:$0xff]  ;;  %600 = vmatpush.msra.mxu0 %v428_v57  ;;  %v115_v56 = vrot.slane %v3228_v54, 1  ;;  %v196_v57 = vrot.slane %v3228_v54, 2 }
  0x1f   :  { %v492_v61 = vld [vmem:[%s5562_s1 + $0x210] sm:$0xff]  ;;  %v458_v2 = vld [vmem:[%s5562_s1 + $0x100] sm:$0xff]  ;;  %689 = vmatpush.msra.mxu1 %v460_v58  ;;  %866 = vmatpush.msra.mxu3 %v526_v62  ;;  %v277_v58 = vrot.slane %v3228_v54, 3  ;;  %v3254_v62 = vld [vmem:[%s5563_s0 + $0x48] sm:$0xff] }
  0x20   :  { %v490_v3 = vld [vmem:[%s5562_s1 + $0x200] sm:$0xff]  ;;  %v524_v4 = vld [vmem:[%s5562_s1 + $0x310] sm:$0xff]  ;;  %778 = vmatpush.msra.mxu2 %v492_v61  ;;  %601 = vmatpush.msra.mxu0 %v426_v1  ;;  %v118_v1 = vrot.slane %v3254_v62, 1 }
  0x21   :  { %690 = vmatpush.msra.mxu1 %v458_v2  ;;  %v584_v9 = vld [vmem:[%s5562_s1 + $0x4f0] sm:$0xff]  ;;  %867 = vmatpush.msra.mxu3 %v524_v4  ;;  %v522_v11 = vld [vmem:[%s5562_s1 + $0x300] sm:$0xff]  ;;  %v199_v4 = vrot.slane %v3254_v62, 2 }
  0x22   :  { %v3101_v10 = vld [vmem:[%s5563_s0 + $0x10] sm:$0xff]  ;;  %779 = vmatpush.msra.mxu2 %v490_v3  ;;  %602 = vmatmul.f32.vlgmr.msra.gmra.mxu0 %v38_v51  ;;  %v582_v14 = vld [vmem:[%s5562_s1 + $0x4e0] sm:$0xff] }
  0x23   :  { %691 = vmatmul.f32.vlgmr.msra.gmra.mxu1 %v3090_v7  ;;  %780 = vmatmul.f32.vlgmr.msra.gmra.mxu2 %v3093_v8  ;;  %v106_v15 = vrot.slane %v3101_v10, 1  ;;  %v187_v17 = vrot.slane %v3101_v10, 2  ;;  %v580_v18 = vld [vmem:[%s5562_s1 + $0x4d0] sm:$0xff]  ;;  %v268_v20 = vrot.slane %v3101_v10, 3  ;;  %v578_v21 = vld [vmem:[%s5562_s1 + $0x4c0] sm:$0xff] }
  0x24   :  { %942 = vmatpush.msrb.mxu0 %v584_v9  ;;  %868 = vmatpush.msra.mxu3 %v522_v11  ;;  %v3166_v32 = vld [vmem:[%s5563_s0 + $0x20] sm:$0xff]  ;;  %v576_v37 = vld [vmem:[%s5562_s1 + $0x4b0] sm:$0xff]  ;;  %v280_v9 = vrot.slane %v3254_v62, 3 }
  0x25   :  { %1031 = vmatpush.msrb.mxu1 %v457_v12  ;;  %869 = vmatmul.f32.vlgmr.msra.gmra.mxu3 %v3111_v13  ;;  %v3134_v22 = vsel %vm102_vm0, %v104_v60, %v106_v15  ;;  %v3137_v23 = vsel %vm183_vm1, %v185_v0, %v187_v17  ;;  %v3150_v26 = vsel %vm264_vm2, %v266_v6, %v268_v20  ;;  %v110_v35 = vrot.slane %v3166_v32, 1  ;;  %v3201_v45 = vld [vmem:[%s5563_s0 + $0x30] sm:$0xff]  ;;  %v574_v49 = vld [vmem:[%s5562_s1 + $0x4a0] sm:$0xff] }
  0x26   :  { %943 = vmatpush.msrb.mxu0 %v582_v14  ;;  %5634 = vst [vmem:[#allocation5_spill] sm:$0xff] %v3150_v26  ;;  %v3158_v30 = vsel %vm102_vm0, %v106_v15, %v108_v27  ;;  %v3161_v31 = vsel %vm183_vm1, %v187_v17, %v189_v28  ;;  %v3176_v34 = vsel %vm264_vm2, %v268_v20, %v270_v29  ;;  %v191_v38 = vrot.slane %v3166_v32, 2  ;;  %v3249_v61 = vld [vmem:[%s5563_s0 + $0x40] sm:$0xff]  ;;  %v572_v2 = vld [vmem:[%s5562_s1 + $0x490] sm:$0xff]  ;;  %v3311_v27 = vld [vmem:[%s5563_s0 + $0x58] sm:$0xf] }
  0x27   :  { %1032 = vmatpush.msrb.mxu1 %v455_v16  ;;  %5635 = vst [vmem:[#allocation6_spill] sm:$0xff] %v3176_v34  ;;  %v272_v41 = vrot.slane %v3166_v32, 3  ;;  %v3193_v43 = vsel %vm102_vm0, %v110_v35, %v111_v36  ;;  %v113_v47 = vrot.slane %v3201_v45, 1  ;;  %v194_v48 = vrot.slane %v3201_v45, 2  ;;  %v3284_v14 = vld [vmem:[%s5563_s0 + $0x50] sm:$0xff] }
  0x28   :  { %944 = vmatpush.msrb.mxu0 %v580_v18  ;;  %v3196_v44 = vsel %vm183_vm1, %v191_v38, %v192_v39  ;;  %v275_v51 = vrot.slane %v3201_v45, 3  ;;  %v117_v0 = vrot.slane %v3249_v61, 1  ;;  %v198_v3 = vrot.slane %v3249_v61, 2  ;;  %v570_v18 = vld [vmem:[%s5562_s1 + $0x480] sm:$0xff] }
  0x29   :  { %1033 = vmatpush.msrb.mxu1 %v453_v19  ;;  %v3206_v46 = vsel %vm264_vm2, %v272_v41, %v273_v42  ;;  %v3223_v53 = vsel %vm183_vm1, %v192_v39, %v194_v48  ;;  %v3241_v59 = vsel %vm102_vm0, %v113_v47, %v115_v56  ;;  %v3244_v60 = vsel %vm183_vm1, %v194_v48, %v196_v57  ;;  %v443_v19 = vld [vmem:[%s5562_s1 + $0x88] sm:$0xff]  ;;  %v3332_v39 = vld [vmem:[%s5563_s0 + $0x60] sm:$0xff]  ;;  %v568_v48 = vld [vmem:[%s5562_s1 + $0x470] sm:$0xff] }
  0x2a   :  { %945 = vmatpush.msrb.mxu0 %v578_v21  ;;  %5636 = vst [vmem:[#allocation7_spill] sm:$0xff] %v3206_v46  ;;  %v3233_v55 = vsel %vm264_vm2, %v273_v42, %v275_v51  ;;  %v3259_v63 = vsel %vm264_vm2, %v275_v51, %v277_v58  ;;  %v279_v6 = vrot.slane %v3249_v61, 3  ;;  %v3276_v11 = vsel %vm102_vm0, %v117_v0, %v118_v1  ;;  %v441_v51 = vld [vmem:[%s5562_s1 + $0x78] sm:$0xff] }
  0x2b   :  { %605 = vmatmul.f32.gmra.mxu0 %v3048_v52  ;;  %694 = vmatmul.f32.gmra.mxu1 %v3134_v22  ;;  %v3220_v52 = vsel %vm102_vm0, %v111_v36, %v113_v47  ;;  %5637 = vst [vmem:[#allocation8_spill] sm:$0xff] %v3233_v55  ;;  %v3279_v12 = vsel %vm183_vm1, %v198_v3, %v199_v4  ;;  %v120_v16 = vrot.slane %v3284_v14, 1  ;;  %v201_v17 = vrot.slane %v3284_v14, 2 }
  0x2c   :  { %783 = vmatmul.f32.gmra.mxu2 %v3137_v23  ;;  %1034 = vmatpush.msrb.mxu1 %v451_v25  ;;  %5638 = vst [vmem:[#allocation9_spill] sm:$0xff] %v3259_v63  ;;  %v3289_v15 = vsel %vm264_vm2, %v279_v6, %v280_v9  ;;  %v282_v20 = vrot.slane %v3284_v14, 3  ;;  %v122_v29 = vrot.slane %v3311_v27, 1  ;;  %v203_v35 = vrot.slane %v3311_v27, 2  ;;  %v439_v6 = vld [vmem:[%s5562_s1 + $0x68] sm:$0xff] }
  0x2d   :  { %872 = vmatmul.f32.gmra.mxu3 %v3150_v26  ;;  %946 = vmatpush.msrb.mxu0 %v576_v37  ;;  %5639 = vst [vmem:[#allocation10_spill] sm:$0xff] %v3289_v15  ;;  %v3303_v21 = vsel %vm102_vm0, %v118_v1, %v120_v16  ;;  %v3306_v25 = vsel %vm183_vm1, %v199_v4, %v201_v17  ;;  %v284_v36 = vrot.slane %v3311_v27, 3  ;;  %v124_v42 = vrot.slane %v3332_v39, 1  ;;  %v3367_v1 = vld [vmem:[%s5563_s0 + $0x70] sm:$0xff] }
  0x2e   :  { %1035 = vmatpush.msrb.mxu1 %v449_v40  ;;  %v3316_v28 = vsel %vm264_vm2, %v280_v9, %v282_v20  ;;  %v3324_v37 = vsel %vm102_vm0, %v120_v16, %v122_v29  ;;  %v3327_v38 = vsel %vm183_vm1, %v201_v17, %v203_v35  ;;  %v3337_v40 = vld [vmem:[%s5563_s0 + $0x68] sm:$0xff]  ;;  %v286_v56 = vrot.slane %v3332_v39, 3 }
  0x2f   :  { %947 = vmatpush.msrb.mxu0 %v574_v49  ;;  %5640 = vst [vmem:[#allocation11_spill] sm:$0xff] %v3316_v28  ;;  %v3342_v41 = vsel %vm264_vm2, %v282_v20, %v284_v36  ;;  %v125_v47 = vrot.slane %v3337_v40, 1  ;;  %v205_v49 = vrot.slane %v3332_v39, 2  ;;  %v287_v57 = vrot.slane %v3337_v40, 3 }
  0x30   :  { %1036 = vmatpush.msrb.mxu1 %v447_v50  ;;  %5641 = vst [vmem:[#allocation12_spill] sm:$0xff] %v3342_v41  ;;  %v206_v50 = vrot.slane %v3337_v40, 2  ;;  %v127_v3 = vrot.slane %v3367_v1, 1  ;;  %v208_v4 = vrot.slane %v3367_v1, 2  ;;  %v289_v9 = vrot.slane %v3367_v1, 3 }
  0x31   :  { %948 = vmatpush.msrb.mxu0 %v572_v2  ;;  %v3359_v58 = vsel %vm102_vm0, %v124_v42, %v125_v47  ;;  %v3372_v2 = vsel %vm264_vm2, %v286_v56, %v287_v57  ;;  %v564_v56 = vld [vmem:[%s5562_s1 + $0x450] sm:$0xff] }
  0x32   :  { %1037 = vmatpush.msrb.mxu1 %v445_v5  ;;  %v3362_v0 = vsel %vm183_vm1, %v205_v49, %v206_v50  ;;  %5642 = vst [vmem:[#allocation13_spill] sm:$0xff] %v3372_v2  ;;  %v566_v5 = vld [vmem:[%s5562_s1 + $0x460] sm:$0xff]  ;;  %v3386_v16 = vsel %vm102_vm0, %v125_v47, %v127_v3  ;;  %v3389_v17 = vsel %vm183_vm1, %v206_v50, %v208_v4 }
  0x33   :  { %608 = vmatmul.f32.gmra.mxu0 %v3101_v10  ;;  %697 = vmatmul.f32.gmra.mxu1 %v3158_v30  ;;  %v3415_v47 = vld [vmem:[%s5563_s0 + $0x80] sm:$0xff] }
  0x34   :  { %786 = vmatmul.f32.gmra.mxu2 %v3161_v31  ;;  %949 = vmatpush.msrb.mxu0 %v570_v18  ;;  %v3394_v18 = vld [vmem:[%s5563_s0 + $0x78] sm:$0xf]  ;;  %v131_v50 = vrot.slane %v3415_v47, 1 }
  0x35   :  { %875 = vmatmul.f32.gmra.mxu3 %v3176_v34  ;;  %1038 = vmatpush.msrb.mxu1 %v443_v19  ;;  %v3399_v19 = vsel %vm264_vm2, %v287_v57, %v289_v9  ;;  %v129_v20 = vrot.slane %v3394_v18, 1  ;;  %v210_v29 = vrot.slane %v3394_v18, 2  ;;  %v291_v35 = vrot.slane %v3394_v18, 3 }
  0x36   :  { %950 = vmatpush.msrb.mxu0 %v568_v48  ;;  %5643 = vst [vmem:[#allocation14_spill] sm:$0xff] %v3399_v19  ;;  %v3420_v48 = vld [vmem:[%s5563_s0 + $0x88] sm:$0xff]  ;;  %v212_v57 = vrot.slane %v3415_v47, 2 }
  0x37   :  { %1039 = vmatpush.msrb.mxu1 %v441_v51  ;;  %v3407_v36 = vsel %vm102_vm0, %v127_v3, %v129_v20  ;;  %v3410_v42 = vsel %vm183_vm1, %v208_v4, %v210_v29  ;;  %v3425_v49 = vsel %vm264_vm2, %v289_v9, %v291_v35  ;;  %v132_v51 = vrot.slane %v3420_v48, 1  ;;  %v437_v4 = vld [vmem:[%s5562_s1 + $0x58] sm:$0xff]  ;;  %v3450_v29 = vld [vmem:[%s5563_s0 + $0x90] sm:$0xff] }
  0x38   :  { %951 = vmatpush.msrb.mxu0 %v566_v5  ;;  %5644 = vst [vmem:[#allocation15_spill] sm:$0xff] %v3425_v49  ;;  %v213_v3 = vrot.slane %v3420_v48, 2  ;;  %v293_v5 = vrot.slane %v3415_v47, 3 }
  0x39   :  { %1040 = vmatpush.msrb.mxu1 %v439_v6  ;;  %v294_v6 = vrot.slane %v3420_v48, 3  ;;  %v3442_v9 = vsel %vm102_vm0, %v131_v50, %v132_v51  ;;  %v134_v50 = vrot.slane %v3450_v29, 1 }
  0x3a   :  { %952 = vmatpush.msrb.mxu0 %v564_v56  ;;  %v3445_v20 = vsel %vm183_vm1, %v212_v57, %v213_v3  ;;  %v215_v56 = vrot.slane %v3450_v29, 2  ;;  %v296_v57 = vrot.slane %v3450_v29, 3 }
  0x3b   :  { %611 = vmatmul.f32.gmra.mxu0 %v3166_v32  ;;  %700 = vmatmul.f32.gmra.mxu1 %v3193_v43  ;;  %5645 = vst [vmem:[#allocation16_spill] sm:$0xff] %v3445_v20  ;;  %v3455_v35 = vsel %vm264_vm2, %v293_v5, %v294_v6 }
  0x3c   :  { %789 = vmatmul.f32.gmra.mxu2 %v3196_v44  ;;  %1041 = vmatpush.msrb.mxu1 %v437_v4  ;;  %5646 = vst [vmem:[#allocation17_spill] sm:$0xff] %v3455_v35  ;;  %v3463_v4 = vsel %vm102_vm0, %v132_v51, %v134_v50  ;;  %v3469_v5 = vsel %vm183_vm1, %v213_v3, %v215_v56 }
  0x3d   :  { %878 = vmatmul.f32.gmra.mxu3 %v3206_v46  ;;  %5647 = vst [vmem:[#allocation18_spill] sm:$0xff] %v3463_v4  ;;  %v3482_v51 = vsel %vm264_vm2, %v294_v6, %v296_v57  ;;  %v3498_v6 = vld [vmem:[%s5563_s0 + $0xa0] sm:$0xff] }
  0x3e   :  { %5648 = vst [vmem:[#allocation19_spill] sm:$0xff] %v3469_v5 }
  0x3f   :  { %5650 = vst [vmem:[#allocation21_spill] sm:$0xff] %v3482_v51 }
  0x40   :  { %5653 = vst [vmem:[#allocation24_spill] sm:$0xff] %v3498_v6 }
  0x43   :  { %614 = vmatmul.f32.gmra.mxu0 %v3171_v33  ;;  %703 = vmatmul.f32.gmra.mxu1 %v3220_v52 }
  0x44   :  { %792 = vmatmul.f32.gmra.mxu2 %v3223_v53 }
  0x45   :  { %881 = vmatmul.f32.gmra.mxu3 %v3233_v55 }
  0x4b   :  { %617 = vmatmul.f32.gmra.mxu0 %v3201_v45  ;;  %706 = vmatmul.f32.gmra.mxu1 %v3241_v59 }
  0x4c   :  { %795 = vmatmul.f32.gmra.mxu2 %v3244_v60 }
  0x4d   :  { %884 = vmatmul.f32.gmra.mxu3 %v3259_v63 }
  0x53   :  { %620 = vmatmul.f32.gmra.mxu0 %v3249_v61  ;;  %709 = vmatmul.f32.gmra.mxu1 %v3276_v11 }
  0x54   :  { %798 = vmatmul.f32.gmra.mxu2 %v3279_v12 }
  0x55   :  { %887 = vmatmul.f32.gmra.mxu3 %v3289_v15 }
  0x5b   :  { %623 = vmatmul.f32.gmra.mxu0 %v3254_v62  ;;  %712 = vmatmul.f32.gmra.mxu1 %v3303_v21 }
  0x5c   :  { %801 = vmatmul.f32.gmra.mxu2 %v3306_v25 }
  0x5d   :  { %890 = vmatmul.f32.gmra.mxu3 %v3316_v28 }
  0x63   :  { %626 = vmatmul.f32.gmra.mxu0 %v3284_v14  ;;  %715 = vmatmul.f32.gmra.mxu1 %v3324_v37 }
  0x64   :  { %804 = vmatmul.f32.gmra.mxu2 %v3327_v38 }
  0x65   :  { %893 = vmatmul.f32.gmra.mxu3 %v3342_v41 }
  0x6b   :  { %629 = vmatmul.f32.gmra.mxu0 %v3332_v39  ;;  %718 = vmatmul.f32.gmra.mxu1 %v3359_v58 }
  0x6c   :  { %807 = vmatmul.f32.gmra.mxu2 %v3362_v0 }
  0x6d   :  { %896 = vmatmul.f32.gmra.mxu3 %v3372_v2 }
  0x73   :  { %632 = vmatmul.f32.gmra.mxu0 %v3337_v40  ;;  %721 = vmatmul.f32.gmra.mxu1 %v3386_v16 }
  0x74   :  { %810 = vmatmul.f32.gmra.mxu2 %v3389_v17 }
  0x75   :  { %899 = vmatmul.f32.gmra.mxu3 %v3399_v19  ;;  %v3474_v19 = vld [vmem:[%s5563_s0 + $0x98] sm:$0xf] }
  0x76   :  { %5649 = vst [vmem:[#allocation20_spill] sm:$0xff] %v3474_v19  ;;  %v136_v3 = vrot.slane %v3474_v19, 1  ;;  %v217_v2 = vrot.slane %v3474_v19, 2 }
  0x78   :  { %v3490_v41 = vsel %vm102_vm0, %v134_v50, %v136_v3  ;;  %v3493_v28 = vsel %vm183_vm1, %v215_v56, %v217_v2  ;;  %v138_v2 = vrot.slane %v3498_v6, 1  ;;  %v560_v3 = vld [vmem:[%s5562_s1 + $0x430] sm:$0xff] }
  0x79   :  { %5651 = vst [vmem:[#allocation22_spill] sm:$0xff] %v3490_v41 }
  0x7a   :  { %5652 = vst [vmem:[#allocation23_spill] sm:$0xff] %v3493_v28 }
  0x7b   :  { %635 = vmatmul.f32.gmra.mxu0 %v3367_v1  ;;  %724 = vmatmul.f32.gmra.mxu1 %v3407_v36 }
  0x7c   :  { %813 = vmatmul.f32.gmra.mxu2 %v3410_v42 }
  0x7d   :  { %902 = vmatmul.f32.gmra.mxu3 %v3425_v49  ;;  %v562_v49 = vld [vmem:[%s5562_s1 + $0x440] sm:$0xff] }
  0x7e   :  { %953 = vmatpush.msrb.mxu0 %v562_v49  ;;  %v298_v49 = vrot.slane %v3474_v19, 3 }
  0x80   :  { %v3508_v50 = vsel %vm264_vm2, %v296_v57, %v298_v49  ;;  %954 = vmatpush.msrb.mxu0 %v560_v3  ;;  %v433_v57 = vld [vmem:[%s5562_s1 + $0x38] sm:$0xff]  ;;  %v300_v49 = vrot.slane %v3498_v6, 3  ;;  %v3533_v3 = vld [vmem:[%s5563_s0 + $0xb0] sm:$0xff] }
  0x81   :  { %5655 = vst [vmem:[#allocation26_spill] sm:$0xff] %v3508_v50 }
  0x82   :  { %5658 = vst [vmem:[#allocation29_spill] sm:$0xff] %v3533_v3 }
  0x83   :  { %638 = vmatmul.f32.gmra.mxu0 %v3415_v47  ;;  %727 = vmatmul.f32.gmra.mxu1 %v3442_v9 }
  0x84   :  { %816 = vmatmul.f32.gmra.mxu2 %v3445_v20  ;;  %v3651_v20 = vld [vmem:[%s5563_s0 + $0xd0] sm:$0xff] }
  0x85   :  { %905 = vmatmul.f32.gmra.mxu3 %v3455_v35  ;;  %v435_v35 = vld [vmem:[%s5562_s1 + $0x48] sm:$0xff]  ;;  %5672 = vst [vmem:[#allocation43_spill] sm:$0xff] %v3651_v20 }
  0x86   :  { %1042 = vmatpush.msrb.mxu1 %v435_v35  ;;  %v3503_v35 = vld [vmem:[%s5563_s0 + $0xa8] sm:$0xff] }
  0x87   :  { %5654 = vst [vmem:[#allocation25_spill] sm:$0xff] %v3503_v35  ;;  %v139_v56 = vrot.slane %v3503_v35, 1  ;;  %v220_v15 = vrot.slane %v3503_v35, 2  ;;  %v301_v63 = vrot.slane %v3503_v35, 3 }
  0x88   :  { %1043 = vmatpush.msrb.mxu1 %v433_v57  ;;  %v222_v57 = vrot.slane %v3533_v3, 2 }
  0x89   :  { %v3525_v55 = vsel %vm102_vm0, %v138_v2, %v139_v56  ;;  %v141_v2 = vrot.slane %v3533_v3, 1 }
  0x8a   :  { %5656 = vst [vmem:[#allocation27_spill] sm:$0xff] %v3525_v55 }
  0x8b   :  { %641 = vmatmul.f32.gmra.mxu0 %v3420_v48  ;;  %730 = vmatmul.f32.gmra.mxu1 %v3463_v4  ;;  %v3546_v13 = vsel %vm102_vm0, %v139_v56, %v141_v2 }
  0x8c   :  { %819 = vmatmul.f32.gmra.mxu2 %v3469_v5  ;;  %5660 = vst [vmem:[#allocation31_spill] sm:$0xff] %v3546_v13 }
  0x8d   :  { %908 = vmatmul.f32.gmra.mxu3 %v3482_v51  ;;  %v219_v51 = vrot.slane %v3498_v6, 2 }
  0x8f   :  { %v3528_v46 = vsel %vm183_vm1, %v219_v51, %v220_v15  ;;  %v303_v51 = vrot.slane %v3533_v3, 3 }
  0x90   :  { %5657 = vst [vmem:[#allocation28_spill] sm:$0xff] %v3528_v46 }
  0x91   :  { %v3565_v56 = vsel %vm264_vm2, %v301_v63, %v303_v51 }
  0x92   :  { %5663 = vst [vmem:[#allocation34_spill] sm:$0xff] %v3565_v56 }
  0x93   :  { %644 = vmatmul.f32.gmra.mxu0 %v3450_v29  ;;  %733 = vmatmul.f32.gmra.mxu1 %v3490_v41 }
  0x94   :  { %822 = vmatmul.f32.gmra.mxu2 %v3493_v28 }
  0x95   :  { %911 = vmatmul.f32.gmra.mxu3 %v3508_v50  ;;  %v3538_v50 = vsel %vm264_vm2, %v300_v49, %v301_v63  ;;  %v558_v49 = vld [vmem:[%s5562_s1 + $0x420] sm:$0xff]  ;;  %v487_v63 = vld [vmem:[%s5562_s1 + $0x1e8] sm:$0xff] }
  0x96   :  { %5659 = vst [vmem:[#allocation30_spill] sm:$0xff] %v3538_v50  ;;  %955 = vmatpush.msrb.mxu0 %v558_v49  ;;  %v489_v49 = vld [vmem:[%s5562_s1 + $0x1f8] sm:$0xff] }
  0x97   :  { %1120 = vmatpush.msrb.mxu2 %v489_v49  ;;  %v519_v49 = vld [vmem:[%s5562_s1 + $0x2e8] sm:$0xff] }
  0x99   :  { %1121 = vmatpush.msrb.mxu2 %v487_v63  ;;  %v481_v63 = vld [vmem:[%s5562_s1 + $0x1b8] sm:$0xff] }
  0x9b   :  { %647 = vmatmul.f32.gmra.mxu0 %v3498_v6  ;;  %736 = vmatmul.f32.gmra.mxu1 %v3525_v55  ;;  %v3552_v55 = vsel %vm183_vm1, %v220_v15, %v222_v57 }
  0x9c   :  { %825 = vmatmul.f32.gmra.mxu2 %v3528_v46  ;;  %5661 = vst [vmem:[#allocation32_spill] sm:$0xff] %v3552_v55  ;;  %v3557_v46 = vld [vmem:[%s5563_s0 + $0xb8] sm:$0xf] }
  0x9d   :  { %914 = vmatmul.f32.gmra.mxu3 %v3538_v50  ;;  %5662 = vst [vmem:[#allocation33_spill] sm:$0xff] %v3557_v46  ;;  %v431_v50 = vld [vmem:[%s5562_s1 + $0x28] sm:$0xff]  ;;  %v143_v15 = vrot.slane %v3557_v46, 1  ;;  %v224_v28 = vrot.slane %v3557_v46, 2 }
  0x9e   :  { %1044 = vmatpush.msrb.mxu1 %v431_v50  ;;  %v305_v50 = vrot.slane %v3557_v46, 3 }
  0x9f   :  { %v603_v34 = vpop.f32.mrf.mxu0  ;;  %v3591_v19 = vsel %vm183_vm1, %v222_v57, %v224_v28  ;;  %v517_v28 = vld [vmem:[%s5562_s1 + $0x2d8] sm:$0xff] }
  0xa0   :  { %v692_v26 = vpop.f32.mrf.mxu1  ;;  %5665 = vst [vmem:[#allocation36_spill] sm:$0xff] %v3591_v19  ;;  %v3614_v57 = vsel %vm264_vm2, %v303_v51, %v305_v50  ;;  %v515_v51 = vld [vmem:[%s5562_s1 + $0x2c8] sm:$0xff] }
  0xa1   :  { %v693_v6 = vadd.f32 %v692_v26, %v603_v34  ;;  %v3582_v26 = vsel %vm102_vm0, %v141_v2, %v143_v15  ;;  %v485_v34 = vld [vmem:[%s5562_s1 + $0x1d8] sm:$0xff]  ;;  %v483_v2 = vld [vmem:[%s5562_s1 + $0x1c8] sm:$0xff]  ;;  %5669 = vst [vmem:[#allocation40_spill] sm:$0xff] %v3614_v57  ;;  %v556_v15 = vld [vmem:[%s5562_s1 + $0x410] sm:$0xff] }
  0xa2   :  { %5664 = vst [vmem:[#allocation35_spill] sm:$0xff] %v3582_v26  ;;  %1122 = vmatpush.msrb.mxu2 %v485_v34  ;;  %956 = vmatpush.msrb.mxu0 %v556_v15 }
  0xa3   :  { %650 = vmatmul.f32.gmra.mxu0 %v3503_v35  ;;  %739 = vmatmul.f32.gmra.mxu1 %v3546_v13 }
  0xa4   :  { %828 = vmatmul.f32.gmra.mxu2 %v3552_v55  ;;  %v521_v55 = vld [vmem:[%s5562_s1 + $0x2f8] sm:$0xff] }
  0xa5   :  { %917 = vmatmul.f32.gmra.mxu3 %v3565_v56  ;;  %1123 = vmatpush.msrb.mxu2 %v483_v2 }
  0xa6   :  { %v781_v13 = vpop.f32.mrf.mxu2  ;;  %1209 = vmatpush.msrb.mxu3 %v521_v55  ;;  %v3601_v55 = vld [vmem:[%s5563_s0 + $0xc8] sm:$0xff] }
  0xa7   :  { %v782_v35 = vadd.f32 %v781_v13, %v693_v6  ;;  %v3596_v13 = vld [vmem:[%s5563_s0 + $0xc0] sm:$0xff]  ;;  %5667 = vst [vmem:[#allocation38_spill] sm:$0xff] %v3601_v55  ;;  %v227_v34 = vrot.slane %v3601_v55, 2  ;;  %v308_v2 = vrot.slane %v3601_v55, 3  ;;  %1124 = vmatpush.msrb.mxu2 %v481_v63 }
  0xa8   :  { %v606_v41 = vpop.f32.mrf.mxu0  ;;  %v695_v5 = vpop.f32.mrf.mxu1  ;;  %5666 = vst [vmem:[#allocation37_spill] sm:$0xff] %v3596_v13  ;;  %1210 = vmatpush.msrb.mxu3 %v519_v49  ;;  %v226_v50 = vrot.slane %v3596_v13, 2  ;;  %v307_v46 = vrot.slane %v3596_v13, 3 }
  0xa9   :  { %v870_v56 = vpop.f32.mrf.mxu3  ;;  %v696_v49 = vadd.f32 %v695_v5, %v606_v41 }
  0xaa   :  { %v3603_v6 = vadd.f32 %v870_v56, %v782_v35  ;;  %v145_v35 = vrot.slane %v3596_v13, 1  ;;  %v146_v56 = vrot.slane %v3601_v55, 1  ;;  %1211 = vmatpush.msrb.mxu3 %v517_v28  ;;  %v429_v28 = vld [vmem:[%s5562_s1 + $0x18] sm:$0xff]  ;;  %v3646_v4 = vsel %vm183_vm1, %v226_v50, %v227_v34 }
  0xab   :  { %653 = vmatmul.f32.gmra.mxu0 %v3533_v3  ;;  %742 = vmatmul.f32.gmra.mxu1 %v3582_v26  ;;  %5671 = vst [vmem:[#allocation42_spill] sm:$0xff] %v3646_v4  ;;  %v229_v50 = vrot.slane %v3651_v20, 2 }
  0xac   :  { %5668 = vst [vmem:[#allocation39_spill] sm:$0xff] %v3603_v6  ;;  %831 = vmatmul.f32.gmra.mxu2 %v3591_v19  ;;  %v479_v6 = vld [vmem:[%s5562_s1 + $0x1a8] sm:$0xff]  ;;  %v513_v19 = vld [vmem:[%s5562_s1 + $0x2b8] sm:$0xff]  ;;  %1212 = vmatpush.msrb.mxu3 %v515_v51  ;;  %v3664_v51 = vsel %vm264_vm2, %v307_v46, %v308_v2 }
  0xad   :  { %920 = vmatmul.f32.gmra.mxu3 %v3614_v57  ;;  %v3643_v57 = vsel %vm102_vm0, %v145_v35, %v146_v56  ;;  %1045 = vmatpush.msrb.mxu1 %v429_v28  ;;  %v477_v35 = vld [vmem:[%s5562_s1 + $0x198] sm:$0xff]  ;;  %5674 = vst [vmem:[#allocation45_spill] sm:$0xff] %v3664_v51  ;;  %v507_v28 = vld [vmem:[%s5562_s1 + $0x288] sm:$0xff] }
  0xae   :  { %5670 = vst [vmem:[#allocation41_spill] sm:$0xff] %v3643_v57  ;;  %1125 = vmatpush.msrb.mxu2 %v479_v6  ;;  %1213 = vmatpush.msrb.mxu3 %v513_v19  ;;  %v148_v19 = vrot.slane %v3651_v20, 1  ;;  %v509_v6 = vld [vmem:[%s5562_s1 + $0x298] sm:$0xff] }
  0xaf   :  { %v784_v26 = vpop.f32.mrf.mxu2  ;;  %v473_v46 = vld [vmem:[%s5562_s1 + $0x178] sm:$0xff] }
  0xb0   :  { %v785_v41 = vadd.f32 %v784_v26, %v696_v49  ;;  %v609_v5 = vpop.f32.mrf.mxu0  ;;  %v698_v15 = vpop.f32.mrf.mxu1  ;;  %v511_v26 = vld [vmem:[%s5562_s1 + $0x2a8] sm:$0xff]  ;;  %1126 = vmatpush.msrb.mxu2 %v477_v35 }
  0xb1   :  { %v873_v3 = vpop.f32.mrf.mxu3  ;;  %1214 = vmatpush.msrb.mxu3 %v511_v26  ;;  %v699_v49 = vadd.f32 %v698_v15, %v609_v5  ;;  %v310_v26 = vrot.slane %v3651_v20, 3  ;;  %v3684_v5 = vsel %vm102_vm0, %v146_v56, %v148_v19  ;;  %v554_v15 = vld [vmem:[%s5562_s1 + $0x400] sm:$0xff]  ;;  %v505_v56 = vld [vmem:[%s5562_s1 + $0x278] sm:$0xff] }
  0xb2   :  { %v3656_v63 = vadd.f32 %v873_v3, %v785_v41  ;;  %v475_v3 = vld [vmem:[%s5562_s1 + $0x188] sm:$0xff]  ;;  %5675 = vst [vmem:[#allocation46_spill] sm:$0xff] %v3684_v5  ;;  %957 = vmatpush.msrb.mxu0 %v554_v15 }
  0xb3   :  { %656 = vmatmul.f32.gmra.mxu0 %v3596_v13  ;;  %745 = vmatmul.f32.gmra.mxu1 %v3643_v57  ;;  %v3695_v13 = vld [vmem:[%s5563_s0 + $0xd8] sm:$0xf] }
  0xb4   :  { %5673 = vst [vmem:[#allocation44_spill] sm:$0xff] %v3656_v63  ;;  %834 = vmatmul.f32.gmra.mxu2 %v3646_v4  ;;  %1215 = vmatpush.msrb.mxu3 %v509_v6  ;;  %v471_v6 = vld [vmem:[%s5562_s1 + $0x168] sm:$0xff] }
  0xb5   :  { %923 = vmatmul.f32.gmra.mxu3 %v3664_v51  ;;  %1127 = vmatpush.msrb.mxu2 %v475_v3  ;;  %v3690_v51 = vsel %vm183_vm1, %v227_v34, %v229_v50  ;;  %5677 = vst [vmem:[#allocation48_spill] sm:$0xff] %v3695_v13  ;;  %v427_v34 = vld [vmem:[%s5562_s1 + $0x8] sm:$0xff] }
  0xb6   :  { %5676 = vst [vmem:[#allocation47_spill] sm:$0xff] %v3690_v51  ;;  %1216 = vmatpush.msrb.mxu3 %v507_v28  ;;  %v503_v28 = vld [vmem:[%s5562_s1 + $0x268] sm:$0xff]  ;;  %1046 = vmatpush.msrb.mxu1 %v427_v34 }
  0xb7   :  { %v787_v41 = vpop.f32.mrf.mxu2  ;;  %1128 = vmatpush.msrb.mxu2 %v473_v46  ;;  %v469_v46 = vld [vmem:[%s5562_s1 + $0x158] sm:$0xff] }
  0xb8   :  { %v788_v63 = vadd.f32 %v787_v41, %v699_v49  ;;  %v612_v4 = vpop.f32.mrf.mxu0  ;;  %v701_v57 = vpop.f32.mrf.mxu1  ;;  %v3711_v49 = vsel %vm264_vm2, %v308_v2, %v310_v26  ;;  %1217 = vmatpush.msrb.mxu3 %v505_v56  ;;  %v231_v41 = vrot.slane %v3695_v13, 2  ;;  %v467_v2 = vld [vmem:[%s5562_s1 + $0x148] sm:$0xff] }
  0xb9   :  { %v876_v35 = vpop.f32.mrf.mxu3  ;;  %5679 = vst [vmem:[#allocation50_spill] sm:$0xff] %v3711_v49  ;;  %1129 = vmatpush.msrb.mxu2 %v471_v6  ;;  %v702_v15 = vadd.f32 %v701_v57, %v612_v4 }
  0xba   :  { %v3700_v3 = vadd.f32 %v876_v35, %v788_v63  ;;  %v150_v63 = vrot.slane %v3695_v13, 1  ;;  %v501_v35 = vld [vmem:[%s5562_s1 + $0x258] sm:$0xff]  ;;  %1218 = vmatpush.msrb.mxu3 %v503_v28  ;;  %v3734_v34 = vsel %vm183_vm1, %v229_v50, %v231_v41 }
  0xbb   :  { %659 = vmatmul.f32.gmra.mxu0 %v3601_v55  ;;  %748 = vmatmul.f32.gmra.mxu1 %v3684_v5  ;;  %5681 = vst [vmem:[#allocation52_spill] sm:$0xff] %v3734_v34  ;;  %v465_v50 = vld [vmem:[%s5562_s1 + $0x138] sm:$0xff]  ;;  %v3794_v55 = vld [vmem:[%s5563_s0 + $0xf0] sm:$0xff] }
  0xbc   :  { %5678 = vst [vmem:[#allocation49_spill] sm:$0xff] %v3700_v3  ;;  %837 = vmatmul.f32.gmra.mxu2 %v3690_v51  ;;  %v312_v3 = vrot.slane %v3695_v13, 3  ;;  %v3731_v4 = vsel %vm102_vm0, %v148_v19, %v150_v63  ;;  %1219 = vmatpush.msrb.mxu3 %v501_v35  ;;  %v499_v19 = vld [vmem:[%s5562_s1 + $0x248] sm:$0xff] }
  0xbd   :  { %926 = vmatmul.f32.gmra.mxu3 %v3711_v49  ;;  %1130 = vmatpush.msrb.mxu2 %v469_v46  ;;  %5680 = vst [vmem:[#allocation51_spill] sm:$0xff] %v3731_v4  ;;  %v3739_v49 = vld [vmem:[%s5563_s0 + $0xe0] sm:$0xff]  ;;  %v3744_v46 = vld [vmem:[%s5563_s0 + $0xe8] sm:$0xff] }
  0xbe   :  { %5682 = vst [vmem:[#allocation53_spill] sm:$0xff] %v3744_v46  ;;  %v3757_v28 = vsel %vm264_vm2, %v310_v26, %v312_v3  ;;  %v152_v41 = vrot.slane %v3739_v49, 1  ;;  %1220 = vmatpush.msrb.mxu3 %v499_v19  ;;  %v553_v26 = vld [vmem:[%s5562_s1 + $0x3f8] sm:$0xff]  ;;  %v233_v3 = vrot.slane %v3739_v49, 2  ;;  %v234_v35 = vrot.slane %v3744_v46, 2  ;;  %v495_v19 = vld [vmem:[%s5562_s1 + $0x228] sm:$0xff] }
  0xbf   :  { %v790_v56 = vpop.f32.mrf.mxu2  ;;  %1131 = vmatpush.msrb.mxu2 %v467_v2  ;;  %5684 = vst [vmem:[#allocation55_spill] sm:$0xff] %v3757_v28  ;;  %v497_v2 = vld [vmem:[%s5562_s1 + $0x238] sm:$0xff]  ;;  %1298 = vmatpush.msra.mxu0 %v553_v26 }
  0xc0   :  { %v791_v51 = vadd.f32 %v790_v56, %v702_v15  ;;  %v615_v5 = vpop.f32.mrf.mxu0  ;;  %v704_v6 = vpop.f32.mrf.mxu1  ;;  %v153_v15 = vrot.slane %v3744_v46, 1  ;;  %1221 = vmatpush.msrb.mxu3 %v497_v2  ;;  %v155_v2 = vrot.slane %v3794_v55, 1 }
  0xc1   :  { %v879_v57 = vpop.f32.mrf.mxu3  ;;  %1132 = vmatpush.msrb.mxu2 %v465_v50  ;;  %v705_v56 = vadd.f32 %v704_v6, %v615_v5  ;;  %v315_v50 = vrot.slane %v3744_v46, 3 }
  0xc2   :  { %v3749_v63 = vadd.f32 %v879_v57, %v791_v51  ;;  %v463_v51 = vld [vmem:[%s5562_s1 + $0x128] sm:$0xff]  ;;  %v461_v57 = vld [vmem:[%s5562_s1 + $0x118] sm:$0xff]  ;;  %1222 = vmatpush.msrb.mxu3 %v495_v19  ;;  %v317_v19 = vrot.slane %v3794_v55, 3 }
  0xc3   :  { %662 = vmatmul.f32.gmra.mxu0 %v3651_v20  ;;  %751 = vmatmul.f32.gmra.mxu1 %v3731_v4  ;;  %v314_v4 = vrot.slane %v3739_v49, 3  ;;  %v3789_v20 = vsel %vm183_vm1, %v233_v3, %v234_v35  ;;  %v236_v3 = vrot.slane %v3794_v55, 2 }
  0xc4   :  { %5683 = vst [vmem:[#allocation54_spill] sm:$0xff] %v3749_v63  ;;  %840 = vmatmul.f32.gmra.mxu2 %v3734_v34  ;;  %v585_v63 = vld [vmem:[%s5562_s1 + $0x4f8] sm:$0xff] }
  0xc5   :  { %929 = vmatmul.f32.gmra.mxu3 %v3757_v28  ;;  %1133 = vmatpush.msrb.mxu2 %v463_v51  ;;  %v3786_v28 = vsel %vm102_vm0, %v152_v41, %v153_v15  ;;  %5686 = vst [vmem:[#allocation57_spill] sm:$0xff] %v3789_v20  ;;  %v3807_v41 = vsel %vm264_vm2, %v314_v4, %v315_v50 }
  0xc6   :  { %5685 = vst [vmem:[#allocation56_spill] sm:$0xff] %v3786_v28  ;;  %1387 = vmatpush.msra.mxu1 %v585_v63  ;;  %v459_v63 = vld [vmem:[%s5562_s1 + $0x108] sm:$0xff] }
  0xc7   :  { %v793_v34 = vpop.f32.mrf.mxu2  ;;  %1134 = vmatpush.msrb.mxu2 %v461_v57  ;;  %5688 = vst [vmem:[#allocation59_spill] sm:$0xff] %v3807_v41 }
  0xc8   :  { %v794_v5 = vadd.f32 %v793_v34, %v705_v56  ;;  %v618_v6 = vpop.f32.mrf.mxu0  ;;  %v707_v26 = vpop.f32.mrf.mxu1  ;;  %v493_v34 = vld [vmem:[%s5562_s1 + $0x218] sm:$0xff] }
  0xc9   :  { %v882_v13 = vpop.f32.mrf.mxu3  ;;  %1223 = vmatpush.msrb.mxu3 %v493_v34  ;;  %1135 = vmatpush.msrb.mxu2 %v459_v63  ;;  %v708_v56 = vadd.f32 %v707_v26, %v618_v6  ;;  %v551_v34 = vld [vmem:[%s5562_s1 + $0x3e8] sm:$0xff]  ;;  %v3824_v63 = vsel %vm183_vm1, %v234_v35, %v236_v3  ;;  %v3829_v6 = vld [vmem:[%s5563_s0 + $0xf8] sm:$0xf] }
  0xca   :  { %v3799_v51 = vadd.f32 %v882_v13, %v794_v5  ;;  %v491_v13 = vld [vmem:[%s5562_s1 + $0x208] sm:$0xff]  ;;  %5690 = vst [vmem:[#allocation61_spill] sm:$0xff] %v3824_v63  ;;  %1299 = vmatpush.msra.mxu0 %v551_v34  ;;  %v157_v35 = vrot.slane %v3829_v6, 1 }
  0xcb   :  { %665 = vmatmul.f32.gmra.mxu0 %v3739_v49  ;;  %754 = vmatmul.f32.gmra.mxu1 %v3786_v28 }
  0xcc   :  { %5687 = vst [vmem:[#allocation58_spill] sm:$0xff] %v3799_v51  ;;  %843 = vmatmul.f32.gmra.mxu2 %v3789_v20  ;;  %1224 = vmatpush.msrb.mxu3 %v491_v13  ;;  %v3818_v20 = vsel %vm102_vm0, %v153_v15, %v155_v2  ;;  %v583_v15 = vld [vmem:[%s5562_s1 + $0x4e8] sm:$0xff]  ;;  %v3839_v13 = vsel %vm264_vm2, %v315_v50, %v317_v19 }
  0xcd   :  { %932 = vmatmul.f32.gmra.mxu3 %v3807_v41  ;;  %5689 = vst [vmem:[#allocation60_spill] sm:$0xff] %v3818_v20  ;;  %1388 = vmatpush.msra.mxu1 %v583_v15 }
  0xce   :  { %5692 = vst [vmem:[#allocation63_spill] sm:$0xff] %v3839_v13 }
  0xcf   :  { %v796_v57 = vpop.f32.mrf.mxu2 }
  0xd0   :  { %v797_v4 = vadd.f32 %v796_v57, %v708_v56  ;;  %v621_v5 = vpop.f32.mrf.mxu0  ;;  %v710_v51 = vpop.f32.mrf.mxu1  ;;  %v238_v56 = vrot.slane %v3829_v6, 2 }
  0xd1   :  { %v885_v28 = vpop.f32.mrf.mxu3 }
  0xd2   :  { %v3831_v26 = vadd.f32 %v885_v28, %v797_v4  ;;  %v711_v28 = vadd.f32 %v710_v51, %v621_v5  ;;  %v319_v4 = vrot.slane %v3829_v6, 3 }
  0xd3   :  { %668 = vmatmul.f32.gmra.mxu0 %v3744_v46  ;;  %757 = vmatmul.f32.gmra.mxu1 %v3818_v20  ;;  %v3847_v20 = vsel %vm102_vm0, %v155_v2, %v157_v35  ;;  %v2816_v2 = vld [vmem:[%s5563_s0] sm:$0xff]  ;;  %v549_v35 = vld [vmem:[%s5562_s1 + $0x3d8] sm:$0xff] }
  0xd4   :  { %5691 = vst [vmem:[#allocation62_spill] sm:$0xff] %v3831_v26  ;;  %846 = vmatmul.f32.gmra.mxu2 %v3824_v63  ;;  %v3850_v63 = vsel %vm183_vm1, %v236_v3, %v238_v56  ;;  %v3857_v51 = vsel %vm264_vm2, %v317_v19, %v319_v4  ;;  %v346_v5 = vrot.slane %v2816_v2, 4  ;;  %v2817_v3 = vld [vmem:[%s5563_s0 + $0x8] sm:$0xff]  ;;  %1300 = vmatpush.msra.mxu0 %v549_v35  ;;  %v581_v56 = vld [vmem:[%s5562_s1 + $0x4d8] sm:$0xff] }
  0xd5   :  { %935 = vmatmul.f32.gmra.mxu3 %v3839_v13  ;;  %v347_v15 = vrot.slane %v2817_v3, 4  ;;  %1389 = vmatpush.msra.mxu1 %v581_v56 }
  0xd7   :  { %v799_v57 = vpop.f32.mrf.mxu2 }
  0xd8   :  { %v800_v34 = vadd.f32 %v799_v57, %v711_v28  ;;  %v624_v41 = vpop.f32.mrf.mxu0  ;;  %v713_v26 = vpop.f32.mrf.mxu1 }
  0xd9   :  { %v888_v50 = vpop.f32.mrf.mxu3  ;;  %v714_v19 = vadd.f32 %v713_v26, %v624_v41  ;;  %v349_v41 = vrot.slane %v3101_v10, 4 }
  0xda   :  { %v3852_v46 = vadd.f32 %v888_v50, %v800_v34  ;;  %v3874_v50 = vsel %vm345_vm3, %v346_v5, %v347_v15 }
  0xdb   :  { %671 = vmatmul.f32.gmra.mxu0 %v3794_v55  ;;  %760 = vmatmul.f32.gmra.mxu1 %v3847_v20  ;;  %v3883_v5 = vsel %vm345_vm3, %v347_v15, %v349_v41 }
  0xdc   :  { %5693 = vst [vmem:[#allocation64_spill] sm:$0xff] %v3852_v46  ;;  %849 = vmatmul.f32.gmra.mxu2 %v3850_v63 }
  0xdd   :  { %938 = vmatmul.f32.gmra.mxu3 %v3857_v51 }
  0xdf   :  { %v802_v28 = vpop.f32.mrf.mxu2 }
  0xe0   :  { %v803_v57 = vadd.f32 %v802_v28, %v714_v19  ;;  %v627_v4 = vpop.f32.mrf.mxu0  ;;  %v716_v34 = vpop.f32.mrf.mxu1 }
  0xe1   :  { %v891_v13 = vpop.f32.mrf.mxu3  ;;  %v717_v26 = vadd.f32 %v716_v34, %v627_v4 }
  0xe2   :  { %v3876_v46 = vadd.f32 %v891_v13, %v803_v57  ;;  %v547_v13 = vld [vmem:[%s5562_s1 + $0x3c8] sm:$0xff] }
  0xe3   :  { %958 = vmatmul.f32.vlgmr.msrb.gmra.mxu0 %v3874_v50  ;;  %1047 = vmatmul.f32.vlgmr.msrb.gmra.mxu1 %v2816_v2 }
  0xe4   :  { %1136 = vmatmul.f32.vlgmr.msrb.gmra.mxu2 %v3090_v7  ;;  %1301 = vmatpush.msra.mxu0 %v547_v13  ;;  %v579_v7 = vld [vmem:[%s5562_s1 + $0x4c8] sm:$0xff] }
  0xe5   :  { %1225 = vmatmul.f32.vlgmr.msrb.gmra.mxu3 %v3093_v8  ;;  %v351_v8 = vrot.slane %v3142_v24, 4  ;;  %1390 = vmatpush.msra.mxu1 %v579_v7  ;;  %v354_v24 = vrot.slane %v3171_v33, 4 }
  0xe7   :  { %v805_v35 = vpop.f32.mrf.mxu2 }
  0xe8   :  { %v806_v19 = vadd.f32 %v805_v35, %v717_v26  ;;  %v630_v56 = vpop.f32.mrf.mxu0  ;;  %v719_v28 = vpop.f32.mrf.mxu1  ;;  %v3898_v35 = vsel %vm345_vm3, %v349_v41, %v351_v8 }
  0xe9   :  { %v894_v57 = vpop.f32.mrf.mxu3  ;;  %v720_v10 = vadd.f32 %v719_v28, %v630_v56  ;;  %v577_v56 = vld [vmem:[%s5562_s1 + $0x4b8] sm:$0xff] }
  0xea   :  { %v3888_v2 = vadd.f32 %v894_v57, %v806_v19  ;;  %1391 = vmatpush.msra.mxu1 %v577_v56 }
  0xeb   :  { %961 = vmatmul.f32.gmra.mxu0 %v3883_v5  ;;  %1050 = vmatmul.f32.gmra.mxu1 %v2817_v3  ;;  %v545_v3 = vld [vmem:[%s5562_s1 + $0x3b8] sm:$0xff] }
  0xec   :  { %1139 = vmatmul.f32.gmra.mxu2 %v3134_v22  ;;  %v2818_v22 = vld [vmem:[%s5563_s0 + $0x10] sm:$0xff]  ;;  %1302 = vmatpush.msra.mxu0 %v545_v3 }
  0xed   :  { %1228 = vmatmul.f32.gmra.mxu3 %v3137_v23  ;;  %v353_v23 = vrot.slane %v3166_v32, 4 }
  0xef   :  { %v808_v15 = vpop.f32.mrf.mxu2  ;;  %v3917_v8 = vsel %vm345_vm3, %v353_v23, %v354_v24  ;;  %v543_v23 = vld [vmem:[%s5562_s1 + $0x3a8] sm:$0xff] }
  0xf0   :  { %v809_v4 = vadd.f32 %v808_v15, %v720_v10  ;;  %v633_v34 = vpop.f32.mrf.mxu0  ;;  %v722_v26 = vpop.f32.mrf.mxu1  ;;  %1303 = vmatpush.msra.mxu0 %v543_v23 }
  0xf1   :  { %v897_v19 = vpop.f32.mrf.mxu3  ;;  %v723_v41 = vadd.f32 %v722_v26, %v633_v34 }
  0xf2   :  { %v3900_v13 = vadd.f32 %v897_v19, %v809_v4 }
  0xf3   :  { %964 = vmatmul.f32.gmra.mxu0 %v3898_v35  ;;  %1053 = vmatmul.f32.gmra.mxu1 %v2818_v22 }
  0xf4   :  { %1142 = vmatmul.f32.gmra.mxu2 %v3158_v30 }
  0xf5   :  { %1231 = vmatmul.f32.gmra.mxu3 %v3161_v31  ;;  %v356_v31 = vrot.slane %v3201_v45, 4 }
  0xf7   :  { %v811_v28 = vpop.f32.mrf.mxu2  ;;  %v3927_v22 = vsel %vm345_vm3, %v354_v24, %v356_v31  ;;  %v358_v24 = vrot.slane %v3228_v54, 4  ;;  %v541_v54 = vld [vmem:[%s5562_s1 + $0x398] sm:$0xff] }
  0xf8   :  { %v812_v57 = vadd.f32 %v811_v28, %v723_v41  ;;  %v636_v30 = vpop.f32.mrf.mxu0  ;;  %v725_v7 = vpop.f32.mrf.mxu1  ;;  %1304 = vmatpush.msra.mxu0 %v541_v54 }
  0xf9   :  { %v900_v33 = vpop.f32.mrf.mxu3  ;;  %v726_v15 = vadd.f32 %v725_v7, %v636_v30  ;;  %v3945_v7 = vsel %vm345_vm3, %v356_v31, %v358_v24 }
  0xfa   :  { %v3919_v10 = vadd.f32 %v900_v33, %v812_v57 }
  0xfb   :  { %967 = vmatmul.f32.gmra.mxu0 %v3917_v8  ;;  %1056 = vmatmul.f32.gmra.mxu1 %v3166_v32 }
  0xfc   :  { %1145 = vmatmul.f32.gmra.mxu2 %v3193_v43  ;;  %v575_v43 = vld [vmem:[%s5562_s1 + $0x4a8] sm:$0xff] }
  0xfd   :  { %1234 = vmatmul.f32.gmra.mxu3 %v3196_v44  ;;  %v2819_v44 = vld [vmem:[%s5563_s0 + $0x28] sm:$0xff]  ;;  %1392 = vmatpush.msra.mxu1 %v575_v43 }
  0xff   :  { %v814_v4 = vpop.f32.mrf.mxu2 }
 0x100   :  { %v815_v34 = vadd.f32 %v814_v4, %v726_v15  ;;  %v639_v26 = vpop.f32.mrf.mxu0  ;;  %v728_v19 = vpop.f32.mrf.mxu1  ;;  %v573_v4 = vld [vmem:[%s5562_s1 + $0x498] sm:$0xff] }
 0x101   :  { %v903_v3 = vpop.f32.mrf.mxu3  ;;  %v729_v41 = vadd.f32 %v728_v19, %v639_v26  ;;  %1393 = vmatpush.msra.mxu1 %v573_v4 }
 0x102   :  { %v3932_v32 = vadd.f32 %v903_v3, %v815_v34 }
 0x103   :  { %970 = vmatmul.f32.gmra.mxu0 %v3927_v22  ;;  %1059 = vmatmul.f32.gmra.mxu1 %v2819_v44 }
 0x104   :  { %1148 = vmatmul.f32.gmra.mxu2 %v3220_v52  ;;  %v360_v52 = vrot.slane %v3249_v61, 4 }
 0x105   :  { %1237 = vmatmul.f32.gmra.mxu3 %v3223_v53  ;;  %v361_v53 = vrot.slane %v3254_v62, 4 }
 0x107   :  { %v817_v56 = vpop.f32.mrf.mxu2  ;;  %v3962_v19 = vsel %vm345_vm3, %v360_v52, %v361_v53 }
 0x108   :  { %v818_v28 = vadd.f32 %v817_v56, %v729_v41  ;;  %v642_v57 = vpop.f32.mrf.mxu0  ;;  %v731_v30 = vpop.f32.mrf.mxu1 }
 0x109   :  { %v906_v33 = vpop.f32.mrf.mxu3  ;;  %v732_v31 = vadd.f32 %v731_v30, %v642_v57 }
 0x10a   :  { %v3947_v15 = vadd.f32 %v906_v33, %v818_v28  ;;  %v539_v28 = vld [vmem:[%s5562_s1 + $0x388] sm:$0xff] }
 0x10b   :  { %973 = vmatmul.f32.gmra.mxu0 %v3945_v7  ;;  %1062 = vmatmul.f32.gmra.mxu1 %v3201_v45 }
 0x10c   :  { %1151 = vmatmul.f32.gmra.mxu2 %v3241_v59  ;;  %1305 = vmatpush.msra.mxu0 %v539_v28 }
 0x10d   :  { %1240 = vmatmul.f32.gmra.mxu3 %v3244_v60  ;;  %v363_v60 = vrot.slane %v3284_v14, 4  ;;  %v365_v14 = vrot.slane %v3311_v27, 4  ;;  %v368_v27 = vrot.slane %v3337_v40, 4 }
 0x10f   :  { %v820_v34 = vpop.f32.mrf.mxu2  ;;  %v3972_v56 = vsel %vm345_vm3, %v361_v53, %v363_v60 }
 0x110   :  { %v821_v45 = vadd.f32 %v820_v34, %v732_v31  ;;  %v645_v59 = vpop.f32.mrf.mxu0  ;;  %v734_v26 = vpop.f32.mrf.mxu1  ;;  %v3990_v31 = vsel %vm345_vm3, %v363_v60, %v365_v14  ;;  %v535_v14 = vld [vmem:[%s5562_s1 + $0x368] sm:$0xff] }
 0x111   :  { %v909_v62 = vpop.f32.mrf.mxu3  ;;  %v735_v3 = vadd.f32 %v734_v26, %v645_v59  ;;  %v569_v26 = vld [vmem:[%s5562_s1 + $0x478] sm:$0xff] }
 0x112   :  { %v3964_v23 = vadd.f32 %v909_v62, %v821_v45  ;;  %v537_v45 = vld [vmem:[%s5562_s1 + $0x378] sm:$0xff] }
 0x113   :  { %976 = vmatmul.f32.gmra.mxu0 %v3962_v19  ;;  %1065 = vmatmul.f32.gmra.mxu1 %v3249_v61 }
 0x114   :  { %1154 = vmatmul.f32.gmra.mxu2 %v3276_v11  ;;  %v571_v11 = vld [vmem:[%s5562_s1 + $0x488] sm:$0xff]  ;;  %1306 = vmatpush.msra.mxu0 %v537_v45  ;;  %v533_v45 = vld [vmem:[%s5562_s1 + $0x358] sm:$0xff] }
 0x115   :  { %1243 = vmatmul.f32.gmra.mxu3 %v3279_v12  ;;  %v2820_v12 = vld [vmem:[%s5563_s0 + $0x48] sm:$0xff]  ;;  %1394 = vmatpush.msra.mxu1 %v571_v11 }
 0x116   :  { %1307 = vmatpush.msra.mxu0 %v535_v14 }
 0x117   :  { %v823_v43 = vpop.f32.mrf.mxu2  ;;  %1395 = vmatpush.msra.mxu1 %v569_v26  ;;  %v565_v26 = vld [vmem:[%s5562_s1 + $0x458] sm:$0xff] }
 0x118   :  { %v824_v44 = vadd.f32 %v823_v43, %v735_v3  ;;  %v648_v24 = vpop.f32.mrf.mxu0  ;;  %v737_v41 = vpop.f32.mrf.mxu1  ;;  %1308 = vmatpush.msra.mxu0 %v533_v45 }
 0x119   :  { %v912_v57 = vpop.f32.mrf.mxu3  ;;  %v738_v30 = vadd.f32 %v737_v41, %v648_v24 }
 0x11a   :  { %v3977_v61 = vadd.f32 %v912_v57, %v824_v44 }
 0x11b   :  { %979 = vmatmul.f32.gmra.mxu0 %v3972_v56  ;;  %1068 = vmatmul.f32.gmra.mxu1 %v2820_v12 }
 0x11c   :  { %5694 = vst [vmem:[#allocation65_spill] sm:$0xff] %v3977_v61  ;;  %1157 = vmatmul.f32.gmra.mxu2 %v3303_v21  ;;  %v2821_v21 = vld [vmem:[%s5563_s0 + $0x50] sm:$0xff] }
 0x11d   :  { %1246 = vmatmul.f32.gmra.mxu3 %v3306_v25  ;;  %v367_v25 = vrot.slane %v3332_v39, 4 }
 0x11f   :  { %v826_v33 = vpop.f32.mrf.mxu2  ;;  %v4009_v43 = vsel %vm345_vm3, %v367_v25, %v368_v27 }
 0x120   :  { %v827_v52 = vadd.f32 %v826_v33, %v738_v30  ;;  %v651_v53 = vpop.f32.mrf.mxu0  ;;  %v740_v54 = vpop.f32.mrf.mxu1 }
 0x121   :  { %v915_v4 = vpop.f32.mrf.mxu3  ;;  %v741_v59 = vadd.f32 %v740_v54, %v651_v53 }
 0x122   :  { %v3992_v34 = vadd.f32 %v915_v4, %v827_v52 }
 0x123   :  { %982 = vmatmul.f32.gmra.mxu0 %v3990_v31  ;;  %1071 = vmatmul.f32.gmra.mxu1 %v2821_v21 }
 0x124   :  { %5695 = vst [vmem:[#allocation66_spill] sm:$0xff] %v3992_v34  ;;  %1160 = vmatmul.f32.gmra.mxu2 %v3324_v37  ;;  %v1803_v34 = vld [vmem:[%s5565_s3 + $0xe0] sm:$0xff] }
 0x125   :  { %1249 = vmatmul.f32.gmra.mxu3 %v3327_v38  ;;  %v370_v38 = vrot.slane %v3367_v1, 4  ;;  %v372_v1 = vrot.slane %v3394_v18, 4  ;;  %v375_v18 = vrot.slane %v3420_v48, 4 }
 0x127   :  { %v829_v62 = vpop.f32.mrf.mxu2  ;;  %v4019_v12 = vsel %vm345_vm3, %v368_v27, %v370_v38  ;;  %v4037_v21 = vsel %vm345_vm3, %v370_v38, %v372_v1  ;;  %v5703_v1 = vld [vmem:[#allocation20_spill] sm:$0xff] }
 0x128   :  { %v830_v60 = vadd.f32 %v829_v62, %v741_v59  ;;  %v654_v37 = vpop.f32.mrf.mxu0  ;;  %v743_v3 = vpop.f32.mrf.mxu1 }
 0x129   :  { %v918_v40 = vpop.f32.mrf.mxu3  ;;  %v744_v24 = vadd.f32 %v743_v3, %v654_v37 }
 0x12a   :  { %v4011_v44 = vadd.f32 %v918_v40, %v830_v60 }
 0x12b   :  { %985 = vmatmul.f32.gmra.mxu0 %v4009_v43  ;;  %1074 = vmatmul.f32.gmra.mxu1 %v3332_v39 }
 0x12c   :  { %5696 = vst [vmem:[#allocation67_spill] sm:$0xff] %v4011_v44  ;;  %1163 = vmatmul.f32.gmra.mxu2 %v3359_v58  ;;  %v567_v58 = vld [vmem:[%s5562_s1 + $0x468] sm:$0xff]  ;;  %v5747_v44 = vld [vmem:[#allocation11_spill] sm:$0xff] }
 0x12d   :  { %1252 = vmatmul.f32.gmra.mxu3 %v3362_v0  ;;  %v2822_v0 = vld [vmem:[%s5563_s0 + $0x68] sm:$0xff]  ;;  %1396 = vmatpush.msra.mxu1 %v567_v58 }
 0x12f   :  { %v832_v41 = vpop.f32.mrf.mxu2  ;;  %1397 = vmatpush.msra.mxu1 %v565_v26  ;;  %v5706_v26 = vld [vmem:[#allocation22_spill] sm:$0xff] }
 0x130   :  { %v833_v28 = vadd.f32 %v832_v41, %v744_v24  ;;  %v657_v57 = vpop.f32.mrf.mxu0  ;;  %v746_v11 = vpop.f32.mrf.mxu1  ;;  %v5700_v24 = vld [vmem:[#allocation16_spill] sm:$0xff] }
 0x131   :  { %v921_v30 = vpop.f32.mrf.mxu3  ;;  %v747_v33 = vadd.f32 %v746_v11, %v657_v57 }
 0x132   :  { %v4024_v39 = vadd.f32 %v921_v30, %v833_v28  ;;  %v531_v30 = vld [vmem:[%s5562_s1 + $0x348] sm:$0xff] }
 0x133   :  { %988 = vmatmul.f32.gmra.mxu0 %v4019_v12  ;;  %1077 = vmatmul.f32.gmra.mxu1 %v2822_v0  ;;  %v5702_v0 = vld [vmem:[#allocation18_spill] sm:$0xff] }
 0x134   :  { %5697 = vst [vmem:[#allocation68_spill] sm:$0xff] %v4024_v39  ;;  %1166 = vmatmul.f32.gmra.mxu2 %v3386_v16  ;;  %v2823_v16 = vld [vmem:[%s5563_s0 + $0x70] sm:$0xff]  ;;  %1309 = vmatpush.msra.mxu0 %v531_v30 }
 0x135   :  { %1255 = vmatmul.f32.gmra.mxu3 %v3389_v17  ;;  %v374_v17 = vrot.slane %v3415_v47, 4 }
 0x137   :  { %v835_v52 = vpop.f32.mrf.mxu2  ;;  %v4056_v3 = vsel %vm345_vm3, %v374_v17, %v375_v18 }
 0x138   :  { %v836_v53 = vadd.f32 %v835_v52, %v747_v33  ;;  %v660_v54 = vpop.f32.mrf.mxu0  ;;  %v749_v4 = vpop.f32.mrf.mxu1  ;;  %v379_v33 = vrot.slane %v5703_v1, 4 }
 0x139   :  { %v924_v25 = vpop.f32.mrf.mxu3  ;;  %v750_v59 = vadd.f32 %v749_v4, %v660_v54 }
 0x13a   :  { %v4039_v27 = vadd.f32 %v924_v25, %v836_v53  ;;  %v5704_v53 = vld [vmem:[#allocation19_spill] sm:$0xff] }
 0x13b   :  { %991 = vmatmul.f32.gmra.mxu0 %v4037_v21  ;;  %1080 = vmatmul.f32.gmra.mxu1 %v2823_v16 }
 0x13c   :  { %5698 = vst [vmem:[#allocation69_spill] sm:$0xff] %v4039_v27  ;;  %1169 = vmatmul.f32.gmra.mxu2 %v3407_v36 }
 0x13d   :  { %1258 = vmatmul.f32.gmra.mxu3 %v3410_v42  ;;  %v377_v42 = vrot.slane %v3450_v29, 4  ;;  %v2824_v29 = vld [vmem:[%s5563_s0 + $0x88] sm:$0xff] }
 0x13f   :  { %v838_v62 = vpop.f32.mrf.mxu2  ;;  %v4066_v14 = vsel %vm345_vm3, %v375_v18, %v377_v42  ;;  %v4084_v17 = vsel %vm345_vm3, %v377_v42, %v379_v33 }
 0x140   :  { %v839_v60 = vadd.f32 %v838_v62, %v750_v59  ;;  %v663_v36 = vpop.f32.mrf.mxu0  ;;  %v752_v37 = vpop.f32.mrf.mxu1  ;;  %v2825_v59 = vld [vmem:[%s5563_s0 + $0x90] sm:$0xff]  ;;  %v5707_v62 = vld [vmem:[#allocation24_spill] sm:$0xff] }
 0x141   :  { %v927_v48 = vpop.f32.mrf.mxu3  ;;  %v753_v38 = vadd.f32 %v752_v37, %v663_v36  ;;  %v5708_v36 = vld [vmem:[#allocation25_spill] sm:$0xff] }
 0x142   :  { %v4058_v40 = vadd.f32 %v927_v48, %v839_v60  ;;  %v381_v60 = vrot.slane %v5707_v62, 4  ;;  %v382_v37 = vrot.slane %v5708_v36, 4  ;;  %v529_v48 = vld [vmem:[%s5562_s1 + $0x338] sm:$0xff] }
 0x143   :  { %994 = vmatmul.f32.gmra.mxu0 %v4056_v3  ;;  %1083 = vmatmul.f32.gmra.mxu1 %v3415_v47  ;;  %v5715_v36 = vld [vmem:[#allocation31_spill] sm:$0xff] }
 0x144   :  { %5699 = vst [vmem:[#allocation70_spill] sm:$0xff] %v4058_v40  ;;  %1172 = vmatmul.f32.gmra.mxu2 %v3442_v9  ;;  %v563_v9 = vld [vmem:[%s5562_s1 + $0x448] sm:$0xff]  ;;  %1310 = vmatpush.msra.mxu0 %v529_v48  ;;  %v4103_v30 = vsel %vm345_vm3, %v381_v60, %v382_v37 }
 0x145   :  { %1261 = vmatmul.f32.gmra.mxu3 %v5700_v24  ;;  %1398 = vmatpush.msra.mxu1 %v563_v9  ;;  %v561_v24 = vld [vmem:[%s5562_s1 + $0x438] sm:$0xff]  ;;  %v2826_v60 = vld [vmem:[%s5563_s0 + $0xa8] sm:$0xff] }
 0x147   :  { %v841_v41 = vpop.f32.mrf.mxu2  ;;  %1399 = vmatpush.msra.mxu1 %v561_v24 }
 0x148   :  { %v842_v28 = vadd.f32 %v841_v41, %v753_v38  ;;  %v666_v57 = vpop.f32.mrf.mxu0  ;;  %v755_v11 = vpop.f32.mrf.mxu1  ;;  %v5709_v38 = vld [vmem:[#allocation23_spill] sm:$0xff] }
 0x149   :  { %v930_v58 = vpop.f32.mrf.mxu3  ;;  %v756_v52 = vadd.f32 %v755_v11, %v666_v57 }
 0x14a   :  { %v4071_v47 = vadd.f32 %v930_v58, %v842_v28 }
 0x14b   :  { %997 = vmatmul.f32.gmra.mxu0 %v4066_v14  ;;  %1086 = vmatmul.f32.gmra.mxu1 %v2824_v29  ;;  %v5711_v29 = vld [vmem:[#allocation27_spill] sm:$0xff] }
 0x14c   :  { %5701 = vst [vmem:[#allocation16_spill] sm:$0xff] %v4071_v47  ;;  %1175 = vmatmul.f32.gmra.mxu2 %v5702_v0  ;;  %v5712_v0 = vld [vmem:[#allocation29_spill] sm:$0xff] }
 0x14d   :  { %1264 = vmatmul.f32.gmra.mxu3 %v5704_v53  ;;  %v384_v1 = vrot.slane %v5712_v0, 4 }
 0x14f   :  { %v844_v54 = vpop.f32.mrf.mxu2 }
 0x150   :  { %v845_v4 = vadd.f32 %v844_v54, %v756_v52  ;;  %v669_v25 = vpop.f32.mrf.mxu0  ;;  %v758_v16 = vpop.f32.mrf.mxu1  ;;  %v5713_v52 = vld [vmem:[#allocation28_spill] sm:$0xff] }
 0x151   :  { %v933_v18 = vpop.f32.mrf.mxu3  ;;  %v759_v42 = vadd.f32 %v758_v16, %v669_v25  ;;  %v4117_v16 = vsel %vm345_vm3, %v382_v37, %v384_v1  ;;  %v5716_v37 = vld [vmem:[#allocation33_spill] sm:$0xff] }
 0x152   :  { %v4086_v45 = vadd.f32 %v933_v18, %v845_v4  ;;  %v527_v18 = vld [vmem:[%s5562_s1 + $0x328] sm:$0xff]  ;;  %v386_v48 = vrot.slane %v5716_v37, 4 }
 0x153   :  { %1000 = vmatmul.f32.gmra.mxu0 %v4084_v17  ;;  %1089 = vmatmul.f32.gmra.mxu1 %v2825_v59 }
 0x154   :  { %5705 = vst [vmem:[#allocation18_spill] sm:$0xff] %v4086_v45  ;;  %1178 = vmatmul.f32.gmra.mxu2 %v5706_v26  ;;  %1311 = vmatpush.msra.mxu0 %v527_v18 }
 0x155   :  { %1267 = vmatmul.f32.gmra.mxu3 %v5709_v38 }
 0x157   :  { %v847_v41 = vpop.f32.mrf.mxu2 }
 0x158   :  { %v848_v28 = vadd.f32 %v847_v41, %v759_v42  ;;  %v672_v57 = vpop.f32.mrf.mxu0  ;;  %v761_v11 = vpop.f32.mrf.mxu1  ;;  %v5717_v42 = vld [vmem:[#allocation32_spill] sm:$0xff]  ;;  %v4139_v41 = vsel %vm345_vm3, %v384_v1, %v386_v48 }
 0x159   :  { %v936_v58 = vpop.f32.mrf.mxu3  ;;  %v762_v33 = vadd.f32 %v761_v11, %v672_v57  ;;  %v5718_v57 = vld [vmem:[#allocation35_spill] sm:$0xff]  ;;  %v5719_v11 = vld [vmem:[#allocation37_spill] sm:$0xff]  ;;  %v5721_v1 = vld [vmem:[#allocation36_spill] sm:$0xff] }
 0x15a   :  { %v4105_v9 = vadd.f32 %v936_v58, %v848_v28  ;;  %v2827_v28 = vld [vmem:[%s5563_s0 + $0xb0] sm:$0xff]  ;;  %v388_v58 = vrot.slane %v5719_v11, 4 }
 0x15b   :  { %1003 = vmatmul.f32.gmra.mxu0 %v4103_v30  ;;  %1092 = vmatmul.f32.gmra.mxu1 %v5707_v62  ;;  %v559_v62 = vld [vmem:[%s5562_s1 + $0x428] sm:$0xff] }
 0x15c   :  { %5710 = vst [vmem:[#allocation20_spill] sm:$0xff] %v4105_v9  ;;  %1181 = vmatmul.f32.gmra.mxu2 %v5711_v29  ;;  %1400 = vmatpush.msra.mxu1 %v559_v62  ;;  %v5720_v29 = vld [vmem:[#allocation38_spill] sm:$0xff]  ;;  %v5723_v62 = vld [vmem:[#allocation43_spill] sm:$0xff] }
 0x15d   :  { %1270 = vmatmul.f32.gmra.mxu3 %v5713_v52  ;;  %v389_v0 = vrot.slane %v5720_v29, 4  ;;  %v557_v52 = vld [vmem:[%s5562_s1 + $0x418] sm:$0xff] }
 0x15e   :  { %1401 = vmatpush.msra.mxu1 %v557_v52 }
 0x15f   :  { %v850_v53 = vpop.f32.mrf.mxu2  ;;  %v4160_v18 = vsel %vm345_vm3, %v388_v58, %v389_v0  ;;  %v5726_v58 = vld [vmem:[#allocation48_spill] sm:$0xff] }
 0x160   :  { %v851_v54 = vadd.f32 %v850_v53, %v762_v33  ;;  %v4112_v4 = vpop.f32.mrf.mxu0  ;;  %v4114_v25 = vpop.f32.mrf.mxu1  ;;  %v525_v33 = vld [vmem:[%s5562_s1 + $0x318] sm:$0xff] }
 0x161   :  { %v939_v59 = vpop.f32.mrf.mxu3  ;;  %1312 = vmatpush.msra.mxu0 %v525_v33  ;;  %v393_v33 = vrot.slane %v5726_v58, 4 }
 0x162   :  { %v4122_v26 = vadd.f32 %v939_v59, %v851_v54  ;;  %v5722_v59 = vld [vmem:[#allocation41_spill] sm:$0xff] }
 0x163   :  { %1006 = vmatmul.f32.gmra.mxu0 %v4117_v16  ;;  %1095 = vmatmul.f32.gmra.mxu1 %v2826_v60  ;;  %v391_v60 = vrot.slane %v5723_v62, 4 }
 0x164   :  { %5714 = vst [vmem:[#allocation19_spill] sm:$0xff] %v4122_v26  ;;  %1184 = vmatmul.f32.gmra.mxu2 %v5715_v36  ;;  %v5724_v36 = vld [vmem:[#allocation42_spill] sm:$0xff] }
 0x165   :  { %1273 = vmatmul.f32.gmra.mxu3 %v5717_v42  ;;  %v4172_v42 = vsel %vm345_vm3, %v389_v0, %v391_v60  ;;  %v5727_v0 = vld [vmem:[#allocation47_spill] sm:$0xff] }
 0x168   :  { %v4134_v38 = vpop.f32.mrf.mxu0  ;;  %v4136_v24 = vpop.f32.mrf.mxu1 }
 0x16b   :  { %1009 = vmatmul.f32.gmra.mxu0 %v4139_v41  ;;  %1098 = vmatmul.f32.gmra.mxu1 %v2827_v28  ;;  %v523_v28 = vld [vmem:[%s5562_s1 + $0x308] sm:$0xff] }
 0x16c   :  { %1187 = vmatmul.f32.gmra.mxu2 %v5718_v57  ;;  %1313 = vmatpush.msra.mxu0 %v523_v28  ;;  %v555_v57 = vld [vmem:[%s5562_s1 + $0x408] sm:$0xff] }
 0x16d   :  { %1276 = vmatmul.f32.gmra.mxu3 %v5721_v1  ;;  %1402 = vmatpush.msra.mxu1 %v555_v57  ;;  %v5729_v28 = vld [vmem:[#allocation53_spill] sm:$0xff]  ;;  %v5730_v57 = vld [vmem:[#allocation52_spill] sm:$0xff] }
 0x170   :  { %v4155_v53 = vpop.f32.mrf.mxu0  ;;  %v4157_v54 = vpop.f32.mrf.mxu1 }
 0x173   :  { %1012 = vmatmul.f32.gmra.mxu0 %v4160_v18  ;;  %1101 = vmatmul.f32.gmra.mxu1 %v5719_v11  ;;  %v5725_v11 = vld [vmem:[#allocation46_spill] sm:$0xff] }
 0x174   :  { %1190 = vmatmul.f32.gmra.mxu2 %v5722_v59  ;;  %v4190_v59 = vsel %vm345_vm3, %v391_v60, %v393_v33  ;;  %v398_v60 = vrot.slane %v3794_v55, 4  ;;  %v5732_v33 = vld [vmem:[#allocation57_spill] sm:$0xff] }
 0x175   :  { %1279 = vmatmul.f32.gmra.mxu3 %v5724_v36  ;;  %v5728_v36 = vld [vmem:[#allocation51_spill] sm:$0xff] }
 0x178   :  { %v4167_v37 = vpop.f32.mrf.mxu0  ;;  %v4169_v48 = vpop.f32.mrf.mxu1 }
 0x17b   :  { %1015 = vmatmul.f32.gmra.mxu0 %v4172_v42  ;;  %1104 = vmatmul.f32.gmra.mxu1 %v5720_v29  ;;  %v395_v29 = vrot.slane %v3739_v49, 4 }
 0x17c   :  { %1193 = vmatmul.f32.gmra.mxu2 %v5725_v11  ;;  %v396_v11 = vrot.slane %v5729_v28, 4 }
 0x17d   :  { %1282 = vmatmul.f32.gmra.mxu3 %v5727_v0 }
 0x17e   :  { %v4203_v26 = vsel %vm345_vm3, %v395_v29, %v396_v11  ;;  %v4215_v9 = vsel %vm345_vm3, %v396_v11, %v398_v60  ;;  %v5733_v29 = vld [vmem:[#allocation60_spill] sm:$0xff] }
 0x17f   :  { %v5735_v11 = vld [vmem:[#allocation4_spill] sm:$0xff] }
 0x180   :  { %v4185_v1 = vpop.f32.mrf.mxu0  ;;  %v4187_v52 = vpop.f32.mrf.mxu1 }
 0x183   :  { %1018 = vmatmul.f32.gmra.mxu0 %v4190_v59  ;;  %1107 = vmatmul.f32.gmra.mxu1 %v5723_v62  ;;  %v5731_v62 = vld [vmem:[#allocation56_spill] sm:$0xff] }
 0x184   :  { %1196 = vmatmul.f32.gmra.mxu2 %v5728_v36 }
 0x185   :  { %1285 = vmatmul.f32.gmra.mxu3 %v5730_v57 }
 0x188   :  { %v4198_v58 = vpop.f32.mrf.mxu0  ;;  %v4200_v0 = vpop.f32.mrf.mxu1 }
 0x18b   :  { %1021 = vmatmul.f32.gmra.mxu0 %v4203_v26  ;;  %1110 = vmatmul.f32.gmra.mxu1 %v3739_v49  ;;  %v400_v49 = vrot.slane %v3829_v6, 4 }
 0x18c   :  { %1199 = vmatmul.f32.gmra.mxu2 %v5731_v62  ;;  %v5734_v62 = vld [vmem:[#allocation61_spill] sm:$0xff] }
 0x18d   :  { %1288 = vmatmul.f32.gmra.mxu3 %v5732_v33  ;;  %v4227_v47 = vsel %vm345_vm3, %v398_v60, %v400_v49  ;;  %v5736_v49 = vld [vmem:[#allocation5_spill] sm:$0xff] }
 0x190   :  { %v4210_v36 = vpop.f32.mrf.mxu0  ;;  %v4212_v57 = vpop.f32.mrf.mxu1 }
 0x193   :  { %1024 = vmatmul.f32.gmra.mxu0 %v4215_v9  ;;  %1113 = vmatmul.f32.gmra.mxu1 %v5729_v28 }
 0x194   :  { %1202 = vmatmul.f32.gmra.mxu2 %v5733_v29 }
 0x195   :  { %1291 = vmatmul.f32.gmra.mxu3 %v5734_v62 }
 0x198   :  { %v4222_v45 = vpop.f32.mrf.mxu0  ;;  %v4224_v33 = vpop.f32.mrf.mxu1 }
 0x19b   :  { %1027 = vmatmul.f32.gmra.mxu0 %v4227_v47  ;;  %1116 = vmatmul.f32.gmra.mxu1 %v3794_v55 }
 0x19c   :  { %1205 = vmatmul.f32.gmra.mxu2 %v3847_v20 }
 0x19d   :  { %1294 = vmatmul.f32.gmra.mxu3 %v3850_v63  ;;  %v5737_v63 = vld [vmem:[#allocation6_spill] sm:$0xff] }
 0x1a0   :  { %v4233_v28 = vpop.f32.mrf.mxu0  ;;  %v4235_v6 = vpop.f32.mrf.mxu1 }
 0x1a3   :  { %1314 = vmatmul.f32.vlgmr.msra.gmra.mxu0 %v5735_v11  ;;  %1403 = vmatmul.f32.vlgmr.msra.gmra.mxu1 %v3874_v50  ;;  %v5738_v50 = vld [vmem:[#allocation7_spill] sm:$0xff] }
 0x1a8   :  { %v4239_v29 = vpop.f32.mrf.mxu0  ;;  %v4241_v60 = vpop.f32.mrf.mxu1 }
 0x1ab   :  { %1317 = vmatmul.f32.gmra.mxu0 %v5736_v49  ;;  %1406 = vmatmul.f32.gmra.mxu1 %v3883_v5  ;;  %v5739_v5 = vld [vmem:[#allocation8_spill] sm:$0xff] }
 0x1b0   :  { %v4245_v55 = vpop.f32.mrf.mxu0  ;;  %v4247_v20 = vpop.f32.mrf.mxu1 }
 0x1b3   :  { %1320 = vmatmul.f32.gmra.mxu0 %v5737_v63  ;;  %1409 = vmatmul.f32.gmra.mxu1 %v3898_v35  ;;  %v5741_v35 = vld [vmem:[#allocation9_spill] sm:$0xff] }
 0x1b8   :  { %v4251_v62 = vpop.f32.mrf.mxu0  ;;  %v4253_v11 = vpop.f32.mrf.mxu1 }
 0x1bb   :  { %1323 = vmatmul.f32.gmra.mxu0 %v5738_v50  ;;  %1412 = vmatmul.f32.gmra.mxu1 %v3917_v8  ;;  %v5744_v8 = vld [vmem:[#allocation10_spill] sm:$0xff] }
 0x1c0   :  { %v4257_v40 = vpop.f32.mrf.mxu0  ;;  %v4259_v49 = vpop.f32.mrf.mxu1 }
 0x1c3   :  { %1326 = vmatmul.f32.gmra.mxu0 %v5739_v5  ;;  %1415 = vmatmul.f32.gmra.mxu1 %v3927_v22  ;;  %v1805_v22 = vld [vmem:[%s5565_s3 + $0xf0] sm:$0xff] }
 0x1c4   :  { %v1837_v5 = vld [vmem:[%s5565_s3 + $0x1f0] sm:$0xff]  ;;  %1935 = vmatpush.msra.mxu2 %v1805_v22  ;;  %v1835_v22 = vld [vmem:[%s5565_s3 + $0x1e0] sm:$0xff] }
 0x1c5   :  { %1976 = vmatpush.msra.mxu3 %v1837_v5  ;;  %v5750_v5 = vld [vmem:[#allocation12_spill] sm:$0xff] }
 0x1c6   :  { %1936 = vmatpush.msra.mxu2 %v1803_v34  ;;  %v1801_v34 = vld [vmem:[%s5565_s3 + $0xd0] sm:$0xff] }
 0x1c7   :  { %1977 = vmatpush.msra.mxu3 %v1835_v22 }
 0x1c8   :  { %v4263_v27 = vpop.f32.mrf.mxu0  ;;  %v4265_v63 = vpop.f32.mrf.mxu1  ;;  %1937 = vmatpush.msra.mxu2 %v1801_v34  ;;  %v1799_v34 = vld [vmem:[%s5565_s3 + $0xc0] sm:$0xff] }
 0x1c9   :  { %5740 = vst [vmem:[#allocation22_spill] sm:$0xff] %v4263_v27  ;;  %v5773_v27 = vld [vmem:[#allocation34_spill] sm:$0xff] }
 0x1ca   :  { %1938 = vmatpush.msra.mxu2 %v1799_v34  ;;  %v1797_v34 = vld [vmem:[%s5565_s3 + $0xb0] sm:$0xff] }
 0x1cb   :  { %1329 = vmatmul.f32.gmra.mxu0 %v5741_v35  ;;  %1418 = vmatmul.f32.gmra.mxu1 %v3945_v7 }
 0x1cc   :  { %1939 = vmatpush.msra.mxu2 %v1797_v34  ;;  %v1829_v34 = vld [vmem:[%s5565_s3 + $0x1b0] sm:$0xff] }
 0x1d0   :  { %v4269_v39 = vpop.f32.mrf.mxu0  ;;  %v4271_v50 = vpop.f32.mrf.mxu1 }
 0x1d1   :  { %5742 = vst [vmem:[#allocation24_spill] sm:$0xff] %v4269_v39  ;;  %v1779_v39 = vld [vmem:[%s5565_s3 + $0x20] sm:$0xff] }
 0x1d2   :  { %5743 = vst [vmem:[#allocation25_spill] sm:$0xff] %v4271_v50 }
 0x1d3   :  { %1332 = vmatmul.f32.gmra.mxu0 %v5744_v8  ;;  %1421 = vmatmul.f32.gmra.mxu1 %v3962_v19 }
 0x1d8   :  { %v4281_v35 = vpop.f32.mrf.mxu0  ;;  %v4283_v7 = vpop.f32.mrf.mxu1 }
 0x1d9   :  { %5745 = vst [vmem:[#allocation23_spill] sm:$0xff] %v4281_v35 }
 0x1da   :  { %5746 = vst [vmem:[#allocation27_spill] sm:$0xff] %v4283_v7 }
 0x1db   :  { %1335 = vmatmul.f32.gmra.mxu0 %v5747_v44  ;;  %1424 = vmatmul.f32.gmra.mxu1 %v3972_v56 }
 0x1e0   :  { %v4287_v8 = vpop.f32.mrf.mxu0  ;;  %v4289_v19 = vpop.f32.mrf.mxu1 }
 0x1e1   :  { %5748 = vst [vmem:[#allocation29_spill] sm:$0xff] %v4287_v8  ;;  %v4303_v8 = vpop.f32.mrf.mxu2 }
 0x1e2   :  { %5749 = vst [vmem:[#allocation28_spill] sm:$0xff] %v4289_v19  ;;  %v5753_v19 = vld [vmem:[#allocation13_spill] sm:$0xff] }
 0x1e3   :  { %1338 = vmatmul.f32.gmra.mxu0 %v5750_v5  ;;  %1427 = vmatmul.f32.gmra.mxu1 %v3990_v31  ;;  %v1833_v5 = vld [vmem:[%s5565_s3 + $0x1d0] sm:$0xff]  ;;  %v4313_v31 = vpop.f32.mrf.mxu3 }
 0x1e4   :  { %1978 = vmatpush.msra.mxu3 %v1833_v5  ;;  %v1831_v5 = vld [vmem:[%s5565_s3 + $0x1c0] sm:$0xff] }
 0x1e6   :  { %1979 = vmatpush.msra.mxu3 %v1831_v5 }
 0x1e8   :  { %v4299_v44 = vpop.f32.mrf.mxu0  ;;  %v4301_v56 = vpop.f32.mrf.mxu1  ;;  %1980 = vmatpush.msra.mxu3 %v1829_v34 }
 0x1e9   :  { %5751 = vst [vmem:[#allocation31_spill] sm:$0xff] %v4299_v44 }
 0x1ea   :  { %5752 = vst [vmem:[#allocation33_spill] sm:$0xff] %v4301_v56  ;;  %v4319_v56 = vpop.f32.mrf.mxu2 }
 0x1eb   :  { %1341 = vmatmul.f32.gmra.mxu0 %v5753_v19  ;;  %1430 = vmatmul.f32.gmra.mxu1 %v4009_v43  ;;  %v5756_v19 = vld [vmem:[#allocation14_spill] sm:$0xff]  ;;  %v4323_v43 = vpop.f32.mrf.mxu3 }
 0x1f0   :  { %v4315_v22 = vpop.f32.mrf.mxu0  ;;  %v4317_v44 = vpop.f32.mrf.mxu1 }
 0x1f1   :  { %5754 = vst [vmem:[#allocation32_spill] sm:$0xff] %v4315_v22  ;;  %v5759_v22 = vld [vmem:[#allocation15_spill] sm:$0xff] }
 0x1f2   :  { %5755 = vst [vmem:[#allocation35_spill] sm:$0xff] %v4317_v44  ;;  %v5762_v44 = vld [vmem:[#allocation17_spill] sm:$0xff] }
 0x1f3   :  { %1344 = vmatmul.f32.gmra.mxu0 %v5756_v19  ;;  %1433 = vmatmul.f32.gmra.mxu1 %v4019_v12  ;;  %v4337_v12 = vpop.f32.mrf.mxu2 }
 0x1f8   :  { %v4325_v35 = vpop.f32.mrf.mxu0  ;;  %v4327_v7 = vpop.f32.mrf.mxu1 }
 0x1f9   :  { %5757 = vst [vmem:[#allocation37_spill] sm:$0xff] %v4325_v35 }
 0x1fa   :  { %5758 = vst [vmem:[#allocation38_spill] sm:$0xff] %v4327_v7  ;;  %v4343_v7 = vpop.f32.mrf.mxu3 }
 0x1fb   :  { %1347 = vmatmul.f32.gmra.mxu0 %v5759_v22  ;;  %1436 = vmatmul.f32.gmra.mxu1 %v4037_v21  ;;  %v4350_v22 = vpop.f32.mrf.mxu2 }
 0x200   :  { %v4339_v19 = vpop.f32.mrf.mxu0  ;;  %v4341_v35 = vpop.f32.mrf.mxu1 }
 0x201   :  { %5760 = vst [vmem:[#allocation36_spill] sm:$0xff] %v4339_v19  ;;  %v1795_v19 = vld [vmem:[%s5565_s3 + $0xa0] sm:$0xff] }
 0x202   :  { %5761 = vst [vmem:[#allocation41_spill] sm:$0xff] %v4341_v35  ;;  %1940 = vmatpush.msra.mxu2 %v1795_v19  ;;  %v5765_v35 = vld [vmem:[#allocation21_spill] sm:$0xff]  ;;  %v1791_v19 = vld [vmem:[%s5565_s3 + $0x80] sm:$0xff] }
 0x203   :  { %1350 = vmatmul.f32.gmra.mxu0 %v5762_v44  ;;  %1439 = vmatmul.f32.gmra.mxu1 %v4056_v3  ;;  %v1793_v3 = vld [vmem:[%s5565_s3 + $0x90] sm:$0xff]  ;;  %v4362_v44 = vpop.f32.mrf.mxu3  ;;  %v4385_v34 = vpop.f32.mrf.mxu2 }
 0x204   :  { %1941 = vmatpush.msra.mxu2 %v1793_v3  ;;  %v1827_v3 = vld [vmem:[%s5565_s3 + $0x1a0] sm:$0xff] }
 0x205   :  { %1981 = vmatpush.msra.mxu3 %v1827_v3 }
 0x206   :  { %1942 = vmatpush.msra.mxu2 %v1791_v19  ;;  %v1785_v19 = vld [vmem:[%s5565_s3 + $0x50] sm:$0xff] }
 0x208   :  { %v4352_v21 = vpop.f32.mrf.mxu0  ;;  %v4354_v5 = vpop.f32.mrf.mxu1 }
 0x209   :  { %5763 = vst [vmem:[#allocation43_spill] sm:$0xff] %v4352_v21  ;;  %v1789_v21 = vld [vmem:[%s5565_s3 + $0x70] sm:$0xff] }
 0x20a   :  { %5764 = vst [vmem:[#allocation42_spill] sm:$0xff] %v4354_v5  ;;  %1943 = vmatpush.msra.mxu2 %v1789_v21  ;;  %v1825_v21 = vld [vmem:[%s5565_s3 + $0x190] sm:$0xff] }
 0x20b   :  { %1353 = vmatmul.f32.gmra.mxu0 %v5765_v35  ;;  %1442 = vmatmul.f32.gmra.mxu1 %v4066_v14  ;;  %v1787_v14 = vld [vmem:[%s5565_s3 + $0x60] sm:$0xff]  ;;  %v4401_v3 = vpop.f32.mrf.mxu3 }
 0x20c   :  { %1944 = vmatpush.msra.mxu2 %v1787_v14  ;;  %1982 = vmatpush.msra.mxu3 %v1825_v21  ;;  %v1823_v14 = vld [vmem:[%s5565_s3 + $0x180] sm:$0xff] }
 0x20e   :  { %1945 = vmatpush.msra.mxu2 %v1785_v19  ;;  %1983 = vmatpush.msra.mxu3 %v1823_v14  ;;  %v1777_v14 = vld [vmem:[%s5565_s3 + $0x10] sm:$0xff] }
 0x210   :  { %v4375_v5 = vpop.f32.mrf.mxu0  ;;  %v4377_v35 = vpop.f32.mrf.mxu1 }
 0x211   :  { %5766 = vst [vmem:[#allocation46_spill] sm:$0xff] %v4375_v5  ;;  %v5768_v5 = vld [vmem:[#allocation26_spill] sm:$0xff] }
 0x212   :  { %5767 = vst [vmem:[#allocation48_spill] sm:$0xff] %v4377_v35  ;;  %v1783_v35 = vld [vmem:[%s5565_s3 + $0x40] sm:$0xff] }
 0x213   :  { %1356 = vmatmul.f32.gmra.mxu0 %v5768_v5  ;;  %1445 = vmatmul.f32.gmra.mxu1 %v4084_v17  ;;  %v1781_v5 = vld [vmem:[%s5565_s3 + $0x30] sm:$0xff] }
 0x214   :  { %1946 = vmatpush.msra.mxu2 %v1783_v35  ;;  %v1821_v17 = vld [vmem:[%s5565_s3 + $0x170] sm:$0xff]  ;;  %v1819_v35 = vld [vmem:[%s5565_s3 + $0x160] sm:$0xff] }
 0x215   :  { %1984 = vmatpush.msra.mxu3 %v1821_v17  ;;  %v4427_v17 = vpop.f32.mrf.mxu2 }
 0x216   :  { %1947 = vmatpush.msra.mxu2 %v1781_v5  ;;  %v1138_v5 = vadd.f32 %v4303_v8, %v4114_v25  ;;  %v1813_v25 = vld [vmem:[%s5565_s3 + $0x130] sm:$0xff] }
 0x217   :  { %1985 = vmatpush.msra.mxu3 %v1819_v35  ;;  %v1815_v35 = vld [vmem:[%s5565_s3 + $0x140] sm:$0xff] }
 0x218   :  { %v4409_v19 = vpop.f32.mrf.mxu0  ;;  %v4411_v21 = vpop.f32.mrf.mxu1  ;;  %1948 = vmatpush.msra.mxu2 %v1779_v39  ;;  %v1775_v39 = vld [vmem:[%s5565_s3] sm:$0xff]  ;;  %v1227_v8 = vadd.f32 %v4313_v31, %v1138_v5  ;;  %v1141_v31 = vadd.f32 %v4319_v56, %v4136_v24 }
 0x219   :  { %5769 = vst [vmem:[#allocation47_spill] sm:$0xff] %v4409_v19  ;;  %v1817_v19 = vld [vmem:[%s5565_s3 + $0x150] sm:$0xff] }
 0x21a   :  { %5770 = vst [vmem:[#allocation51_spill] sm:$0xff] %v4411_v21  ;;  %v5771_v21 = vld [vmem:[#allocation30_spill] sm:$0xff]  ;;  %1949 = vmatpush.msra.mxu2 %v1777_v14  ;;  %1986 = vmatpush.msra.mxu3 %v1817_v19  ;;  %v1811_v14 = vld [vmem:[%s5565_s3 + $0x120] sm:$0xff] }
 0x21b   :  { %1359 = vmatmul.f32.gmra.mxu0 %v5771_v21  ;;  %1448 = vmatmul.f32.gmra.mxu1 %v4103_v30  ;;  %v4441_v21 = vpop.f32.mrf.mxu3 }
 0x21c   :  { %1950 = vmatpush.msra.mxu2 %v1775_v39  ;;  %1987 = vmatpush.msra.mxu3 %v1815_v35  ;;  %v1809_v39 = vld [vmem:[%s5565_s3 + $0x110] sm:$0xff]  ;;  %v5772_v35 = vld [vmem:[#allocation39_spill] sm:$0xff] }
 0x21d   :  { %v960_v50 = vadd.f32 %v4112_v4, %v5772_v35  ;;  %v1838_v4 = vld [vmem:[%s5565_s3 + $0x1f8] sm:$0xff]  ;;  %v4469_v24 = vpop.f32.mrf.mxu2 }
 0x21e   :  { %1988 = vmatpush.msra.mxu3 %v1813_v25  ;;  %v4456_v25 = vld [vmem:[%s5564_s2] ss:$0 sm:$0xff]  ;;  %2181 = vmatpush.msrb.mxu0 %v1838_v4  ;;  %v1866_v35 = vld [vmem:[%s5565_s3 + $0x2d8] sm:$0xff] }
 0x220   :  { %v1315_v30 = vpop.f32.mrf.mxu0  ;;  %v1404_v19 = vpop.f32.mrf.mxu1  ;;  %1989 = vmatpush.msra.mxu3 %v1811_v14 }
 0x221   :  { %v1316_v61 = vadd.f32 %v1315_v30, %v1227_v8  ;;  %v1807_v8 = vld [vmem:[%s5565_s3 + $0x100] sm:$0xff]  ;;  %v1230_v30 = vadd.f32 %v4323_v43, %v1141_v31  ;;  %v1832_v43 = vld [vmem:[%s5565_s3 + $0x1c8] sm:$0xff] }
 0x222   :  { %1990 = vmatpush.msra.mxu3 %v1809_v39  ;;  %v1864_v31 = vld [vmem:[%s5565_s3 + $0x2c8] sm:$0xff] }
 0x223   :  { %v1405_v5 = vadd.f32 %v1404_v19, %v1316_v61  ;;  %1362 = vmatmul.f32.gmra.mxu0 %v5773_v27  ;;  %1451 = vmatmul.f32.gmra.mxu1 %v4117_v16  ;;  %v1870_v61 = vld [vmem:[%s5565_s3 + $0x2f8] sm:$0xff]  ;;  %v1836_v27 = vld [vmem:[%s5565_s3 + $0x1e8] sm:$0xff] }
 0x224   :  { %2222 = vmatpush.msrb.mxu1 %v1870_v61  ;;  %1991 = vmatpush.msra.mxu3 %v1807_v8  ;;  %v1868_v16 = vld [vmem:[%s5565_s3 + $0x2e8] sm:$0xff]  ;;  %v5774_v61 = vld [vmem:[#allocation44_spill] sm:$0xff] }
 0x225   :  { %v1476_v56 = vmax.f32 %v960_v50, %v1405_v5  ;;  %2182 = vmatpush.msrb.mxu0 %v1836_v27  ;;  %v1834_v50 = vld [vmem:[%s5565_s3 + $0x1d8] sm:$0xff]  ;;  %v4485_v5 = vpop.f32.mrf.mxu3  ;;  %v1144_v27 = vadd.f32 %v4337_v12, %v4157_v54  ;;  %v1828_v54 = vld [vmem:[%s5565_s3 + $0x1a8] sm:$0xff] }
 0x226   :  { %2223 = vmatpush.msrb.mxu1 %v1868_v16 }
 0x227   :  { %v1504_v19 = vadd.f32 %v4456_v25, %v1476_v56  ;;  %2183 = vmatpush.msrb.mxu0 %v1834_v50  ;;  %v963_v56 = vadd.f32 %v4134_v38, %v5774_v61  ;;  %v1233_v12 = vadd.f32 %v4343_v7, %v1144_v27  ;;  %v1824_v7 = vld [vmem:[%s5565_s3 + $0x188] sm:$0xff] }
 0x228   :  { %v1318_v14 = vpop.f32.mrf.mxu0  ;;  %v1407_v39 = vpop.f32.mrf.mxu1  ;;  %2224 = vmatpush.msrb.mxu1 %v1866_v35  ;;  %v5776_v27 = vld [vmem:[#allocation49_spill] sm:$0xff] }
 0x229   :  { %v1528_v8 = vmax.f32 %v1504_v19, 0.0  ;;  %v1319_v4 = vadd.f32 %v1318_v14, %v1230_v30  ;;  %v5775_v19 = vld [vmem:[#allocation40_spill] sm:$0xff]  ;;  %2184 = vmatpush.msrb.mxu0 %v1832_v43  ;;  %v1830_v30 = vld [vmem:[%s5565_s3 + $0x1b8] sm:$0xff] }
 0x22a   :  { %2225 = vmatpush.msrb.mxu1 %v1864_v31  ;;  %v1862_v14 = vld [vmem:[%s5565_s3 + $0x2b8] sm:$0xff] }
 0x22b   :  { %1552 = vst [vmem:[#allocation2] sm:$0xff] %v1528_v8  ;;  %v1408_v16 = vadd.f32 %v1407_v39, %v1319_v4  ;;  %1365 = vmatmul.f32.gmra.mxu0 %v5775_v19  ;;  %1454 = vmatmul.f32.gmra.mxu1 %v4139_v41  ;;  %v1860_v41 = vld [vmem:[%s5565_s3 + $0x2a8] sm:$0xff]  ;;  %v4512_v39 = vpop.f32.mrf.mxu2  ;;  %v1826_v4 = vld [vmem:[%s5565_s3 + $0x198] sm:$0xff]  ;;  %v1147_v19 = vadd.f32 %v4350_v22, %v4169_v48 }
 0x22c   :  { %2185 = vmatpush.msrb.mxu0 %v1830_v30  ;;  %2226 = vmatpush.msrb.mxu1 %v1862_v14  ;;  %v1858_v43 = vld [vmem:[%s5565_s3 + $0x298] sm:$0xff]  ;;  %v1820_v48 = vld [vmem:[%s5565_s3 + $0x168] sm:$0xff] }
 0x22d   :  { %v1477_v38 = vmax.f32 %v963_v56, %v1408_v16  ;;  %v1856_v56 = vld [vmem:[%s5565_s3 + $0x288] sm:$0xff]  ;;  %v966_v16 = vadd.f32 %v4155_v53, %v5776_v27  ;;  %v4531_v30 = vpop.f32.mrf.mxu3  ;;  %v1854_v53 = vld [vmem:[%s5565_s3 + $0x278] sm:$0xff]  ;;  %v1236_v22 = vadd.f32 %v4362_v44, %v1147_v19  ;;  %v1150_v19 = vadd.f32 %v4385_v34, %v4187_v52 }
 0x22e   :  { %2186 = vmatpush.msrb.mxu0 %v1828_v54  ;;  %2227 = vmatpush.msrb.mxu1 %v1860_v41  ;;  %v1822_v54 = vld [vmem:[%s5565_s3 + $0x178] sm:$0xff] }
 0x22f   :  { %v1505_v50 = vadd.f32 %v4456_v25, %v1477_v38  ;;  %v5777_v38 = vld [vmem:[#allocation45_spill] sm:$0xff]  ;;  %v1846_v52 = vld [vmem:[%s5565_s3 + $0x238] sm:$0xff] }
 0x230   :  { %v1321_v35 = vpop.f32.mrf.mxu0  ;;  %v1410_v8 = vpop.f32.mrf.mxu1  ;;  %2187 = vmatpush.msrb.mxu0 %v1826_v4  ;;  %2228 = vmatpush.msrb.mxu1 %v1858_v43  ;;  %v1850_v4 = vld [vmem:[%s5565_s3 + $0x258] sm:$0xff] }
 0x231   :  { %v1529_v31 = vmax.f32 %v1505_v50, 0.0  ;;  %v1322_v61 = vadd.f32 %v1321_v35, %v1233_v12 }
 0x232   :  { %2188 = vmatpush.msrb.mxu0 %v1824_v7  ;;  %2229 = vmatpush.msrb.mxu1 %v1856_v56  ;;  %v5778_v7 = vld [vmem:[#allocation54_spill] sm:$0xff] }
 0x233   :  { %1553 = vst [vmem:[#allocation2 + $0x8] sm:$0xff] %v1529_v31  ;;  %v1411_v14 = vadd.f32 %v1410_v8, %v1322_v61  ;;  %1368 = vmatmul.f32.gmra.mxu0 %v5777_v38  ;;  %1457 = vmatmul.f32.gmra.mxu1 %v4160_v18  ;;  %v1852_v18 = vld [vmem:[%s5565_s3 + $0x268] sm:$0xff]  ;;  %v1818_v8 = vld [vmem:[%s5565_s3 + $0x158] sm:$0xff]  ;;  %v4555_v43 = vpop.f32.mrf.mxu2  ;;  %v969_v44 = vadd.f32 %v4167_v37, %v5778_v7  ;;  %v5779_v38 = vld [vmem:[#allocation50_spill] sm:$0xff] }
 0x234   :  { %2189 = vmatpush.msrb.mxu0 %v1822_v54  ;;  %2230 = vmatpush.msrb.mxu1 %v1854_v53  ;;  %v1848_v37 = vld [vmem:[%s5565_s3 + $0x248] sm:$0xff]  ;;  %v1814_v53 = vld [vmem:[%s5565_s3 + $0x138] sm:$0xff] }
 0x235   :  { %v1478_v41 = vmax.f32 %v966_v16, %v1411_v14  ;;  %v1816_v16 = vld [vmem:[%s5565_s3 + $0x148] sm:$0xff]  ;;  %v4577_v34 = vpop.f32.mrf.mxu3 }
 0x236   :  { %2190 = vmatpush.msrb.mxu0 %v1820_v48  ;;  %2231 = vmatpush.msrb.mxu1 %v1852_v18  ;;  %v1844_v48 = vld [vmem:[%s5565_s3 + $0x228] sm:$0xff]  ;;  %v1239_v18 = vadd.f32 %v4401_v3, %v1150_v19 }
 0x237   :  { %v1506_v12 = vadd.f32 %v4456_v25, %v1478_v41 }
 0x238   :  { %v1324_v50 = vpop.f32.mrf.mxu0  ;;  %v1413_v35 = vpop.f32.mrf.mxu1  ;;  %2191 = vmatpush.msrb.mxu0 %v1818_v8  ;;  %2232 = vmatpush.msrb.mxu1 %v1850_v4  ;;  %v1842_v8 = vld [vmem:[%s5565_s3 + $0x218] sm:$0xff] }
 0x239   :  { %v1530_v31 = vmax.f32 %v1506_v12, 0.0  ;;  %v1325_v61 = vadd.f32 %v1324_v50, %v1236_v22 }
 0x23a   :  { %v1576_v56 = vld [vmem:[#allocation2] ss:$2 sm:$0xff]  ;;  %v1592_v27 = vld [vmem:[#allocation2 + $0x1] ss:$2 sm:$0xff]  ;;  %2192 = vmatpush.msrb.mxu0 %v1816_v16  ;;  %2233 = vmatpush.msrb.mxu1 %v1848_v37 }
 0x23b   :  { %1554 = vst [vmem:[#allocation2 + $0x10] sm:$0xff] %v1530_v31  ;;  %v1414_v14 = vadd.f32 %v1413_v35, %v1325_v61  ;;  %1371 = vmatmul.f32.gmra.mxu0 %v5779_v38  ;;  %1460 = vmatmul.f32.gmra.mxu1 %v4172_v42  ;;  %v4566_v54 = vmax.f32 %v1576_v56, %v1592_v27  ;;  %v1812_v42 = vld [vmem:[%s5565_s3 + $0x128] sm:$0xff]  ;;  %v1810_v35 = vld [vmem:[%s5565_s3 + $0x118] sm:$0xff]  ;;  %v5780_v61 = vld [vmem:[#allocation58_spill] sm:$0xff]  ;;  %v4601_v16 = vpop.f32.mrf.mxu2 }
 0x23c   :  { %2193 = vmatpush.msrb.mxu0 %v1814_v53  ;;  %2234 = vmatpush.msrb.mxu1 %v1846_v52  ;;  %v972_v7 = vadd.f32 %v4185_v1, %v5780_v61  ;;  %v1808_v56 = vld [vmem:[%s5565_s3 + $0x108] sm:$0xff]  ;;  %v1153_v27 = vadd.f32 %v4427_v17, %v4200_v0 }
 0x23d   :  { %v1479_v41 = vmax.f32 %v969_v44, %v1414_v14  ;;  %1951 = vmatmul.f32.vlgmr.msra.gmra.mxu2 %v4566_v54  ;;  %v5781_v14 = vld [vmem:[#allocation55_spill] sm:$0xff]  ;;  %v1840_v38 = vld [vmem:[%s5565_s3 + $0x208] sm:$0xff]  ;;  %v4612_v17 = vpop.f32.mrf.mxu3 }
 0x23e   :  { %2194 = vmatpush.msrb.mxu0 %v1812_v42  ;;  %2235 = vmatpush.msrb.mxu1 %v1844_v48  ;;  %v1242_v0 = vadd.f32 %v4441_v21, %v1153_v27  ;;  %v5782_v48 = vld [vmem:[#allocation62_spill] sm:$0xff] }
 0x23f   :  { %v1507_v22 = vadd.f32 %v4456_v25, %v1479_v41 }
 0x240   :  { %v1327_v12 = vpop.f32.mrf.mxu0  ;;  %v1416_v50 = vpop.f32.mrf.mxu1  ;;  %2195 = vmatpush.msrb.mxu0 %v1810_v35  ;;  %2236 = vmatpush.msrb.mxu1 %v1842_v8 }
 0x241   :  { %v1531_v4 = vmax.f32 %v1507_v22, 0.0  ;;  %v1328_v31 = vadd.f32 %v1327_v12, %v1239_v18  ;;  %v975_v18 = vadd.f32 %v4198_v58, %v5782_v48  ;;  %v1156_v22 = vadd.f32 %v4469_v24, %v4212_v57  ;;  %v5784_v57 = vld [vmem:[#allocation64_spill] sm:$0xff] }
 0x242   :  { %v1616_v3 = vld [vmem:[#allocation2 + $0x2] ss:$2 sm:$0xff]  ;;  %v1632_v44 = vld [vmem:[#allocation2 + $0x3] ss:$2 sm:$0xff]  ;;  %2196 = vmatpush.msrb.mxu0 %v1808_v56  ;;  %2237 = vmatpush.msrb.mxu1 %v1840_v38  ;;  %v978_v24 = vadd.f32 %v4210_v36, %v5784_v57 }
 0x243   :  { %1555 = vst [vmem:[#allocation2 + $0x18] sm:$0xff] %v1531_v4  ;;  %v1417_v19 = vadd.f32 %v1416_v50, %v1328_v31  ;;  %1374 = vmatmul.f32.gmra.mxu0 %v5781_v14  ;;  %1463 = vmatmul.f32.gmra.mxu1 %v4190_v59  ;;  %v4605_v1 = vmax.f32 %v1616_v3, %v1632_v44  ;;  %v5783_v50 = vld [vmem:[#allocation59_spill] sm:$0xff]  ;;  %v4621_v21 = vpop.f32.mrf.mxu2 }
 0x244   :  { %v1245_v8 = vadd.f32 %v4485_v5, %v1156_v22  ;;  %v1656_v22 = vld [vmem:[#allocation2 + $0x4] ss:$2 sm:$0xff] }
 0x245   :  { %v1480_v37 = vmax.f32 %v972_v7, %v1417_v19  ;;  %1992 = vmatmul.f32.vlgmr.msra.gmra.mxu3 %v4605_v1  ;;  %v4625_v7 = vpop.f32.mrf.mxu3  ;;  %v5785_v19 = vld [vmem:[#allocation63_spill] sm:$0xff] }
 0x247   :  { %v1508_v53 = vadd.f32 %v4456_v25, %v1480_v37 }
 0x248   :  { %v1330_v52 = vpop.f32.mrf.mxu0  ;;  %v1419_v41 = vpop.f32.mrf.mxu1 }
 0x249   :  { %v1532_v59 = vmax.f32 %v1508_v53, 0.0  ;;  %v1331_v42 = vadd.f32 %v1330_v52, %v1242_v0  ;;  %v981_v52 = vadd.f32 %v4222_v45, %v3876_v46 }
 0x24b   :  { %1556 = vst [vmem:[#allocation2 + $0x20] sm:$0xff] %v1532_v59  ;;  %v1420_v12 = vadd.f32 %v1419_v41, %v1331_v42  ;;  %1377 = vmatmul.f32.gmra.mxu0 %v5783_v50  ;;  %1466 = vmatmul.f32.gmra.mxu1 %v4203_v26  ;;  %v1159_v26 = vadd.f32 %v4512_v39, %v4224_v33  ;;  %v4637_v37 = vpop.f32.mrf.mxu2 }
 0x24c   :  { %v1162_v59 = vadd.f32 %v4555_v43, %v4235_v6 }
 0x24d   :  { %v1481_v35 = vmax.f32 %v975_v18, %v1420_v12  ;;  %v1248_v38 = vadd.f32 %v4531_v30, %v1159_v26  ;;  %v4644_v42 = vpop.f32.mrf.mxu3  ;;  %v1672_v12 = vld [vmem:[#allocation2 + $0x5] ss:$2 sm:$0xff] }
 0x24e   :  { %v1251_v46 = vadd.f32 %v4577_v34, %v1162_v59 }
 0x24f   :  { %v1509_v4 = vadd.f32 %v4456_v25, %v1481_v35 }
 0x250   :  { %v1333_v31 = vpop.f32.mrf.mxu0  ;;  %v1422_v61 = vpop.f32.mrf.mxu1 }
 0x251   :  { %v1533_v58 = vmax.f32 %v1509_v4, 0.0  ;;  %v1334_v3 = vadd.f32 %v1333_v31, %v1245_v8  ;;  %v4652_v4 = vmax.f32 %v1656_v22, %v1672_v12 }
 0x252   :  { %v1578_v44 = vld [vmem:[#allocation2 + $0x18] ss:$2 sm:$0xff]  ;;  %v1594_v56 = vld [vmem:[#allocation2 + $0x19] ss:$2 sm:$0xff] }
 0x253   :  { %1557 = vst [vmem:[#allocation2 + $0x28] sm:$0xff] %v1533_v58  ;;  %v1423_v27 = vadd.f32 %v1422_v61, %v1334_v3  ;;  %1380 = vmatmul.f32.gmra.mxu0 %v5785_v19  ;;  %1469 = vmatmul.f32.gmra.mxu1 %v4215_v9  ;;  %v4633_v5 = vmax.f32 %v1578_v44, %v1594_v56  ;;  %v4650_v6 = vpop.f32.mrf.mxu2 }
 0x255   :  { %v1482_v14 = vmax.f32 %v978_v24, %v1423_v27  ;;  %1954 = vmatmul.f32.gmra.mxu2 %v4633_v5  ;;  %v1262_v34 = vpop.f32.mrf.mxu3  ;;  %v1168_v27 = vadd.f32 %v4621_v21, %v4247_v20 }
 0x257   :  { %v1510_v36 = vadd.f32 %v4456_v25, %v1482_v14 }
 0x258   :  { %v1336_v0 = vpop.f32.mrf.mxu0  ;;  %v1425_v53 = vpop.f32.mrf.mxu1 }
 0x259   :  { %v1534_v33 = vmax.f32 %v1510_v36, 0.0  ;;  %v1337_v39 = vadd.f32 %v1336_v0, %v1248_v38  ;;  %v1257_v36 = vadd.f32 %v4625_v7, %v1168_v27 }
 0x25a   :  { %v1618_v41 = vld [vmem:[#allocation2 + $0x1a] ss:$2 sm:$0xff]  ;;  %v1634_v9 = vld [vmem:[#allocation2 + $0x1b] ss:$2 sm:$0xff] }
 0x25b   :  { %1558 = vst [vmem:[#allocation2 + $0x30] sm:$0xff] %v1534_v33  ;;  %v1426_v30 = vadd.f32 %v1425_v53, %v1337_v39  ;;  %1383 = vmatmul.f32.gmra.mxu0 %v3857_v51  ;;  %1472 = vmatmul.f32.gmra.mxu1 %v4227_v47  ;;  %v1648_v48 = vmax.f32 %v1618_v41, %v1634_v9  ;;  %v1658_v58 = vld [vmem:[#allocation2 + $0x1c] ss:$2 sm:$0xff]  ;;  %v1674_v3 = vld [vmem:[#allocation2 + $0x1d] ss:$2 sm:$0xff]  ;;  %v1176_v19 = vpop.f32.mrf.mxu2 }
 0x25c   :  { %v984_v51 = vadd.f32 %v4233_v28, %v3888_v2  ;;  %v1165_v47 = vadd.f32 %v4601_v16, %v4241_v60  ;;  %v4662_v26 = vmax.f32 %v1658_v58, %v1674_v3  ;;  %v987_v60 = vadd.f32 %v4239_v29, %v3900_v13 }
 0x25d   :  { %v1483_v18 = vmax.f32 %v981_v52, %v1426_v30  ;;  %1995 = vmatmul.f32.gmra.mxu3 %v1648_v48  ;;  %v1265_v0 = vpop.f32.mrf.mxu3  ;;  %v990_v41 = vadd.f32 %v4245_v55, %v3919_v10  ;;  %v1171_v9 = vadd.f32 %v4637_v37, %v4253_v11 }
 0x25e   :  { %v1254_v57 = vadd.f32 %v4612_v17, %v1165_v47 }
 0x25f   :  { %v1511_v45 = vadd.f32 %v4456_v25, %v1483_v18  ;;  %v1260_v12 = vadd.f32 %v4644_v42, %v1171_v9 }
 0x260   :  { %v1339_v50 = vpop.f32.mrf.mxu0  ;;  %v1428_v35 = vpop.f32.mrf.mxu1 }
 0x261   :  { %v1535_v43 = vmax.f32 %v1511_v45, 0.0  ;;  %v1340_v8 = vadd.f32 %v1339_v50, %v1251_v46  ;;  %v993_v50 = vadd.f32 %v4251_v62, %v3932_v32  ;;  %v1177_v32 = vadd.f32 %v1176_v19, %v4265_v63  ;;  %v5786_v63 = vld [vmem:[#allocation22_spill] sm:$0xff] }
 0x262   :  { %v999_v19 = vadd.f32 %v5786_v63, %v3964_v23  ;;  %v5795_v63 = vld [vmem:[#allocation29_spill] sm:$0xff] }
 0x263   :  { %1559 = vst [vmem:[#allocation2 + $0x38] sm:$0xff] %v1535_v43  ;;  %v1429_v31 = vadd.f32 %v1428_v35, %v1340_v8  ;;  %2197 = vmatmul.f32.vlgmr.msrb.gmra.mxu0 %v4605_v1  ;;  %2238 = vmatmul.f32.vlgmr.msrb.gmra.mxu1 %v4652_v4  ;;  %v1179_v18 = vpop.f32.mrf.mxu2  ;;  %v1174_v35 = vadd.f32 %v4650_v6, %v4259_v49 }
 0x265   :  { %v1484_v61 = vmax.f32 %v984_v51, %v1429_v31  ;;  %v1268_v45 = vpop.f32.mrf.mxu3  ;;  %v1263_v51 = vadd.f32 %v1262_v34, %v1174_v35 }
 0x267   :  { %v1512_v24 = vadd.f32 %v4456_v25, %v1484_v61 }
 0x268   :  { %v1342_v44 = vpop.f32.mrf.mxu0  ;;  %v1431_v56 = vpop.f32.mrf.mxu1 }
 0x269   :  { %v1536_v2 = vmax.f32 %v1512_v24, 0.0  ;;  %v1343_v28 = vadd.f32 %v1342_v44, %v1254_v57  ;;  %v996_v44 = vadd.f32 %v4257_v40, %v3947_v15 }
 0x26a   :  { %v1580_v16 = vld [vmem:[#allocation2 + $0x30] ss:$2 sm:$0xff]  ;;  %v1596_v1 = vld [vmem:[#allocation2 + $0x31] ss:$2 sm:$0xff] }
 0x26b   :  { %1560 = vst [vmem:[#allocation2 + $0x40] sm:$0xff] %v1536_v2  ;;  %v1432_v14 = vadd.f32 %v1431_v56, %v1343_v28  ;;  %2200 = vmatmul.f32.gmra.mxu0 %v1648_v48  ;;  %2241 = vmatmul.f32.gmra.mxu1 %v4662_v26  ;;  %v4669_v17 = vmax.f32 %v1580_v16, %v1596_v1  ;;  %v1182_v47 = vpop.f32.mrf.mxu2 }
 0x26c   :  { %v1266_v56 = vadd.f32 %v1265_v0, %v1177_v32  ;;  %v1867_v32 = vld [vmem:[%s5565_s3 + $0x2e0] sm:$0xff] }
 0x26d   :  { %v1485_v38 = vmax.f32 %v987_v60, %v1432_v14  ;;  %1957 = vmatmul.f32.gmra.mxu2 %v4669_v17  ;;  %v1271_v62 = vpop.f32.mrf.mxu3 }
 0x26f   :  { %v1513_v13 = vadd.f32 %v4456_v25, %v1485_v38  ;;  %v5787_v38 = vld [vmem:[#allocation25_spill] sm:$0xff] }
 0x270   :  { %v1345_v29 = vpop.f32.mrf.mxu0  ;;  %v1434_v53 = vpop.f32.mrf.mxu1 }
 0x271   :  { %v1537_v33 = vmax.f32 %v1513_v13, 0.0  ;;  %v1346_v20 = vadd.f32 %v1345_v29, %v1257_v36  ;;  %v1180_v36 = vadd.f32 %v1179_v18, %v5787_v38  ;;  %v5790_v18 = vld [vmem:[#allocation27_spill] sm:$0xff]  ;;  %v5796_v38 = vld [vmem:[#allocation33_spill] sm:$0xff] }
 0x272   :  { %v1620_v21 = vld [vmem:[#allocation2 + $0x32] ss:$2 sm:$0xff]  ;;  %v1636_v39 = vld [vmem:[#allocation2 + $0x33] ss:$2 sm:$0xff] }
 0x273   :  { %v1660_v52 = vld [vmem:[#allocation2 + $0x34] ss:$2 sm:$0xff]  ;;  %1561 = vst [vmem:[#allocation2 + $0x48] sm:$0xff] %v1537_v33  ;;  %v1435_v59 = vadd.f32 %v1434_v53, %v1346_v20  ;;  %v1649_v30 = vmax.f32 %v1620_v21, %v1636_v39  ;;  %v1676_v7 = vld [vmem:[#allocation2 + $0x35] ss:$2 sm:$0xff]  ;;  %v1185_v16 = vpop.f32.mrf.mxu2  ;;  %v1269_v21 = vadd.f32 %v1268_v45, %v1180_v36 }
 0x274   :  { %v4678_v48 = vmax.f32 %v1660_v52, %v1676_v7 }
 0x275   :  { %v1486_v22 = vmax.f32 %v990_v41, %v1435_v59  ;;  %1998 = vmatmul.f32.gmra.mxu3 %v1649_v30  ;;  %2203 = vmatmul.f32.gmra.mxu0 %v1649_v30  ;;  %v1274_v33 = vpop.f32.mrf.mxu3  ;;  %v5788_v59 = vld [vmem:[#allocation65_spill] sm:$0xff]  ;;  %v5789_v30 = vld [vmem:[#allocation24_spill] sm:$0xff] }
 0x276   :  { %2244 = vmatmul.f32.gmra.mxu1 %v4678_v48  ;;  %v1002_v7 = vadd.f32 %v5789_v30, %v5788_v59 }
 0x277   :  { %v1514_v46 = vadd.f32 %v4456_v25, %v1486_v22  ;;  %v1183_v22 = vadd.f32 %v1182_v47, %v5790_v18 }
 0x278   :  { %v1348_v10 = vpop.f32.mrf.mxu0  ;;  %v1437_v55 = vpop.f32.mrf.mxu1 }
 0x279   :  { %v1538_v11 = vmax.f32 %v1514_v46, 0.0  ;;  %v1349_v37 = vadd.f32 %v1348_v10, %v1260_v12 }
 0x27b   :  { %1562 = vst [vmem:[#allocation2 + $0x50] sm:$0xff] %v1538_v11  ;;  %v1438_v43 = vadd.f32 %v1437_v55, %v1349_v37  ;;  %v1188_v12 = vpop.f32.mrf.mxu2  ;;  %v1272_v55 = vadd.f32 %v1271_v62, %v1183_v22 }
 0x27c   :  { %v1189_v36 = vadd.f32 %v1188_v12, %v5796_v38  ;;  %v5797_v12 = vld [vmem:[#allocation68_spill] sm:$0xff] }
 0x27d   :  { %v1487_v8 = vmax.f32 %v993_v50, %v1438_v43  ;;  %v1277_v11 = vpop.f32.mrf.mxu3 }
 0x27f   :  { %v1515_v42 = vadd.f32 %v4456_v25, %v1487_v8 }
 0x280   :  { %v1351_v31 = vpop.f32.mrf.mxu0  ;;  %v1440_v61 = vpop.f32.mrf.mxu1 }
 0x281   :  { %v1539_v58 = vmax.f32 %v1515_v42, 0.0  ;;  %v1352_v3 = vadd.f32 %v1351_v31, %v1263_v51  ;;  %v5791_v42 = vld [vmem:[#allocation66_spill] sm:$0xff]  ;;  %v5792_v31 = vld [vmem:[#allocation23_spill] sm:$0xff] }
 0x282   :  { %v1582_v57 = vld [vmem:[#allocation2 + $0x48] ss:$2 sm:$0xff]  ;;  %v1598_v24 = vld [vmem:[#allocation2 + $0x49] ss:$2 sm:$0xff] }
 0x283   :  { %1563 = vst [vmem:[#allocation2 + $0x58] sm:$0xff] %v1539_v58  ;;  %v1441_v49 = vadd.f32 %v1440_v61, %v1352_v3  ;;  %v4691_v6 = vmax.f32 %v1582_v57, %v1598_v24  ;;  %v1005_v61 = vadd.f32 %v5792_v31, %v5791_v42  ;;  %v5793_v58 = vld [vmem:[#allocation28_spill] sm:$0xff]  ;;  %v1869_v24 = vld [vmem:[%s5565_s3 + $0x2f0] sm:$0xff]  ;;  %v1191_v62 = vpop.f32.mrf.mxu2 }
 0x284   :  { %v1186_v3 = vadd.f32 %v1185_v16, %v5793_v58  ;;  %2017 = vmatpush.msrb.mxu2 %v1869_v24 }
 0x285   :  { %v1488_v34 = vmax.f32 %v996_v44, %v1441_v49  ;;  %1960 = vmatmul.f32.gmra.mxu2 %v4691_v6  ;;  %v1901_v44 = vld [vmem:[%s5565_s3 + $0x3f0] sm:$0xff] }
 0x286   :  { %2058 = vmatpush.msrb.mxu3 %v1901_v44  ;;  %2018 = vmatpush.msrb.mxu2 %v1867_v32 }
 0x287   :  { %v1516_v2 = vadd.f32 %v4456_v25, %v1488_v34  ;;  %v1275_v34 = vadd.f32 %v1274_v33, %v1186_v3  ;;  %v1899_v33 = vld [vmem:[%s5565_s3 + $0x3e0] sm:$0xff] }
 0x288   :  { %v1354_v28 = vpop.f32.mrf.mxu0  ;;  %v1443_v60 = vpop.f32.mrf.mxu1  ;;  %2059 = vmatpush.msrb.mxu3 %v1899_v33 }
 0x289   :  { %v1540_v1 = vmax.f32 %v1516_v2, 0.0  ;;  %v1355_v27 = vadd.f32 %v1354_v28, %v1266_v56 }
 0x28a   :  { %v1622_v14 = vld [vmem:[#allocation2 + $0x4a] ss:$2 sm:$0xff]  ;;  %v1638_v15 = vld [vmem:[#allocation2 + $0x4b] ss:$2 sm:$0xff] }
 0x28b   :  { %v1662_v40 = vld [vmem:[#allocation2 + $0x4c] ss:$2 sm:$0xff]  ;;  %1564 = vst [vmem:[#allocation2 + $0x60] sm:$0xff] %v1540_v1  ;;  %v1444_v13 = vadd.f32 %v1443_v60, %v1355_v27  ;;  %v1650_v29 = vmax.f32 %v1622_v14, %v1638_v15  ;;  %v1678_v53 = vld [vmem:[#allocation2 + $0x4d] ss:$2 sm:$0xff]  ;;  %v1280_v60 = vpop.f32.mrf.mxu3 }
 0x28c   :  { %v4698_v0 = vmax.f32 %v1662_v40, %v1678_v53  ;;  %v5794_v40 = vld [vmem:[#allocation67_spill] sm:$0xff] }
 0x28d   :  { %v1489_v20 = vmax.f32 %v999_v19, %v1444_v13  ;;  %2001 = vmatmul.f32.gmra.mxu3 %v1650_v29  ;;  %2206 = vmatmul.f32.gmra.mxu0 %v1650_v29  ;;  %v1008_v19 = vadd.f32 %v5795_v63, %v5794_v40 }
 0x28e   :  { %2247 = vmatmul.f32.gmra.mxu1 %v4698_v0 }
 0x28f   :  { %v1517_v39 = vadd.f32 %v4456_v25, %v1489_v20  ;;  %v1865_v20 = vld [vmem:[%s5565_s3 + $0x2d0] sm:$0xff] }
 0x290   :  { %v1357_v52 = vpop.f32.mrf.mxu0  ;;  %v1446_v41 = vpop.f32.mrf.mxu1  ;;  %2019 = vmatpush.msrb.mxu2 %v1865_v20 }
 0x291   :  { %v1541_v23 = vmax.f32 %v1517_v39, 0.0  ;;  %v1358_v9 = vadd.f32 %v1357_v52, %v1269_v21  ;;  %v1897_v39 = vld [vmem:[%s5565_s3 + $0x3d0] sm:$0xff]  ;;  %v1863_v52 = vld [vmem:[%s5565_s3 + $0x2c0] sm:$0xff] }
 0x292   :  { %2060 = vmatpush.msrb.mxu3 %v1897_v39  ;;  %2020 = vmatpush.msrb.mxu2 %v1863_v52  ;;  %v5803_v39 = vld [vmem:[#allocation70_spill] sm:$0xff]  ;;  %v5804_v52 = vld [vmem:[#allocation37_spill] sm:$0xff] }
 0x293   :  { %1565 = vst [vmem:[#allocation2 + $0x68] sm:$0xff] %v1541_v23  ;;  %v1447_v46 = vadd.f32 %v1446_v41, %v1358_v9  ;;  %v1278_v23 = vadd.f32 %v1277_v11, %v1189_v36  ;;  %v1194_v9 = vpop.f32.mrf.mxu2  ;;  %v1895_v11 = vld [vmem:[%s5565_s3 + $0x3c0] sm:$0xff] }
 0x294   :  { %2061 = vmatpush.msrb.mxu3 %v1895_v11 }
 0x295   :  { %v1490_v10 = vmax.f32 %v1002_v7, %v1447_v46  ;;  %v5798_v46 = vld [vmem:[#allocation31_spill] sm:$0xff] }
 0x297   :  { %v1518_v37 = vadd.f32 %v4456_v25, %v1490_v10  ;;  %v1011_v10 = vadd.f32 %v5798_v46, %v5797_v12  ;;  %v1853_v12 = vld [vmem:[%s5565_s3 + $0x270] sm:$0xff] }
 0x298   :  { %v1360_v45 = vpop.f32.mrf.mxu0  ;;  %v1449_v50 = vpop.f32.mrf.mxu1 }
 0x299   :  { %v1542_v35 = vmax.f32 %v1518_v37, 0.0  ;;  %v1361_v43 = vadd.f32 %v1360_v45, %v1272_v55  ;;  %v5799_v55 = vld [vmem:[#allocation35_spill] sm:$0xff]  ;;  %v1283_v45 = vpop.f32.mrf.mxu3 }
 0x29a   :  { %v1584_v8 = vld [vmem:[#allocation2 + $0x60] ss:$2 sm:$0xff]  ;;  %v1600_v51 = vld [vmem:[#allocation2 + $0x61] ss:$2 sm:$0xff]  ;;  %v1192_v37 = vadd.f32 %v1191_v62, %v5799_v55 }
 0x29b   :  { %1566 = vst [vmem:[#allocation2 + $0x70] sm:$0xff] %v1542_v35  ;;  %v1450_v47 = vadd.f32 %v1449_v50, %v1361_v43  ;;  %v4709_v57 = vmax.f32 %v1584_v8, %v1600_v51  ;;  %v1861_v35 = vld [vmem:[%s5565_s3 + $0x2b0] sm:$0xff]  ;;  %v1859_v8 = vld [vmem:[%s5565_s3 + $0x2a0] sm:$0xff]  ;;  %v1197_v3 = vpop.f32.mrf.mxu2  ;;  %v5800_v62 = vld [vmem:[#allocation69_spill] sm:$0xff] }
 0x29c   :  { %v1893_v43 = vld [vmem:[%s5565_s3 + $0x3b0] sm:$0xff]  ;;  %2021 = vmatpush.msrb.mxu2 %v1861_v35  ;;  %v1281_v42 = vadd.f32 %v1280_v60, %v1192_v37  ;;  %v1891_v60 = vld [vmem:[%s5565_s3 + $0x3a0] sm:$0xff] }
 0x29d   :  { %v1491_v49 = vmax.f32 %v1005_v61, %v1450_v47  ;;  %1963 = vmatmul.f32.gmra.mxu2 %v4709_v57  ;;  %2062 = vmatpush.msrb.mxu3 %v1893_v43  ;;  %v1851_v55 = vld [vmem:[%s5565_s3 + $0x260] sm:$0xff] }
 0x29e   :  { %2022 = vmatpush.msrb.mxu2 %v1859_v8 }
 0x29f   :  { %v1519_v56 = vadd.f32 %v4456_v25, %v1491_v49  ;;  %v5801_v49 = vld [vmem:[#allocation32_spill] sm:$0xff]  ;;  %2063 = vmatpush.msrb.mxu3 %v1891_v60 }
 0x2a0   :  { %v1363_v2 = vpop.f32.mrf.mxu0  ;;  %v1452_v28 = vpop.f32.mrf.mxu1 }
 0x2a1   :  { %v1543_v16 = vmax.f32 %v1519_v56, 0.0  ;;  %v1364_v1 = vadd.f32 %v1363_v2, %v1275_v34  ;;  %v1014_v34 = vadd.f32 %v5801_v49, %v5800_v62  ;;  %v5802_v56 = vld [vmem:[#allocation38_spill] sm:$0xff]  ;;  %v1847_v62 = vld [vmem:[%s5565_s3 + $0x240] sm:$0xff] }
 0x2a2   :  { %v1624_v27 = vld [vmem:[#allocation2 + $0x62] ss:$2 sm:$0xff]  ;;  %v1640_v14 = vld [vmem:[#allocation2 + $0x63] ss:$2 sm:$0xff]  ;;  %v1195_v2 = vadd.f32 %v1194_v9, %v5802_v56 }
 0x2a3   :  { %v1664_v15 = vld [vmem:[#allocation2 + $0x64] ss:$2 sm:$0xff]  ;;  %1567 = vst [vmem:[#allocation2 + $0x78] sm:$0xff] %v1543_v16  ;;  %v1453_v13 = vadd.f32 %v1452_v28, %v1364_v1  ;;  %v1651_v29 = vmax.f32 %v1624_v27, %v1640_v14  ;;  %v1680_v53 = vld [vmem:[#allocation2 + $0x65] ss:$2 sm:$0xff] }
 0x2a4   :  { %v4731_v21 = vmax.f32 %v1664_v15, %v1680_v53  ;;  %v1857_v1 = vld [vmem:[%s5565_s3 + $0x290] sm:$0xff]  ;;  %v1855_v14 = vld [vmem:[%s5565_s3 + $0x280] sm:$0xff]  ;;  %v1286_v15 = vpop.f32.mrf.mxu3  ;;  %v1284_v63 = vadd.f32 %v1283_v45, %v1195_v2 }
 0x2a5   :  { %v1492_v41 = vmax.f32 %v1008_v19, %v1453_v13  ;;  %2004 = vmatmul.f32.gmra.mxu3 %v1651_v29  ;;  %2209 = vmatmul.f32.gmra.mxu0 %v1651_v29  ;;  %v1889_v27 = vld [vmem:[%s5565_s3 + $0x390] sm:$0xff]  ;;  %v1879_v2 = vld [vmem:[%s5565_s3 + $0x340] sm:$0xff] }
 0x2a6   :  { %2250 = vmatmul.f32.gmra.mxu1 %v4731_v21  ;;  %2023 = vmatpush.msrb.mxu2 %v1857_v1  ;;  %v1845_v49 = vld [vmem:[%s5565_s3 + $0x230] sm:$0xff] }
 0x2a7   :  { %v1520_v59 = vadd.f32 %v4456_v25, %v1492_v41  ;;  %2064 = vmatpush.msrb.mxu3 %v1889_v27  ;;  %v1017_v41 = vadd.f32 %v5804_v52, %v5803_v39  ;;  %v1877_v27 = vld [vmem:[%s5565_s3 + $0x330] sm:$0xff]  ;;  %v5811_v39 = vld [vmem:[#allocation48_spill] sm:$0xff] }
 0x2a8   :  { %v1366_v30 = vpop.f32.mrf.mxu0  ;;  %v1455_v7 = vpop.f32.mrf.mxu1  ;;  %2024 = vmatpush.msrb.mxu2 %v1855_v14 }
 0x2a9   :  { %v1544_v18 = vmax.f32 %v1520_v59, 0.0  ;;  %v1367_v22 = vadd.f32 %v1366_v30, %v1278_v23  ;;  %v5805_v23 = vld [vmem:[#allocation41_spill] sm:$0xff]  ;;  %v1200_v59 = vpop.f32.mrf.mxu2 }
 0x2aa   :  { %v1198_v9 = vadd.f32 %v1197_v3, %v5805_v23  ;;  %2025 = vmatpush.msrb.mxu2 %v1853_v12  ;;  %v5808_v3 = vld [vmem:[#allocation42_spill] sm:$0xff] }
 0x2ab   :  { %1568 = vst [vmem:[#allocation2 + $0x80] sm:$0xff] %v1544_v18  ;;  %v1456_v50 = vadd.f32 %v1455_v7, %v1367_v22  ;;  %v1887_v22 = vld [vmem:[%s5565_s3 + $0x380] sm:$0xff] }
 0x2ac   :  { %2065 = vmatpush.msrb.mxu3 %v1887_v22  ;;  %v1287_v45 = vadd.f32 %v1286_v15, %v1198_v9  ;;  %2026 = vmatpush.msrb.mxu2 %v1851_v55  ;;  %v1839_v9 = vld [vmem:[%s5565_s3 + $0x200] sm:$0xff] }
 0x2ad   :  { %v1493_v51 = vmax.f32 %v1011_v10, %v1456_v50  ;;  %v1885_v10 = vld [vmem:[%s5565_s3 + $0x370] sm:$0xff]  ;;  %v1289_v50 = vpop.f32.mrf.mxu3  ;;  %v1871_v55 = vld [vmem:[%s5565_s3 + $0x300] sm:$0xff] }
 0x2ae   :  { %2066 = vmatpush.msrb.mxu3 %v1885_v10 }
 0x2af   :  { %v1521_v31 = vadd.f32 %v4456_v25, %v1493_v51 }
 0x2b0   :  { %v1369_v61 = vpop.f32.mrf.mxu0  ;;  %v1458_v58 = vpop.f32.mrf.mxu1 }
 0x2b1   :  { %v1545_v47 = vmax.f32 %v1521_v31, 0.0  ;;  %v1370_v24 = vadd.f32 %v1369_v61, %v1281_v42  ;;  %v1849_v42 = vld [vmem:[%s5565_s3 + $0x250] sm:$0xff]  ;;  %v5806_v31 = vld [vmem:[#allocation16_spill] sm:$0xff] }
 0x2b2   :  { %v1586_v44 = vld [vmem:[#allocation2 + $0x78] ss:$2 sm:$0xff]  ;;  %v1602_v32 = vld [vmem:[#allocation2 + $0x79] ss:$2 sm:$0xff]  ;;  %2027 = vmatpush.msrb.mxu2 %v1849_v42 }
 0x2b3   :  { %1569 = vst [vmem:[#allocation2 + $0x88] sm:$0xff] %v1545_v47  ;;  %v1459_v28 = vadd.f32 %v1458_v58, %v1370_v24  ;;  %v4760_v16 = vmax.f32 %v1586_v44, %v1602_v32  ;;  %v5807_v61 = vld [vmem:[#allocation36_spill] sm:$0xff]  ;;  %v1201_v47 = vadd.f32 %v1200_v59, %v5808_v3  ;;  %v1881_v32 = vld [vmem:[%s5565_s3 + $0x350] sm:$0xff]  ;;  %v5814_v42 = vld [vmem:[#allocation51_spill] sm:$0xff] }
 0x2b4   :  { %v1020_v58 = vadd.f32 %v5807_v61, %v5806_v31  ;;  %v1883_v44 = vld [vmem:[%s5565_s3 + $0x360] sm:$0xff]  ;;  %2028 = vmatpush.msrb.mxu2 %v1847_v62  ;;  %v1933_v3 = vld [vmem:[%s5565_s3 + $0x4f0] sm:$0xff] }
 0x2b5   :  { %v1494_v40 = vmax.f32 %v1014_v34, %v1459_v28  ;;  %1966 = vmatmul.f32.gmra.mxu2 %v4760_v16  ;;  %2067 = vmatpush.msrb.mxu3 %v1883_v44  ;;  %v1203_v34 = vpop.f32.mrf.mxu2  ;;  %v1843_v28 = vld [vmem:[%s5565_s3 + $0x220] sm:$0xff]  ;;  %v1290_v60 = vadd.f32 %v1289_v50, %v1201_v47 }
 0x2b6   :  { %2029 = vmatpush.msrb.mxu2 %v1845_v49  ;;  %v1204_v52 = vadd.f32 %v1203_v34, %v5811_v39  ;;  %v1931_v62 = vld [vmem:[%s5565_s3 + $0x4e0] sm:$0xff] }
 0x2b7   :  { %v1522_v19 = vadd.f32 %v4456_v25, %v1494_v40  ;;  %2068 = vmatpush.msrb.mxu3 %v1881_v32  ;;  %v1806_v32 = vld [vmem:[%s5565_s3 + $0xf8] sm:$0xff]  ;;  %v2828_v34 = vld [vmem:[%s5564_s2] ss:$0 sm:$0xff] }
 0x2b8   :  { %v1372_v38 = vpop.f32.mrf.mxu0  ;;  %v1461_v36 = vpop.f32.mrf.mxu1  ;;  %2030 = vmatpush.msrb.mxu2 %v1843_v28 }
 0x2b9   :  { %v1546_v13 = vmax.f32 %v1522_v19, 0.0  ;;  %v1373_v29 = vadd.f32 %v1372_v38, %v1284_v63  ;;  %2069 = vmatpush.msrb.mxu3 %v1879_v2  ;;  %v1875_v19 = vld [vmem:[%s5565_s3 + $0x320] sm:$0xff]  ;;  %v1841_v38 = vld [vmem:[%s5565_s3 + $0x210] sm:$0xff] }
 0x2ba   :  { %v1626_v53 = vld [vmem:[#allocation2 + $0x7a] ss:$2 sm:$0xff]  ;;  %v1642_v33 = vld [vmem:[#allocation2 + $0x7b] ss:$2 sm:$0xff]  ;;  %2031 = vmatpush.msrb.mxu2 %v1841_v38 }
 0x2bb   :  { %v1666_v20 = vld [vmem:[#allocation2 + $0x7c] ss:$2 sm:$0xff]  ;;  %1570 = vst [vmem:[#allocation2 + $0x90] sm:$0xff] %v1546_v13  ;;  %v1462_v30 = vadd.f32 %v1461_v36, %v1373_v29  ;;  %v1652_v7 = vmax.f32 %v1626_v53, %v1642_v33  ;;  %v1682_v18 = vld [vmem:[#allocation2 + $0x7d] ss:$2 sm:$0xff]  ;;  %v5809_v36 = vld [vmem:[#allocation18_spill] sm:$0xff]  ;;  %v1292_v53 = vpop.f32.mrf.mxu3  ;;  %2070 = vmatpush.msrb.mxu3 %v1877_v27 }
 0x2bc   :  { %v4785_v46 = vmax.f32 %v1666_v20, %v1682_v18  ;;  %v5810_v13 = vld [vmem:[#allocation43_spill] sm:$0xff]  ;;  %2032 = vmatpush.msrb.mxu2 %v1839_v9  ;;  %v1929_v27 = vld [vmem:[%s5565_s3 + $0x4d0] sm:$0xff] }
 0x2bd   :  { %v1495_v37 = vmax.f32 %v1017_v41, %v1462_v30  ;;  %2007 = vmatmul.f32.gmra.mxu3 %v1652_v7  ;;  %2212 = vmatmul.f32.gmra.mxu0 %v1652_v7  ;;  %v1023_v29 = vadd.f32 %v5810_v13, %v5809_v36  ;;  %v1873_v30 = vld [vmem:[%s5565_s3 + $0x310] sm:$0xff]  ;;  %v1293_v7 = vadd.f32 %v1292_v53, %v1204_v52  ;;  %v1206_v18 = vpop.f32.mrf.mxu2  ;;  %v1802_v36 = vld [vmem:[%s5565_s3 + $0xd8] sm:$0xff]  ;;  %v1927_v13 = vld [vmem:[%s5565_s3 + $0x4c0] sm:$0xff] }
 0x2be   :  { %2253 = vmatmul.f32.gmra.mxu1 %v4785_v46  ;;  %2071 = vmatpush.msrb.mxu3 %v1875_v19  ;;  %v1207_v31 = vadd.f32 %v1206_v18, %v5814_v42  ;;  %v1925_v53 = vld [vmem:[%s5565_s3 + $0x4b0] sm:$0xff]  ;;  %v1798_v9 = vld [vmem:[%s5565_s3 + $0xb8] sm:$0xff]  ;;  %v1915_v42 = vld [vmem:[%s5565_s3 + $0x460] sm:$0xff] }
 0x2bf   :  { %v1523_v11 = vadd.f32 %v4456_v25, %v1495_v37  ;;  %2099 = vmatpush.msra.mxu2 %v1933_v3  ;;  %v1786_v3 = vld [vmem:[%s5565_s3 + $0x58] sm:$0xff] }
 0x2c0   :  { %v1375_v35 = vpop.f32.mrf.mxu0  ;;  %v1464_v43 = vpop.f32.mrf.mxu1  ;;  %2072 = vmatpush.msrb.mxu3 %v1873_v30  ;;  %v1796_v30 = vld [vmem:[%s5565_s3 + $0xa8] sm:$0xff] }
 0x2c1   :  { %v1547_v8 = vmax.f32 %v1523_v11, 0.0  ;;  %v1376_v51 = vadd.f32 %v1375_v35, %v1287_v45  ;;  %2100 = vmatpush.msra.mxu2 %v1931_v62  ;;  %v1784_v62 = vld [vmem:[%s5565_s3 + $0x48] sm:$0xff] }
 0x2c2   :  { %2073 = vmatpush.msrb.mxu3 %v1871_v55  ;;  %v1921_v55 = vld [vmem:[%s5565_s3 + $0x490] sm:$0xff] }
 0x2c3   :  { %1571 = vst [vmem:[#allocation2 + $0x98] sm:$0xff] %v1547_v8  ;;  %v1465_v24 = vadd.f32 %v1464_v43, %v1376_v51  ;;  %v5812_v43 = vld [vmem:[#allocation20_spill] sm:$0xff]  ;;  %v5813_v8 = vld [vmem:[#allocation46_spill] sm:$0xff]  ;;  %v1295_v47 = vpop.f32.mrf.mxu3  ;;  %2101 = vmatpush.msra.mxu2 %v1929_v27 }
 0x2c4   :  { %v1026_v51 = vadd.f32 %v5813_v8, %v5812_v43  ;;  %2140 = vmatpush.msra.mxu3 %v1806_v32  ;;  %v1296_v49 = vadd.f32 %v1295_v47, %v1207_v31  ;;  %v1792_v43 = vld [vmem:[%s5565_s3 + $0x88] sm:$0xff]  ;;  %v1911_v47 = vld [vmem:[%s5565_s3 + $0x440] sm:$0xff] }
 0x2c5   :  { %v1496_v56 = vmax.f32 %v1020_v58, %v1465_v24  ;;  %2102 = vmatpush.msra.mxu2 %v1927_v13  ;;  %v1788_v31 = vld [vmem:[%s5565_s3 + $0x68] sm:$0xff]  ;;  %v1716_v32 = vld [vmem:[#allocation2 + $0x37] ss:$2 sm:$0xff] }
 0x2c6   :  { %v1706_v13 = vld [vmem:[#allocation2 + $0x7e] ss:$2 sm:$0xff] }
 0x2c7   :  { %v1524_v1 = vadd.f32 %v4456_v25, %v1496_v56  ;;  %2103 = vmatpush.msra.mxu2 %v1925_v53  ;;  %v1932_v53 = vld [vmem:[%s5565_s3 + $0x4e8] sm:$0xff] }
 0x2c8   :  { %v1378_v14 = vpop.f32.mrf.mxu0  ;;  %v1467_v15 = vpop.f32.mrf.mxu1 }
 0x2c9   :  { %v1548_v40 = vmax.f32 %v1524_v1, 0.0  ;;  %v1379_v63 = vadd.f32 %v1378_v14, %v1290_v60  ;;  %v1804_v1 = vld [vmem:[%s5565_s3 + $0xe8] sm:$0xff] }
 0x2ca   :  { %v1588_v33 = vld [vmem:[#allocation2 + $0x90] ss:$2 sm:$0xff]  ;;  %v1604_v20 = vld [vmem:[#allocation2 + $0x91] ss:$2 sm:$0xff]  ;;  %2141 = vmatpush.msra.mxu3 %v1804_v1  ;;  %v1903_v1 = vld [vmem:[%s5565_s3 + $0x400] sm:$0xff] }
 0x2cb   :  { %1572 = vst [vmem:[#allocation2 + $0xa0] sm:$0xff] %v1548_v40  ;;  %v1468_v41 = vadd.f32 %v1467_v15, %v1379_v63  ;;  %v4832_v23 = vmax.f32 %v1588_v33, %v1604_v20  ;;  %v5815_v15 = vld [vmem:[#allocation19_spill] sm:$0xff] }
 0x2cc   :  { %v5816_v40 = vld [vmem:[#allocation47_spill] sm:$0xff]  ;;  %2142 = vmatpush.msra.mxu3 %v1802_v36  ;;  %v1900_v36 = vld [vmem:[%s5565_s3 + $0x3e8] sm:$0xff] }
 0x2cd   :  { %v1497_v59 = vmax.f32 %v1023_v29, %v1468_v41  ;;  %1969 = vmatmul.f32.gmra.mxu2 %v4832_v23  ;;  %v1029_v63 = vadd.f32 %v5816_v40, %v5815_v15  ;;  %v1800_v29 = vld [vmem:[%s5565_s3 + $0xc8] sm:$0xff]  ;;  %v1902_v40 = vld [vmem:[%s5565_s3 + $0x3f8] sm:$0xff] }
 0x2ce   :  { %2143 = vmatpush.msra.mxu3 %v1800_v29  ;;  %v1776_v15 = vld [vmem:[%s5565_s3 + $0x8] sm:$0xff] }
 0x2cf   :  { %v1525_v22 = vadd.f32 %v4456_v25, %v1497_v59  ;;  %v1923_v59 = vld [vmem:[%s5565_s3 + $0x4a0] sm:$0xff] }
 0x2d0   :  { %v1381_v12 = vpop.f32.mrf.mxu0  ;;  %v1470_v10 = vpop.f32.mrf.mxu1  ;;  %2144 = vmatpush.msra.mxu3 %v1798_v9  ;;  %2104 = vmatpush.msra.mxu2 %v1923_v59  ;;  %v1722_v29 = vld [vmem:[#allocation2 + $0x7f] ss:$2 sm:$0xff] }
 0x2d1   :  { %v1549_v37 = vmax.f32 %v1525_v22, 0.0  ;;  %v1382_v45 = vadd.f32 %v1381_v12, %v1293_v7  ;;  %v1928_v59 = vld [vmem:[%s5565_s3 + $0x4c8] sm:$0xff] }
 0x2d2   :  { %v1628_v50 = vld [vmem:[#allocation2 + $0x92] ss:$2 sm:$0xff]  ;;  %v1644_v11 = vld [vmem:[#allocation2 + $0x93] ss:$2 sm:$0xff]  ;;  %2145 = vmatpush.msra.mxu3 %v1796_v30  ;;  %2105 = vmatpush.msra.mxu2 %v1921_v55 }
 0x2d3   :  { %v1668_v35 = vld [vmem:[#allocation2 + $0x94] ss:$2 sm:$0xff]  ;;  %1573 = vst [vmem:[#allocation2 + $0xa8] sm:$0xff] %v1549_v37  ;;  %v1471_v61 = vadd.f32 %v1470_v10, %v1382_v45  ;;  %v1653_v25 = vmax.f32 %v1628_v50, %v1644_v11  ;;  %v1684_v58 = vld [vmem:[#allocation2 + $0x95] ss:$2 sm:$0xff] }
 0x2d4   :  { %v4851_v24 = vmax.f32 %v1668_v35, %v1684_v58  ;;  %v1794_v45 = vld [vmem:[%s5565_s3 + $0x98] sm:$0xff]  ;;  %v1919_v50 = vld [vmem:[%s5565_s3 + $0x480] sm:$0xff] }
 0x2d5   :  { %v1498_v44 = vmax.f32 %v1026_v51, %v1471_v61  ;;  %2010 = vmatmul.f32.gmra.mxu3 %v1653_v25  ;;  %2215 = vmatmul.f32.gmra.mxu0 %v1653_v25  ;;  %v1696_v11 = vld [vmem:[#allocation2 + $0x6] ss:$2 sm:$0xff]  ;;  %v1712_v35 = vld [vmem:[#allocation2 + $0x7] ss:$2 sm:$0xff]  ;;  %v1790_v51 = vld [vmem:[%s5565_s3 + $0x78] sm:$0xff] }
 0x2d6   :  { %2256 = vmatmul.f32.gmra.mxu1 %v4851_v24  ;;  %2146 = vmatpush.msra.mxu3 %v1794_v45  ;;  %v4914_v8 = vmax.f32 %v1696_v11, %v1712_v35  ;;  %v1698_v61 = vld [vmem:[#allocation2 + $0x1e] ss:$2 sm:$0xff]  ;;  %v1714_v25 = vld [vmem:[#allocation2 + $0x1f] ss:$2 sm:$0xff] }
 0x2d7   :  { %v1526_v56 = vadd.f32 %v2828_v34, %v1498_v44  ;;  %2106 = vmatpush.msra.mxu2 %v1919_v50  ;;  %v4930_v58 = vmax.f32 %v1698_v61, %v1714_v25  ;;  %v1700_v44 = vld [vmem:[#allocation2 + $0x36] ss:$2 sm:$0xff]  ;;  %v1724_v9 = vld [vmem:[#allocation2 + $0x97] ss:$2 sm:$0xff] }
 0x2d8   :  { %v1384_v2 = vpop.f32.mrf.mxu0  ;;  %v1473_v14 = vpop.f32.mrf.mxu1  ;;  %2147 = vmatpush.msra.mxu3 %v1792_v43  ;;  %v1752_v45 = vld [vmem:[#allocation2 + $0x9] ss:$2 sm:$0xff]  ;;  %v1922_v35 = vld [vmem:[%s5565_s3 + $0x498] sm:$0xff] }
 0x2d9   :  { %v1550_v28 = vmax.f32 %v1526_v56, 0.0  ;;  %v1385_v60 = vadd.f32 %v1384_v2, %v1296_v49  ;;  %v1909_v49 = vld [vmem:[%s5565_s3 + $0x430] sm:$0xff]  ;;  %v1907_v56 = vld [vmem:[%s5565_s3 + $0x420] sm:$0xff]  ;;  %v1888_v43 = vld [vmem:[%s5565_s3 + $0x388] sm:$0xff] }
 0x2da   :  { %2148 = vmatpush.msra.mxu3 %v1790_v51  ;;  %v1702_v2 = vld [vmem:[#allocation2 + $0x4e] ss:$2 sm:$0xff] }
 0x2db   :  { %1574 = vst [vmem:[#allocation2 + $0xb0] sm:$0xff] %v1550_v28  ;;  %v1474_v19 = vadd.f32 %v1473_v14, %v1385_v60  ;;  %v1718_v28 = vld [vmem:[#allocation2 + $0x4f] ss:$2 sm:$0xff]  ;;  %v1738_v51 = vld [vmem:[#allocation2 + $0x20] ss:$2 sm:$0xff] }
 0x2dc   :  { %2149 = vmatpush.msra.mxu3 %v1788_v31  ;;  %v1780_v60 = vld [vmem:[%s5565_s3 + $0x28] sm:$0xff]  ;;  %v4965_v27 = vmax.f32 %v1702_v2, %v1718_v28  ;;  %v1778_v14 = vld [vmem:[%s5565_s3 + $0x18] sm:$0xff] }
 0x2dd   :  { %v1499_v38 = vmax.f32 %v1029_v63, %v1474_v19  ;;  %v1704_v63 = vld [vmem:[#allocation2 + $0x66] ss:$2 sm:$0xff]  ;;  %v1720_v19 = vld [vmem:[#allocation2 + $0x67] ss:$2 sm:$0xff]  ;;  %v1886_v61 = vld [vmem:[%s5565_s3 + $0x378] sm:$0xff] }
 0x2de   :  { %2150 = vmatpush.msra.mxu3 %v1786_v3  ;;  %v1920_v31 = vld [vmem:[%s5565_s3 + $0x488] sm:$0xff]  ;;  %v1918_v25 = vld [vmem:[%s5565_s3 + $0x478] sm:$0xff] }
 0x2df   :  { %v1527_v33 = vadd.f32 %v2828_v34, %v1499_v38  ;;  %v1782_v34 = vld [vmem:[%s5565_s3 + $0x38] sm:$0xff]  ;;  %v1884_v3 = vld [vmem:[%s5565_s3 + $0x368] sm:$0xff] }
 0x2e0   :  { %2151 = vmatpush.msra.mxu3 %v1784_v62  ;;  %v1934_v38 = vld [vmem:[%s5565_s3 + $0x4f8] sm:$0xff]  ;;  %v1880_v2 = vld [vmem:[%s5565_s3 + $0x348] sm:$0xff] }
 0x2e1   :  { %v1551_v20 = vmax.f32 %v1527_v33, 0.0  ;;  %v1898_v33 = vld [vmem:[%s5565_s3 + $0x3d8] sm:$0xff]  ;;  %v1912_v28 = vld [vmem:[%s5565_s3 + $0x448] sm:$0xff] }
 0x2e2   :  { %v1590_v39 = vld [vmem:[#allocation2 + $0xa8] ss:$2 sm:$0xff]  ;;  %v1606_v52 = vld [vmem:[#allocation2 + $0xa9] ss:$2 sm:$0xff]  ;;  %2152 = vmatpush.msra.mxu3 %v1782_v34  ;;  %v1756_v62 = vld [vmem:[#allocation2 + $0x39] ss:$2 sm:$0xff] }
 0x2e3   :  { %1575 = vst [vmem:[#allocation2 + $0xb8] sm:$0xff] %v1551_v20  ;;  %v4883_v41 = vmax.f32 %v1590_v39, %v1606_v52  ;;  %v1930_v20 = vld [vmem:[%s5565_s3 + $0x4d8] sm:$0xff]  ;;  %v1896_v39 = vld [vmem:[%s5565_s3 + $0x3c8] sm:$0xff] }
 0x2e4   :  { %2153 = vmatpush.msra.mxu3 %v1780_v60  ;;  %v1708_v52 = vld [vmem:[#allocation2 + $0x96] ss:$2 sm:$0xff] }
 0x2e5   :  { %1972 = vmatmul.f32.gmra.mxu2 %v4883_v41  ;;  %v5010_v30 = vmax.f32 %v1708_v52, %v1724_v9  ;;  %v1878_v60 = vld [vmem:[%s5565_s3 + $0x338] sm:$0xff]  ;;  %v1746_v9 = vld [vmem:[#allocation2 + $0x80] ss:$2 sm:$0xff] }
 0x2e6   :  { %2154 = vmatpush.msra.mxu3 %v1778_v14  ;;  %v1758_v14 = vld [vmem:[#allocation2 + $0x51] ss:$2 sm:$0xff] }
 0x2e8   :  { %2155 = vmatpush.msra.mxu3 %v1776_v15 }
 0x2ea   :  { %v1630_v7 = vld [vmem:[#allocation2 + $0xaa] ss:$2 sm:$0xff]  ;;  %v1646_v18 = vld [vmem:[#allocation2 + $0xab] ss:$2 sm:$0xff] }
 0x2eb   :  { %v1670_v22 = vld [vmem:[#allocation2 + $0xac] ss:$2 sm:$0xff]  ;;  %v1654_v12 = vmax.f32 %v1630_v7, %v1646_v18  ;;  %v1686_v10 = vld [vmem:[#allocation2 + $0xad] ss:$2 sm:$0xff] }
 0x2ec   :  { %v4898_v37 = vmax.f32 %v1670_v22, %v1686_v10  ;;  %v1926_v7 = vld [vmem:[%s5565_s3 + $0x4b8] sm:$0xff]  ;;  %v1892_v18 = vld [vmem:[%s5565_s3 + $0x3a8] sm:$0xff] }
 0x2ed   :  { %2013 = vmatmul.f32.gmra.mxu3 %v1654_v12  ;;  %2033 = vmatmul.f32.vlgmr.msrb.gmra.mxu2 %v4652_v4  ;;  %v1917_v4 = vld [vmem:[%s5565_s3 + $0x470] sm:$0xff]  ;;  %v1924_v22 = vld [vmem:[%s5565_s3 + $0x4a8] sm:$0xff] }
 0x2ee   :  { %2218 = vmatmul.f32.gmra.mxu0 %v1654_v12  ;;  %2259 = vmatmul.f32.gmra.mxu1 %v4898_v37  ;;  %v1890_v12 = vld [vmem:[%s5565_s3 + $0x398] sm:$0xff]  ;;  %v1736_v10 = vld [vmem:[#allocation2 + $0x8] ss:$2 sm:$0xff] }
 0x2ef   :  { %2107 = vmatpush.msra.mxu2 %v1917_v4  ;;  %v1710_v55 = vld [vmem:[#allocation2 + $0xae] ss:$2 sm:$0xff]  ;;  %v5028_v11 = vmax.f32 %v1736_v10, %v1752_v45  ;;  %v5038_v4 = vpop.f32.mrf.mxu2 }
 0x2f0   :  { %v1750_v45 = vld [vmem:[#allocation2 + $0xb0] ss:$2 sm:$0xff] }
 0x2f1   :  { %2108 = vmatpush.msra.mxu2 %v1915_v42  ;;  %v1754_v42 = vld [vmem:[#allocation2 + $0x21] ss:$2 sm:$0xff] }
 0x2f5   :  { %2036 = vmatmul.f32.gmra.mxu2 %v4662_v26  ;;  %2074 = vmatmul.f32.vlgmr.msrb.gmra.mxu3 %v4914_v8  ;;  %v1913_v26 = vld [vmem:[%s5565_s3 + $0x450] sm:$0xff] }
 0x2f6   :  { %2109 = vmatpush.msra.mxu2 %v1913_v26  ;;  %2304 = vmatpush.msrb.mxu3 %v1934_v38  ;;  %v5043_v26 = vmax.f32 %v1738_v51, %v1754_v42 }
 0x2f8   :  { %2110 = vmatpush.msra.mxu2 %v1911_v47  ;;  %2305 = vmatpush.msrb.mxu3 %v1932_v53  ;;  %v5056_v47 = vpop.f32.mrf.mxu3  ;;  %v1874_v53 = vld [vmem:[%s5565_s3 + $0x318] sm:$0xff] }
 0x2fa   :  { %2111 = vmatpush.msra.mxu2 %v1909_v49  ;;  %2306 = vmatpush.msrb.mxu3 %v1930_v20  ;;  %v1882_v49 = vld [vmem:[%s5565_s3 + $0x358] sm:$0xff] }
 0x2fb   :  { %v1906_v20 = vld [vmem:[%s5565_s3 + $0x418] sm:$0xff] }
 0x2fc   :  { %2112 = vmatpush.msra.mxu2 %v1907_v56  ;;  %2307 = vmatpush.msrb.mxu3 %v1928_v59  ;;  %v1914_v56 = vld [vmem:[%s5565_s3 + $0x458] sm:$0xff]  ;;  %v1762_v59 = vld [vmem:[#allocation2 + $0x81] ss:$2 sm:$0xff] }
 0x2fd   :  { %2039 = vmatmul.f32.gmra.mxu2 %v4678_v48  ;;  %2077 = vmatmul.f32.gmra.mxu3 %v4930_v58  ;;  %v4943_v48 = vmax.f32 %v1700_v44, %v1716_v32  ;;  %v5058_v44 = vpop.f32.mrf.mxu2  ;;  %v1740_v32 = vld [vmem:[#allocation2 + $0x38] ss:$2 sm:$0xff] }
 0x2fe   :  { %2308 = vmatpush.msrb.mxu3 %v1926_v7  ;;  %v5066_v34 = vmax.f32 %v1740_v32, %v1756_v62  ;;  %v1772_v7 = vmax.f32 %v1746_v9, %v1762_v59 }
 0x300   :  { %2309 = vmatpush.msrb.mxu3 %v1924_v22  ;;  %v1748_v22 = vld [vmem:[#allocation2 + $0x98] ss:$2 sm:$0xff] }
 0x302   :  { %2310 = vmatpush.msrb.mxu3 %v1922_v35  ;;  %v1766_v35 = vld [vmem:[#allocation2 + $0xb1] ss:$2 sm:$0xff] }
 0x304   :  { %2311 = vmatpush.msrb.mxu3 %v1920_v31 }
 0x305   :  { %2042 = vmatmul.f32.gmra.mxu2 %v4698_v0  ;;  %2080 = vmatmul.f32.gmra.mxu3 %v4943_v48  ;;  %v1905_v0 = vld [vmem:[%s5565_s3 + $0x410] sm:$0xff] }
 0x306   :  { %2113 = vmatpush.msra.mxu2 %v1905_v0  ;;  %2312 = vmatpush.msrb.mxu3 %v1918_v25  ;;  %v5082_v0 = vpop.f32.mrf.mxu3 }
 0x308   :  { %2114 = vmatpush.msra.mxu2 %v1903_v1  ;;  %v1742_v1 = vld [vmem:[#allocation2 + $0x50] ss:$2 sm:$0xff] }
 0x309   :  { %v5086_v15 = vmax.f32 %v1742_v1, %v1758_v14 }
 0x30a   :  { %2263 = vmatpush.msrb.mxu2 %v1902_v40  ;;  %v1910_v40 = vld [vmem:[%s5565_s3 + $0x438] sm:$0xff] }
 0x30c   :  { %2264 = vmatpush.msrb.mxu2 %v1900_v36  ;;  %v1744_v36 = vld [vmem:[#allocation2 + $0x68] ss:$2 sm:$0xff] }
 0x30d   :  { %2045 = vmatmul.f32.gmra.mxu2 %v4731_v21  ;;  %2083 = vmatmul.f32.gmra.mxu3 %v4965_v27  ;;  %v4978_v21 = vmax.f32 %v1704_v63, %v1720_v19  ;;  %v1876_v63 = vld [vmem:[%s5565_s3 + $0x328] sm:$0xff] }
 0x30e   :  { %2265 = vmatpush.msrb.mxu2 %v1898_v33  ;;  %v1999_v19 = vpop.f32.mrf.mxu3  ;;  %v1872_v33 = vld [vmem:[%s5565_s3 + $0x308] sm:$0xff] }
 0x310   :  { %2266 = vmatpush.msrb.mxu2 %v1896_v39 }
 0x315   :  { %2048 = vmatmul.f32.gmra.mxu2 %v4785_v46  ;;  %2086 = vmatmul.f32.gmra.mxu3 %v4978_v21  ;;  %v4991_v46 = vmax.f32 %v1706_v13, %v1722_v29  ;;  %v1760_v13 = vld [vmem:[#allocation2 + $0x69] ss:$2 sm:$0xff] }
 0x316   :  { %v1908_v29 = vld [vmem:[%s5565_s3 + $0x428] sm:$0xff]  ;;  %v2002_v39 = vpop.f32.mrf.mxu3 }
 0x31d   :  { %2051 = vmatmul.f32.gmra.mxu2 %v4851_v24  ;;  %2089 = vmatmul.f32.gmra.mxu3 %v4991_v46  ;;  %v1894_v24 = vld [vmem:[%s5565_s3 + $0x3b8] sm:$0xff] }
 0x31e   :  { %2267 = vmatpush.msrb.mxu2 %v1894_v24  ;;  %v1904_v24 = vld [vmem:[%s5565_s3 + $0x408] sm:$0xff] }
 0x320   :  { %2268 = vmatpush.msrb.mxu2 %v1892_v18 }
 0x322   :  { %2269 = vmatpush.msrb.mxu2 %v1890_v12  ;;  %v1764_v12 = vld [vmem:[#allocation2 + $0x99] ss:$2 sm:$0xff] }
 0x323   :  { %v1773_v10 = vmax.f32 %v1748_v22, %v1764_v12 }
 0x324   :  { %2270 = vmatpush.msrb.mxu2 %v1888_v43  ;;  %v1774_v43 = vmax.f32 %v1750_v45, %v1766_v35 }
 0x325   :  { %2054 = vmatmul.f32.gmra.mxu2 %v4898_v37  ;;  %2092 = vmatmul.f32.gmra.mxu3 %v5010_v30  ;;  %v1726_v37 = vld [vmem:[#allocation2 + $0xaf] ss:$2 sm:$0xff] }
 0x326   :  { %v5026_v50 = vmax.f32 %v1710_v55, %v1726_v37  ;;  %2271 = vmatpush.msrb.mxu2 %v1886_v61 }
 0x328   :  { %2272 = vmatpush.msrb.mxu2 %v1884_v3 }
 0x32a   :  { %2273 = vmatpush.msrb.mxu2 %v1882_v49 }
 0x32c   :  { %2274 = vmatpush.msrb.mxu2 %v1880_v2 }
 0x32d   :  { %2095 = vmatmul.f32.gmra.mxu3 %v5026_v50  ;;  %2115 = vmatmul.f32.vlgmr.msra.gmra.mxu2 %v5028_v11 }
 0x32e   :  { %2275 = vmatpush.msrb.mxu2 %v1878_v60 }
 0x330   :  { %2276 = vmatpush.msrb.mxu2 %v1876_v63 }
 0x332   :  { %2277 = vmatpush.msrb.mxu2 %v1874_v53 }
 0x334   :  { %2278 = vmatpush.msrb.mxu2 %v1872_v33 }
 0x335   :  { %2118 = vmatmul.f32.gmra.mxu2 %v5043_v26  ;;  %2156 = vmatmul.f32.vlgmr.msra.gmra.mxu3 %v4566_v54  ;;  %v1916_v54 = vld [vmem:[%s5565_s3 + $0x468] sm:$0xff] }
 0x336   :  { %2313 = vmatpush.msrb.mxu3 %v1916_v54 }
 0x338   :  { %2314 = vmatpush.msrb.mxu3 %v1914_v56 }
 0x33a   :  { %2315 = vmatpush.msrb.mxu3 %v1912_v28 }
 0x33c   :  { %2316 = vmatpush.msrb.mxu3 %v1910_v40 }
 0x33d   :  { %2121 = vmatmul.f32.gmra.mxu2 %v5066_v34  ;;  %2159 = vmatmul.f32.gmra.mxu3 %v4633_v5  ;;  %v5084_v5 = vpop.f32.mrf.mxu2 }
 0x33e   :  { %2317 = vmatpush.msrb.mxu3 %v1908_v29  ;;  %v2000_v62 = vadd.f32 %v1999_v19, %v5084_v5 }
 0x340   :  { %2318 = vmatpush.msrb.mxu3 %v1906_v20 }
 0x342   :  { %2319 = vmatpush.msrb.mxu3 %v1904_v24 }
 0x345   :  { %2124 = vmatmul.f32.gmra.mxu2 %v5086_v15  ;;  %2162 = vmatmul.f32.gmra.mxu3 %v4669_v17  ;;  %v5096_v38 = vpop.f32.mrf.mxu2  ;;  %v5101_v17 = vmax.f32 %v1744_v36, %v1760_v13 }
 0x34d   :  { %2127 = vmatmul.f32.gmra.mxu2 %v5101_v17  ;;  %2165 = vmatmul.f32.gmra.mxu3 %v4691_v6  ;;  %v1964_v52 = vpop.f32.mrf.mxu2  ;;  %v2005_v6 = vpop.f32.mrf.mxu3 }
 0x34e   :  { %v2006_v28 = vadd.f32 %v2005_v6, %v1964_v52 }
 0x355   :  { %2130 = vmatmul.f32.gmra.mxu2 %v1772_v7  ;;  %2168 = vmatmul.f32.gmra.mxu3 %v4709_v57  ;;  %v1967_v18 = vpop.f32.mrf.mxu2  ;;  %v2008_v55 = vpop.f32.mrf.mxu3 }
 0x356   :  { %v2009_v5 = vadd.f32 %v2008_v55, %v1967_v18 }
 0x35d   :  { %2133 = vmatmul.f32.gmra.mxu2 %v1773_v10  ;;  %2171 = vmatmul.f32.gmra.mxu3 %v4760_v16  ;;  %v1970_v37 = vpop.f32.mrf.mxu2  ;;  %v2011_v51 = vpop.f32.mrf.mxu3 }
 0x35e   :  { %v2012_v40 = vadd.f32 %v2011_v51, %v1970_v37  ;;  %v2623_v51 = vld [vmem:[%s5568_s5 + $0x178] sm:$0xff] }
 0x35f   :  { %2684 = vmatpush.msra.mxu2 %v2623_v51  ;;  %v2602_v51 = vld [vmem:[%s5568_s5 + $0xd0] sm:$0xff] }
 0x365   :  { %2136 = vmatmul.f32.gmra.mxu2 %v1774_v43  ;;  %2174 = vmatmul.f32.gmra.mxu3 %v4832_v23  ;;  %v1997_v23 = vadd.f32 %v5082_v0, %v5058_v44  ;;  %v2003_v44 = vadd.f32 %v2002_v39, %v5096_v38 }
 0x368   :  { %v1973_v42 = vpop.f32.mrf.mxu2 }
 0x36d   :  { %2177 = vmatmul.f32.gmra.mxu3 %v4883_v41  ;;  %2279 = vmatmul.f32.vlgmr.msrb.gmra.mxu2 %v4914_v8 }
 0x370   :  { %v2014_v57 = vpop.f32.mrf.mxu3  ;;  %v5122_v31 = vpop.f32.mrf.mxu2 }
 0x371   :  { %v2015_v61 = vadd.f32 %v2014_v57, %v1973_v42  ;;  %v2198_v42 = vpop.f32.mrf.mxu0 }
 0x375   :  { %2282 = vmatmul.f32.gmra.mxu2 %v4930_v58  ;;  %2320 = vmatmul.f32.vlgmr.msrb.gmra.mxu3 %v5028_v11 }
 0x378   :  { %v2037_v16 = vpop.f32.mrf.mxu2  ;;  %v5126_v25 = vpop.f32.mrf.mxu3 }
 0x379   :  { %v2038_v41 = vadd.f32 %v2037_v16, %v1997_v23  ;;  %v2239_v16 = vpop.f32.mrf.mxu1 }
 0x37d   :  { %2285 = vmatmul.f32.gmra.mxu2 %v4943_v48  ;;  %2323 = vmatmul.f32.gmra.mxu3 %v5043_v26 }
 0x380   :  { %v2040_v8 = vpop.f32.mrf.mxu2  ;;  %v2078_v3 = vpop.f32.mrf.mxu3 }
 0x381   :  { %v2079_v32 = vadd.f32 %v2078_v3, %v2038_v41  ;;  %v2041_v58 = vadd.f32 %v2040_v8, %v2000_v62  ;;  %v2591_v41 = vld [vmem:[%s5568_s5 + $0x78] sm:$0xff]  ;;  %v2590_v62 = vld [vmem:[%s5568_s5 + $0x70] sm:$0xff] }
 0x382   :  { %v2639_v8 = vld [vmem:[%s5568_s5 + $0x1f8] sm:$0xff]  ;;  %2644 = vmatpush.msra.mxu0 %v2591_v41 }
 0x383   :  { %v2607_v3 = vld [vmem:[%s5568_s5 + $0xf8] sm:$0xff]  ;;  %2704 = vmatpush.msra.mxu3 %v2639_v8 }
 0x384   :  { %2664 = vmatpush.msra.mxu1 %v2607_v3  ;;  %2645 = vmatpush.msra.mxu0 %v2590_v62 }
 0x385   :  { %2288 = vmatmul.f32.gmra.mxu2 %v4965_v27  ;;  %2326 = vmatmul.f32.gmra.mxu3 %v5066_v34 }
 0x388   :  { %v2043_v11 = vpop.f32.mrf.mxu2  ;;  %v2081_v54 = vpop.f32.mrf.mxu3 }
 0x389   :  { %v2082_v49 = vadd.f32 %v2081_v54, %v2041_v58  ;;  %v2044_v48 = vadd.f32 %v2043_v11, %v2003_v44  ;;  %v2638_v58 = vld [vmem:[%s5568_s5 + $0x1f0] sm:$0xff]  ;;  %v1994_v11 = vadd.f32 %v5056_v47, %v5038_v4 }
 0x38a   :  { %v2606_v54 = vld [vmem:[%s5568_s5 + $0xf0] sm:$0xff]  ;;  %2705 = vmatpush.msra.mxu3 %v2638_v58  ;;  %v2585_v58 = vld [vmem:[%s5568_s5 + $0x48] sm:$0xff] }
 0x38b   :  { %v2035_v44 = vadd.f32 %v5122_v31, %v1994_v11  ;;  %2665 = vmatpush.msra.mxu1 %v2606_v54  ;;  %v2589_v31 = vld [vmem:[%s5568_s5 + $0x68] sm:$0xff] }
 0x38c   :  { %2646 = vmatpush.msra.mxu0 %v2589_v31  ;;  %v2633_v11 = vld [vmem:[%s5568_s5 + $0x1c8] sm:$0xff] }
 0x38d   :  { %2291 = vmatmul.f32.gmra.mxu2 %v4978_v21  ;;  %2329 = vmatmul.f32.gmra.mxu3 %v5086_v15  ;;  %v2076_v4 = vadd.f32 %v5126_v25, %v2035_v44  ;;  %v2605_v25 = vld [vmem:[%s5568_s5 + $0xe8] sm:$0xff]  ;;  %v2632_v44 = vld [vmem:[%s5568_s5 + $0x1c0] sm:$0xff] }
 0x38e   :  { %2666 = vmatpush.msra.mxu1 %v2605_v25  ;;  %v2601_v54 = vld [vmem:[%s5568_s5 + $0xc8] sm:$0xff] }
 0x390   :  { %v2046_v26 = vpop.f32.mrf.mxu2  ;;  %v2084_v56 = vpop.f32.mrf.mxu3 }
 0x391   :  { %v2085_v2 = vadd.f32 %v2084_v56, %v2044_v48  ;;  %v2047_v27 = vadd.f32 %v2046_v26, %v2006_v28  ;;  %v2201_v26 = vpop.f32.mrf.mxu0  ;;  %v5202_v28 = vld [vmem:[%s5566_s4] ss:$0 sm:$0xff] }
 0x395   :  { %2294 = vmatmul.f32.gmra.mxu2 %v4991_v46  ;;  %2332 = vmatmul.f32.gmra.mxu3 %v5101_v17 }
 0x398   :  { %v2049_v34 = vpop.f32.mrf.mxu2  ;;  %v2087_v60 = vpop.f32.mrf.mxu3 }
 0x399   :  { %v2088_v0 = vadd.f32 %v2087_v60, %v2047_v27  ;;  %v2050_v21 = vadd.f32 %v2049_v34, %v2009_v5  ;;  %v2620_v5 = vld [vmem:[%s5568_s5 + $0x160] sm:$0xff] }
 0x39d   :  { %2297 = vmatmul.f32.gmra.mxu2 %v5010_v30  ;;  %2335 = vmatmul.f32.gmra.mxu3 %v1772_v7 }
 0x3a0   :  { %v2052_v1 = vpop.f32.mrf.mxu2  ;;  %v2090_v14 = vpop.f32.mrf.mxu3 }
 0x3a1   :  { %v2091_v15 = vadd.f32 %v2090_v14, %v2050_v21  ;;  %v2053_v63 = vadd.f32 %v2052_v1, %v2012_v40  ;;  %v2588_v21 = vld [vmem:[%s5568_s5 + $0x60] sm:$0xff]  ;;  %v2242_v14 = vpop.f32.mrf.mxu1 }
 0x3a2   :  { %v2636_v1 = vld [vmem:[%s5568_s5 + $0x1e0] sm:$0xff]  ;;  %2647 = vmatpush.msra.mxu0 %v2588_v21  ;;  %v2631_v21 = vld [vmem:[%s5568_s5 + $0x1b8] sm:$0xff] }
 0x3a3   :  { %v2604_v40 = vld [vmem:[%s5568_s5 + $0xe0] sm:$0xff] }
 0x3a4   :  { %2667 = vmatpush.msra.mxu1 %v2604_v40 }
 0x3a5   :  { %2300 = vmatmul.f32.gmra.mxu2 %v5026_v50  ;;  %2338 = vmatmul.f32.gmra.mxu3 %v1773_v10 }
 0x3a8   :  { %v2055_v46 = vpop.f32.mrf.mxu2  ;;  %v2093_v19 = vpop.f32.mrf.mxu3 }
 0x3a9   :  { %v2056_v38 = vadd.f32 %v2055_v46, %v2015_v61  ;;  %v2094_v36 = vadd.f32 %v2093_v19, %v2053_v63  ;;  %v2619_v63 = vld [vmem:[%s5568_s5 + $0x158] sm:$0xff] }
 0x3ad   :  { %2341 = vmatmul.f32.gmra.mxu3 %v1774_v43 }
 0x3b0   :  { %v2096_v13 = vpop.f32.mrf.mxu3  ;;  %v2116_v29 = vpop.f32.mrf.mxu2 }
 0x3b1   :  { %v2097_v17 = vadd.f32 %v2096_v13, %v2056_v38  ;;  %v2117_v27 = vadd.f32 %v2116_v29, %v2076_v4  ;;  %v2204_v38 = vpop.f32.mrf.mxu0  ;;  %v2600_v4 = vld [vmem:[%s5568_s5 + $0xc0] sm:$0xff] }
 0x3b8   :  { %v2119_v53 = vpop.f32.mrf.mxu2  ;;  %v2157_v30 = vpop.f32.mrf.mxu3 }
 0x3b9   :  { %v5142_v33 = vadd.f32 %v2119_v53, %v2079_v32  ;;  %v2199_v23 = vadd.f32 %v2198_v42, %v2157_v30  ;;  %v2622_v32 = vld [vmem:[%s5568_s5 + $0x170] sm:$0xff]  ;;  %v2617_v42 = vld [vmem:[%s5568_s5 + $0x148] sm:$0xff] }
 0x3ba   :  { %2685 = vmatpush.msra.mxu2 %v2622_v32 }
 0x3bb   :  { %v2240_v48 = vadd.f32 %v2239_v16, %v2199_v23  ;;  %v2207_v23 = vpop.f32.mrf.mxu0 }
 0x3c0   :  { %v2122_v20 = vpop.f32.mrf.mxu2  ;;  %v2160_v39 = vpop.f32.mrf.mxu3 }
 0x3c1   :  { %v5144_v52 = vadd.f32 %v2122_v20, %v2082_v49  ;;  %v2621_v49 = vld [vmem:[%s5568_s5 + $0x168] sm:$0xff]  ;;  %v2202_v34 = vadd.f32 %v2201_v26, %v2160_v39  ;;  %v2587_v20 = vld [vmem:[%s5568_s5 + $0x58] sm:$0xff] }
 0x3c2   :  { %2686 = vmatpush.msra.mxu2 %v2621_v49  ;;  %v2635_v39 = vld [vmem:[%s5568_s5 + $0x1d8] sm:$0xff]  ;;  %2648 = vmatpush.msra.mxu0 %v2587_v20  ;;  %v2584_v49 = vld [vmem:[%s5568_s5 + $0x40] sm:$0xff] }
 0x3c3   :  { %v2243_v46 = vadd.f32 %v2242_v14, %v2202_v34  ;;  %v2582_v14 = vld [vmem:[%s5568_s5 + $0x30] sm:$0xff] }
 0x3c4   :  { %2687 = vmatpush.msra.mxu2 %v2620_v5  ;;  %v2583_v5 = vld [vmem:[%s5568_s5 + $0x38] sm:$0xff] }
 0x3c6   :  { %2688 = vmatpush.msra.mxu2 %v2619_v63 }
 0x3c8   :  { %v2125_v9 = vpop.f32.mrf.mxu2  ;;  %v5146_v50 = vpop.f32.mrf.mxu3 }
 0x3c9   :  { %v5148_v59 = vadd.f32 %v2125_v9, %v2085_v2  ;;  %v2205_v53 = vadd.f32 %v2204_v38, %v5146_v50  ;;  %v2603_v9 = vld [vmem:[%s5568_s5 + $0xd8] sm:$0xff]  ;;  %v2618_v50 = vld [vmem:[%s5568_s5 + $0x150] sm:$0xff] }
 0x3ca   :  { %2668 = vmatpush.msra.mxu1 %v2603_v9  ;;  %2689 = vmatpush.msra.mxu2 %v2618_v50  ;;  %v2629_v9 = vld [vmem:[%s5568_s5 + $0x1a8] sm:$0xff] }
 0x3cb   :  { %v2597_v50 = vld [vmem:[%s5568_s5 + $0xa8] sm:$0xff] }
 0x3cc   :  { %2669 = vmatpush.msra.mxu1 %v2602_v51  ;;  %2690 = vmatpush.msra.mxu2 %v2617_v42  ;;  %v2596_v51 = vld [vmem:[%s5568_s5 + $0xa0] sm:$0xff]  ;;  %v2611_v42 = vld [vmem:[%s5568_s5 + $0x118] sm:$0xff] }
 0x3ce   :  { %2670 = vmatpush.msra.mxu1 %v2601_v54 }
 0x3d0   :  { %v2128_v24 = vpop.f32.mrf.mxu2  ;;  %v5150_v7 = vpop.f32.mrf.mxu3  ;;  %2671 = vmatpush.msra.mxu1 %v2600_v4 }
 0x3d1   :  { %v5152_v6 = vadd.f32 %v2128_v24, %v2088_v0  ;;  %v2637_v0 = vld [vmem:[%s5568_s5 + $0x1e8] sm:$0xff]  ;;  %v2586_v24 = vld [vmem:[%s5568_s5 + $0x50] sm:$0xff]  ;;  %v2208_v32 = vadd.f32 %v2207_v23, %v5150_v7  ;;  %v2616_v7 = vld [vmem:[%s5568_s5 + $0x140] sm:$0xff] }
 0x3d2   :  { %2706 = vmatpush.msra.mxu3 %v2637_v0  ;;  %2649 = vmatpush.msra.mxu0 %v2586_v24  ;;  %v2580_v24 = vld [vmem:[%s5568_s5 + $0x20] sm:$0xff]  ;;  %v2610_v23 = vld [vmem:[%s5568_s5 + $0x110] sm:$0xff] }
 0x3d3   :  { %2691 = vmatpush.msra.mxu2 %v2616_v7  ;;  %v2577_v7 = vld [vmem:[%s5568_s5 + $0x8] sm:$0xff] }
 0x3d4   :  { %2707 = vmatpush.msra.mxu3 %v2636_v1  ;;  %2650 = vmatpush.msra.mxu0 %v2585_v58  ;;  %v2599_v1 = vld [vmem:[%s5568_s5 + $0xb8] sm:$0xff] }
 0x3d5   :  { %2672 = vmatpush.msra.mxu1 %v2599_v1 }
 0x3d6   :  { %2708 = vmatpush.msra.mxu3 %v2635_v39  ;;  %2651 = vmatpush.msra.mxu0 %v2584_v49  ;;  %v2581_v39 = vld [vmem:[%s5568_s5 + $0x28] sm:$0xff] }
 0x3d7   :  { %v2625_v49 = vld [vmem:[%s5568_s5 + $0x188] sm:$0xff] }
 0x3d8   :  { %v2131_v18 = vpop.f32.mrf.mxu2  ;;  %v5154_v22 = vpop.f32.mrf.mxu3  ;;  %2652 = vmatpush.msra.mxu0 %v2583_v5 }
 0x3d9   :  { %v5156_v12 = vadd.f32 %v2131_v18, %v2091_v15  ;;  %v2634_v18 = vld [vmem:[%s5568_s5 + $0x1d0] sm:$0xff] }
 0x3da   :  { %2709 = vmatpush.msra.mxu3 %v2634_v18  ;;  %2653 = vmatpush.msra.mxu0 %v2582_v14  ;;  %v2628_v18 = vld [vmem:[%s5568_s5 + $0x1a0] sm:$0xff] }
 0x3dc   :  { %2710 = vmatpush.msra.mxu3 %v2633_v11  ;;  %2654 = vmatpush.msra.mxu0 %v2581_v39  ;;  %v2739_v39 = vld [vmem:[%s5569_s7 + $0x70] sm:$0xff] }
 0x3de   :  { %2711 = vmatpush.msra.mxu3 %v2632_v44  ;;  %2655 = vmatpush.msra.mxu0 %v2580_v24 }
 0x3e0   :  { %v2134_v10 = vpop.f32.mrf.mxu2  ;;  %v5158_v55 = vpop.f32.mrf.mxu3  ;;  %2712 = vmatpush.msra.mxu3 %v2631_v21 }
 0x3e1   :  { %v5160_v37 = vadd.f32 %v2134_v10, %v2094_v36  ;;  %v2245_v10 = vpop.f32.mrf.mxu1 }
 0x3e8   :  { %v2137_v45 = vpop.f32.mrf.mxu2  ;;  %v5162_v35 = vpop.f32.mrf.mxu3 }
 0x3e9   :  { %v5164_v43 = vadd.f32 %v2137_v45, %v2097_v17 }
 0x3f0   :  { %v5169_v57 = vpop.f32.mrf.mxu3  ;;  %v2280_v61 = vpop.f32.mrf.mxu2 }
 0x3f1   :  { %v2281_v47 = vadd.f32 %v2280_v61, %v2240_v48  ;;  %v2246_v61 = vadd.f32 %v2245_v10, %v2205_v53  ;;  %v2248_v48 = vpop.f32.mrf.mxu1 }
 0x3f8   :  { %v2283_v56 = vpop.f32.mrf.mxu2  ;;  %v2321_v2 = vpop.f32.mrf.mxu3 }
 0x3f9   :  { %v2322_v60 = vadd.f32 %v2321_v2, %v2281_v47  ;;  %v2284_v36 = vadd.f32 %v2283_v56, %v2243_v46  ;;  %v2615_v47 = vld [vmem:[%s5568_s5 + $0x138] sm:$0xff]  ;;  %v2249_v56 = vadd.f32 %v2248_v48, %v2208_v32  ;;  %v2251_v40 = vpop.f32.mrf.mxu1  ;;  %v2598_v46 = vld [vmem:[%s5568_s5 + $0xb0] sm:$0xff]  ;;  %v2593_v48 = vld [vmem:[%s5568_s5 + $0x88] sm:$0xff] }
 0x3fa   :  { %2692 = vmatpush.msra.mxu2 %v2615_v47  ;;  %2673 = vmatpush.msra.mxu1 %v2598_v46  ;;  %v2594_v32 = vld [vmem:[%s5568_s5 + $0x90] sm:$0xff] }
 0x3fb   :  { %v2345_v15 = vmax.f32 %v2117_v27, %v2322_v60  ;;  %v2210_v27 = vpop.f32.mrf.mxu0 }
 0x3fc   :  { %v2211_v0 = vadd.f32 %v2210_v27, %v5154_v22  ;;  %v2614_v22 = vld [vmem:[%s5568_s5 + $0x130] sm:$0xff]  ;;  %2674 = vmatpush.msra.mxu1 %v2597_v50 }
 0x3fd   :  { %v2357_v19 = vadd.f32 %v5202_v28, %v2345_v15  ;;  %v2630_v15 = vld [vmem:[%s5568_s5 + $0x1b0] sm:$0xff]  ;;  %2693 = vmatpush.msra.mxu2 %v2614_v22 }
 0x3fe   :  { %2713 = vmatpush.msra.mxu3 %v2630_v15  ;;  %v2252_v38 = vadd.f32 %v2251_v40, %v2211_v0  ;;  %2675 = vmatpush.msra.mxu1 %v2596_v51 }
 0x3ff   :  { %v2365_v13 = vmax.f32 %v2357_v19, 0.0  ;;  %v2613_v19 = vld [vmem:[%s5568_s5 + $0x128] sm:$0xff] }
 0x400   :  { %v2286_v29 = vpop.f32.mrf.mxu2  ;;  %v2324_v17 = vpop.f32.mrf.mxu3  ;;  %2694 = vmatpush.msra.mxu2 %v2613_v19  ;;  %2714 = vmatpush.msra.mxu3 %v2629_v9  ;;  %v2738_v9 = vld [vmem:[%s5569_s7 + $0x68] sm:$0xff] }
 0x401   :  { %2373 = vst [vmem:[#allocation3] sm:$0xff] %v2365_v13  ;;  %v2325_v30 = vadd.f32 %v2324_v17, %v2284_v36  ;;  %v2287_v41 = vadd.f32 %v2286_v29, %v2246_v61  ;;  %v2254_v10 = vpop.f32.mrf.mxu1  ;;  %v2579_v61 = vld [vmem:[%s5568_s5 + $0x18] sm:$0xff] }
 0x402   :  { %2715 = vmatpush.msra.mxu3 %v2628_v18  ;;  %2656 = vmatpush.msra.mxu0 %v2579_v61 }
 0x403   :  { %v2346_v45 = vmax.f32 %v5142_v33, %v2325_v30  ;;  %v2213_v13 = vpop.f32.mrf.mxu0 }
 0x404   :  { %v2214_v30 = vadd.f32 %v2213_v13, %v5158_v55  ;;  %v2612_v55 = vld [vmem:[%s5568_s5 + $0x120] sm:$0xff] }
 0x405   :  { %v2358_v16 = vadd.f32 %v5202_v28, %v2346_v45  ;;  %2695 = vmatpush.msra.mxu2 %v2612_v55 }
 0x407   :  { %v2366_v33 = vmax.f32 %v2358_v16, 0.0  ;;  %v2595_v16 = vld [vmem:[%s5568_s5 + $0x98] sm:$0xff]  ;;  %2696 = vmatpush.msra.mxu2 %v2611_v42 }
 0x408   :  { %v2289_v8 = vpop.f32.mrf.mxu2  ;;  %v2327_v3 = vpop.f32.mrf.mxu3  ;;  %2676 = vmatpush.msra.mxu1 %v2595_v16 }
 0x409   :  { %2374 = vst [vmem:[#allocation3 + $0x8] sm:$0xff] %v2366_v33  ;;  %v2328_v62 = vadd.f32 %v2327_v3, %v2287_v41  ;;  %v2290_v34 = vadd.f32 %v2289_v8, %v2249_v56  ;;  %v2255_v41 = vadd.f32 %v2254_v10, %v2214_v30  ;;  %v2578_v8 = vld [vmem:[%s5568_s5 + $0x10] sm:$0xff]  ;;  %2697 = vmatpush.msra.mxu2 %v2610_v23  ;;  %v2576_v56 = vld [vmem:[%s5568_s5] sm:$0xff] }
 0x40a   :  { %v2626_v3 = vld [vmem:[%s5568_s5 + $0x190] sm:$0xff]  ;;  %2657 = vmatpush.msra.mxu0 %v2578_v8  ;;  %2677 = vmatpush.msra.mxu1 %v2594_v32  ;;  %v2737_v23 = vld [vmem:[%s5569_s7 + $0x60] sm:$0xff] }
 0x40b   :  { %v2347_v26 = vmax.f32 %v5144_v52, %v2328_v62  ;;  %v2609_v62 = vld [vmem:[%s5568_s5 + $0x108] sm:$0xff]  ;;  %v2216_v58 = vpop.f32.mrf.mxu0  ;;  %v2381_v32 = vld [vmem:[#allocation3] sm:$0x1] }
 0x40c   :  { %v2217_v4 = vadd.f32 %v2216_v58, %v5162_v35  ;;  %2698 = vmatpush.msra.mxu2 %v2609_v62  ;;  %2658 = vmatpush.msra.mxu0 %v2577_v7  ;;  %v2257_v35 = vpop.f32.mrf.mxu1  ;;  %v2389_v62 = vld [vmem:[#allocation3 + $0x1] sm:$0x1]  ;;  %v2405_v58 = vld [vmem:[#allocation3 + $0x2] sm:$0x1]  ;;  %v2736_v7 = vld [vmem:[%s5569_s7 + $0x58] sm:$0xff] }
 0x40d   :  { %v2359_v2 = vadd.f32 %v5202_v28, %v2347_v26  ;;  %v2608_v26 = vld [vmem:[%s5568_s5 + $0x100] sm:$0xff]  ;;  %2678 = vmatpush.msra.mxu1 %v2593_v48 }
 0x40e   :  { %2699 = vmatpush.msra.mxu2 %v2608_v26  ;;  %2659 = vmatpush.msra.mxu0 %v2576_v56  ;;  %v2429_v26 = vld [vmem:[#allocation3 + $0x4] sm:$0x1]  ;;  %v2453_v56 = vld [vmem:[#allocation3 + $0x6] sm:$0x1] }
 0x40f   :  { %v2367_v52 = vmax.f32 %v2359_v2, 0.0  ;;  %v2624_v2 = vld [vmem:[%s5568_s5 + $0x180] sm:$0xff] }
 0x410   :  { %v2292_v60 = vpop.f32.mrf.mxu2  ;;  %v2330_v31 = vpop.f32.mrf.mxu3  ;;  %v2382_v21 = vld [vmem:[#allocation3 + $0x8] sm:$0x1]  ;;  %v2390_v1 = vld [vmem:[#allocation3 + $0x9] sm:$0x1]  ;;  %v2406_v22 = vld [vmem:[#allocation3 + $0xa] sm:$0x1] }
 0x411   :  { %2375 = vst [vmem:[#allocation3 + $0x10] sm:$0xff] %v2367_v52  ;;  %v2331_v25 = vadd.f32 %v2330_v31, %v2290_v34  ;;  %v2293_v29 = vadd.f32 %v2292_v60, %v2252_v38  ;;  %v2592_v34 = vld [vmem:[%s5568_s5 + $0x80] sm:$0xff]  ;;  %v2258_v60 = vadd.f32 %v2257_v35, %v2217_v4  ;;  %v2414_v14 = vld [vmem:[#allocation3 + $0xb] sm:$0x1]  ;;  %v2454_v46 = vld [vmem:[#allocation3 + $0xe] sm:$0x1]  ;;  %v2398_v24 = vmax.f32 %v2382_v21, %v2390_v1 }
 0x412   :  { %2679 = vmatpush.msra.mxu1 %v2592_v34  ;;  %v2462_v19 = vld [vmem:[#allocation3 + $0xf] sm:$0x1]  ;;  %v2437_v4 = vld [vmem:[#allocation3 + $0x5] sm:$0x1] }
 0x413   :  { %v2348_v63 = vmax.f32 %v5148_v59, %v2331_v25  ;;  %v2219_v0 = vpop.f32.mrf.mxu0  ;;  %v2470_v16 = vmax.f32 %v2454_v46, %v2462_v19  ;;  %v2734_v46 = vld [vmem:[%s5569_s7 + $0x48] sm:$0xff]  ;;  %v2397_v19 = vmax.f32 %v2381_v32, %v2389_v62 }
 0x414   :  { %v2220_v15 = vadd.f32 %v2219_v0, %v5169_v57  ;;  %v2260_v30 = vpop.f32.mrf.mxu1 }
 0x415   :  { %v2360_v36 = vadd.f32 %v5202_v28, %v2348_v63  ;;  %v2430_v63 = vld [vmem:[#allocation3 + $0xc] sm:$0x1] }
 0x416   :  { %v2261_v50 = vadd.f32 %v2260_v30, %v2220_v15  ;;  %v2733_v30 = vld [vmem:[%s5569_s7 + $0x40] sm:$0xff] }
 0x417   :  { %v2368_v59 = vmax.f32 %v2360_v36, 0.0 }
 0x418   :  { %v2295_v17 = vpop.f32.mrf.mxu2  ;;  %v2333_v53 = vpop.f32.mrf.mxu3  ;;  %v2383_v36 = vld [vmem:[#allocation3 + $0x10] sm:$0x1]  ;;  %v2391_v13 = vld [vmem:[#allocation3 + $0x11] sm:$0x1]  ;;  %v2431_v42 = vld [vmem:[#allocation3 + $0x14] sm:$0x1] }
 0x419   :  { %2376 = vst [vmem:[#allocation3 + $0x18] sm:$0xff] %v2368_v59  ;;  %v2334_v20 = vadd.f32 %v2333_v53, %v2293_v29  ;;  %v2296_v11 = vadd.f32 %v2295_v17, %v2255_v41  ;;  %v2740_v29 = vld [vmem:[%s5569_s7 + $0x78] sm:$0xff]  ;;  %v2407_v53 = vld [vmem:[#allocation3 + $0x12] sm:$0x1]  ;;  %v2439_v61 = vld [vmem:[#allocation3 + $0x15] sm:$0x1] }
 0x41a   :  { %2745 = vmatpush.msrb.mxu0 %v2740_v29 }
 0x41b   :  { %v2349_v45 = vmax.f32 %v5152_v6, %v2334_v20  ;;  %v2627_v6 = vld [vmem:[%s5568_s5 + $0x198] sm:$0xff]  ;;  %v2415_v20 = vld [vmem:[#allocation3 + $0x13] sm:$0x1] }
 0x41c   :  { %2716 = vmatpush.msra.mxu3 %v2627_v6  ;;  %2746 = vmatpush.msrb.mxu0 %v2739_v39 }
 0x41d   :  { %v2361_v33 = vadd.f32 %v5202_v28, %v2349_v45  ;;  %v2422_v45 = vmax.f32 %v2406_v22, %v2414_v14 }
 0x41e   :  { %2717 = vmatpush.msra.mxu3 %v2626_v3  ;;  %2747 = vmatpush.msrb.mxu0 %v2738_v9 }
 0x41f   :  { %v2369_v54 = vmax.f32 %v2361_v33, 0.0  ;;  %v2423_v33 = vmax.f32 %v2407_v53, %v2415_v20  ;;  %v2515_v48 = vrot.slane %v2422_v45, 7 }
 0x420   :  { %v2336_v44 = vpop.f32.mrf.mxu3  ;;  %v2298_v27 = vpop.f32.mrf.mxu2  ;;  %2718 = vmatpush.msra.mxu3 %v2625_v49  ;;  %v2384_v59 = vld [vmem:[#allocation3 + $0x18] sm:$0x1]  ;;  %v2392_v17 = vld [vmem:[#allocation3 + $0x19] sm:$0x1]  ;;  %v2408_v18 = vld [vmem:[#allocation3 + $0x1a] sm:$0x1]  ;;  %2748 = vmatpush.msrb.mxu0 %v2737_v23 }
 0x421   :  { %2377 = vst [vmem:[#allocation3 + $0x20] sm:$0xff] %v2369_v54  ;;  %v2337_v47 = vadd.f32 %v2336_v44, %v2296_v11  ;;  %v2299_v25 = vadd.f32 %v2298_v27, %v2258_v60  ;;  %v2416_v10 = vld [vmem:[#allocation3 + $0x1b] sm:$0x1]  ;;  %v2400_v41 = vmax.f32 %v2384_v59, %v2392_v17  ;;  %v2413_v11 = vld [vmem:[#allocation3 + $0x3] sm:$0x1]  ;;  %v2485_v44 = vrot.slane %v2398_v24, 7 }
 0x422   :  { %2719 = vmatpush.msra.mxu3 %v2624_v2  ;;  %v2424_v54 = vmax.f32 %v2408_v18, %v2416_v10  ;;  %v2461_v2 = vld [vmem:[#allocation3 + $0x7] sm:$0x1]  ;;  %v2735_v60 = vld [vmem:[%s5569_s7 + $0x50] sm:$0xff]  ;;  %v5406_v0 = vrot.slane %v2423_v33, 6  ;;  %2749 = vmatpush.msrb.mxu0 %v2736_v7  ;;  %v5415_v15 = vld [vmem:[#allocation3 + $0x1c] sm:$0x1] }
 0x423   :  { %v2350_v52 = vmax.f32 %v5156_v12, %v2337_v47  ;;  %v2438_v12 = vld [vmem:[#allocation3 + $0xd] sm:$0x1]  ;;  %v2447_v47 = vmax.f32 %v2431_v42, %v2439_v61  ;;  %v2487_v18 = vsel %vm2486_vm4, %v2485_v44, %v2397_v19 }
 0x424   :  { %v2446_v6 = vmax.f32 %v2430_v63, %v2438_v12  ;;  %v5413_v14 = vrot.slane %v2424_v54, 5  ;;  %v5419_v63 = vld [vmem:[#allocation3 + $0x1e] sm:$0x1]  ;;  %v5421_v12 = vld [vmem:[#allocation3 + $0x1f] sm:$0x1]  ;;  %2750 = vmatpush.msrb.mxu0 %v2735_v60 }
 0x425   :  { %v2362_v31 = vadd.f32 %v5202_v28, %v2350_v52  ;;  %v2561_v52 = vrot.slane %v2470_v16, 7  ;;  %v2540_v59 = vrot.slane %v2447_v47, 6 }
 0x426   :  { %v2538_v35 = vrot.slane %v2446_v6, 7  ;;  %2751 = vmatpush.msrb.mxu0 %v2734_v46 }
 0x427   :  { %v2370_v5 = vmax.f32 %v2362_v31, 0.0  ;;  %v2491_v31 = vrot.slane %v2400_v41, 5  ;;  %v2732_v41 = vld [vmem:[%s5569_s7 + $0x38] sm:$0xff] }
 0x428   :  { %v2339_v40 = vpop.f32.mrf.mxu3  ;;  %v2301_v55 = vpop.f32.mrf.mxu2  ;;  %v5409_v1 = vld [vmem:[#allocation3 + $0x20] sm:$0x1]  ;;  %v5411_v22 = vld [vmem:[#allocation3 + $0x21] sm:$0x1]  ;;  %v2441_v29 = vld [vmem:[#allocation3 + $0x25] sm:$0x1]  ;;  %2752 = vmatpush.msrb.mxu0 %v2733_v30 }
 0x429   :  { %2378 = vst [vmem:[#allocation3 + $0x28] sm:$0xff] %v2370_v5  ;;  %v2340_v38 = vadd.f32 %v2339_v40, %v2299_v25  ;;  %v2302_v8 = vadd.f32 %v2301_v55, %v2261_v50  ;;  %v2455_v25 = vld [vmem:[#allocation3 + $0x16] sm:$0x1]  ;;  %v2463_v5 = vld [vmem:[#allocation3 + $0x17] sm:$0x1]  ;;  %v2445_v50 = vmax.f32 %v2429_v26, %v2437_v4  ;;  %v2469_v55 = vmax.f32 %v2453_v56, %v2461_v2 }
 0x42a   :  { %v5417_v40 = vld [vmem:[#allocation3 + $0x1d] sm:$0x1]  ;;  %v5432_v17 = vld [vmem:[#allocation3 + $0x26] sm:$0x1]  ;;  %v2465_v53 = vld [vmem:[#allocation3 + $0x27] sm:$0x1]  ;;  %v2471_v24 = vmax.f32 %v2455_v25, %v2463_v5  ;;  %2753 = vmatpush.msrb.mxu0 %v2732_v41 }
 0x42b   :  { %v2351_v57 = vmax.f32 %v5160_v37, %v2340_v38  ;;  %v2399_v37 = vmax.f32 %v2383_v36, %v2391_v13  ;;  %v5428_v38 = vld [vmem:[#allocation3 + $0x23] sm:$0x1]  ;;  %v2421_v36 = vmax.f32 %v2405_v58, %v2413_v11  ;;  %v5430_v13 = vld [vmem:[#allocation3 + $0x24] sm:$0x1]  ;;  %v2562_v23 = vsel %vm2486_vm4, %v2561_v52, %v2469_v55 }
 0x42c   :  { %v2448_v58 = vmax.f32 %v5415_v15, %v5417_v40  ;;  %v2472_v11 = vmax.f32 %v5419_v63, %v5421_v12  ;;  %v2449_v44 = vmax.f32 %v5430_v13, %v2441_v29  ;;  %v2563_v26 = vrot.slane %v2471_v24, 6 }
 0x42d   :  { %v2363_v51 = vadd.f32 %v5202_v28, %v2351_v57  ;;  %v2488_v34 = vrot.slane %v2399_v37, 6  ;;  %v2516_v45 = vsel %vm2486_vm4, %v2515_v48, %v2421_v36  ;;  %v2473_v48 = vmax.f32 %v5432_v17, %v2465_v53 }
 0x42e   :  { %v2518_v56 = vsel %vm2489_vm5, %v5406_v0, %v2516_v45  ;;  %v2544_v40 = vrot.slane %v2449_v44, 4  ;;  %v2564_v63 = vsel %vm2489_vm5, %v2563_v26, %v2562_v23  ;;  %v2731_v26 = vld [vmem:[%s5569_s7 + $0x30] sm:$0xff] }
 0x42f   :  { %v2371_v3 = vmax.f32 %v2363_v51, 0.0  ;;  %v2490_v61 = vsel %vm2489_vm5, %v2488_v34, %v2487_v18  ;;  %v2567_v12 = vrot.slane %v2473_v48, 4  ;;  %2754 = vmatpush.msrb.mxu0 %v2731_v26 }
 0x430   :  { %v2342_v49 = vpop.f32.mrf.mxu3  ;;  %v2386_v20 = vld [vmem:[#allocation3 + $0x28] sm:$0x1]  ;;  %v2394_v39 = vld [vmem:[#allocation3 + $0x29] sm:$0x1]  ;;  %v2410_v9 = vld [vmem:[#allocation3 + $0x2a] sm:$0x1]  ;;  %v2493_v32 = vsel %vm2492_vm6, %v2491_v31, %v2490_v61 }
 0x431   :  { %2379 = vst [vmem:[#allocation3 + $0x30] sm:$0xff] %v2371_v3  ;;  %v2343_v27 = vadd.f32 %v2342_v49, %v2302_v8  ;;  %v2418_v10 = vld [vmem:[#allocation3 + $0x2b] sm:$0x1]  ;;  %v2434_v51 = vld [vmem:[#allocation3 + $0x2c] sm:$0x1]  ;;  %v2401_v3 = vmax.f32 %v5409_v1, %v5411_v22  ;;  %v2402_v4 = vmax.f32 %v2386_v20, %v2394_v39  ;;  %v2542_v1 = vrot.slane %v2448_v58, 5 }
 0x432   :  { %v2442_v37 = vld [vmem:[#allocation3 + $0x2d] sm:$0x1]  ;;  %v2458_v6 = vld [vmem:[#allocation3 + $0x2e] sm:$0x1]  ;;  %v2466_v16 = vld [vmem:[#allocation3 + $0x2f] sm:$0x1]  ;;  %v2426_v47 = vmax.f32 %v2410_v9, %v2418_v10 }
 0x433   :  { %v2352_v21 = vmax.f32 %v5164_v43, %v2343_v27  ;;  %v5426_v43 = vld [vmem:[#allocation3 + $0x22] sm:$0x1]  ;;  %v2450_v27 = vmax.f32 %v2434_v51, %v2442_v37  ;;  %v2474_v25 = vmax.f32 %v2458_v6, %v2466_v16  ;;  %v2494_v5 = vrot.slane %v2401_v3, 4 }
 0x434   :  { %v2425_v7 = vmax.f32 %v5426_v43, %v5428_v38  ;;  %v2565_v22 = vrot.slane %v2472_v11, 5  ;;  %v2497_v0 = vrot.slane %v2402_v4, 3  ;;  %v2523_v46 = vrot.slane %v2426_v47, 3  ;;  %v2730_v4 = vld [vmem:[%s5569_s7 + $0x28] sm:$0xff]  ;;  %v2729_v47 = vld [vmem:[%s5569_s7 + $0x20] sm:$0xff] }
 0x435   :  { %v2364_v57 = vadd.f32 %v5202_v28, %v2352_v21  ;;  %v2539_v28 = vsel %vm2486_vm4, %v2538_v35, %v2445_v50  ;;  %v2546_v19 = vrot.slane %v2450_v27, 3  ;;  %v2569_v29 = vrot.slane %v2474_v25, 3  ;;  %2755 = vmatpush.msrb.mxu0 %v2730_v4  ;;  %v2726_v27 = vld [vmem:[%s5569_s7 + $0x8] sm:$0xff]  ;;  %v2777_v25 = vld [vmem:[%s5571_s9 + $0x58] sm:$0xff] }
 0x436   :  { %v2541_v21 = vsel %vm2489_vm5, %v2540_v59, %v2539_v28  ;;  %v2521_v15 = vrot.slane %v2425_v7, 4  ;;  %v2496_v30 = vsel %vm2495_vm7, %v2494_v5, %v2493_v32  ;;  %v2566_v39 = vsel %vm2492_vm6, %v2565_v22, %v2564_v63  ;;  %v2776_v5 = vld [vmem:[%s5571_s9 + $0x50] sm:$0xff]  ;;  %v2773_v22 = vld [vmem:[%s5571_s9 + $0x38] sm:$0xff] }
 0x437   :  { %v2372_v42 = vmax.f32 %v2364_v57, 0.0  ;;  %v2520_v57 = vsel %vm2492_vm6, %v5413_v14, %v2518_v56  ;;  %v2543_v20 = vsel %vm2492_vm6, %v2542_v1, %v2541_v21  ;;  %v2568_v45 = vsel %vm2495_vm7, %v2567_v12, %v2566_v39  ;;  %2756 = vmatpush.msrb.mxu0 %v2729_v47  ;;  %v2728_v56 = vld [vmem:[%s5569_s7 + $0x18] sm:$0xff]  ;;  %v2775_v21 = vld [vmem:[%s5571_s9 + $0x48] sm:$0xff]  ;;  %v2774_v1 = vld [vmem:[%s5571_s9 + $0x40] sm:$0xff] }
 0x438   :  { %v2387_v33 = vld [vmem:[#allocation3 + $0x30] sm:$0x1]  ;;  %v2395_v8 = vld [vmem:[#allocation3 + $0x31] sm:$0x1]  ;;  %v2411_v62 = vld [vmem:[#allocation3 + $0x32] sm:$0x1]  ;;  %v2522_v55 = vsel %vm2495_vm7, %v2521_v15, %v2520_v57  ;;  %v2545_v10 = vsel %vm2495_vm7, %v2544_v40, %v2543_v20  ;;  %v2499_v51 = vsel %vm2498_vm8, %v2497_v0, %v2496_v30  ;;  %v2570_v32 = vsel %vm2498_vm8, %v2569_v29, %v2568_v45 }
 0x439   :  { %2380 = vst [vmem:[#allocation3 + $0x38] sm:$0xff] %v2372_v42  ;;  %v2419_v54 = vld [vmem:[#allocation3 + $0x33] sm:$0x1]  ;;  %v2435_v49 = vld [vmem:[#allocation3 + $0x34] sm:$0x1]  ;;  %v2403_v34 = vmax.f32 %v2387_v33, %v2395_v8  ;;  %v2524_v16 = vsel %vm2498_vm8, %v2523_v46, %v2522_v55  ;;  %v2547_v23 = vsel %vm2498_vm8, %v2546_v19, %v2545_v10  ;;  %2757 = vmatpush.msrb.mxu0 %v2728_v56  ;;  %v2771_v12 = vld [vmem:[%s5571_s9 + $0x28] sm:$0xff] }
 0x43a   :  { %v2443_v2 = vld [vmem:[#allocation3 + $0x35] sm:$0x1]  ;;  %v2427_v35 = vmax.f32 %v2411_v62, %v2419_v54  ;;  %v2459_v60 = vld [vmem:[#allocation3 + $0x36] sm:$0x1]  ;;  %v2467_v31 = vld [vmem:[#allocation3 + $0x37] sm:$0x1] }
 0x43b   :  { %v2451_v52 = vmax.f32 %v2435_v49, %v2443_v2  ;;  %v2475_v43 = vmax.f32 %v2459_v60, %v2467_v31  ;;  %v2500_v38 = vrot.slane %v2403_v34, 2  ;;  %v2727_v2 = vld [vmem:[%s5569_s7 + $0x10] sm:$0xff]  ;;  %v2781_v34 = vld [vmem:[%s5571_s9 + $0x78] sm:$0xff]  ;;  %v2779_v60 = vld [vmem:[%s5571_s9 + $0x68] sm:$0xff] }
 0x43c   :  { %v2525_v36 = vrot.slane %v2427_v35, 2  ;;  %v2780_v35 = vld [vmem:[%s5571_s9 + $0x70] sm:$0xff]  ;;  %2758 = vmatpush.msrb.mxu0 %v2727_v2  ;;  %2786 = vmatpush.msrb.mxu1 %v2781_v34  ;;  %v2778_v31 = vld [vmem:[%s5571_s9 + $0x60] sm:$0xff]  ;;  %v2769_v19 = vld [vmem:[%s5571_s9 + $0x18] sm:$0xff] }
 0x43d   :  { %v2548_v13 = vrot.slane %v2451_v52, 2  ;;  %v2571_v28 = vrot.slane %v2475_v43, 2  ;;  %v2502_v33 = vsel %vm2501_vm9, %v2500_v38, %v2499_v51  ;;  %v2725_v52 = vld [vmem:[%s5569_s7] sm:$0xff]  ;;  %v2772_v40 = vld [vmem:[%s5571_s9 + $0x30] sm:$0xff] }
 0x43e   :  { %v2526_v58 = vsel %vm2501_vm9, %v2525_v36, %v2524_v16  ;;  %2759 = vmatpush.msrb.mxu0 %v2726_v27  ;;  %2787 = vmatpush.msrb.mxu1 %v2780_v35  ;;  %v2813_v15 = vld [vmem:[%s5567_s6] ss:$0 sm:$0xff]  ;;  %v2768_v30 = vld [vmem:[%s5571_s9 + $0x10] sm:$0xff] }
 0x43f   :  { %v2549_v11 = vsel %vm2501_vm9, %v2548_v13, %v2547_v23  ;;  %v2572_v44 = vsel %vm2501_vm9, %v2571_v28, %v2570_v32  ;;  %v2770_v46 = vld [vmem:[%s5571_s9 + $0x20] sm:$0xff] }
 0x440   :  { %v2388_v17 = vld [vmem:[#allocation3 + $0x38] sm:$0x1]  ;;  %v2396_v53 = vld [vmem:[#allocation3 + $0x39] sm:$0x1]  ;;  %v2412_v59 = vld [vmem:[#allocation3 + $0x3a] sm:$0x1]  ;;  %2760 = vmatpush.msrb.mxu0 %v2725_v52  ;;  %2788 = vmatpush.msrb.mxu1 %v2779_v60 }
 0x441   :  { %v2404_v9 = vmax.f32 %v2388_v17, %v2396_v53  ;;  %v2420_v50 = vld [vmem:[#allocation3 + $0x3b] sm:$0x1]  ;;  %v2436_v24 = vld [vmem:[#allocation3 + $0x3c] sm:$0x1]  ;;  %v2444_v18 = vld [vmem:[#allocation3 + $0x3d] sm:$0x1] }
 0x442   :  { %v2428_v37 = vmax.f32 %v2412_v59, %v2420_v50  ;;  %v2452_v42 = vmax.f32 %v2436_v24, %v2444_v18  ;;  %v2460_v61 = vld [vmem:[#allocation3 + $0x3e] sm:$0x1]  ;;  %v2468_v14 = vld [vmem:[#allocation3 + $0x3f] sm:$0x1]  ;;  %2789 = vmatpush.msrb.mxu1 %v2778_v31  ;;  %v2767_v59 = vld [vmem:[%s5571_s9 + $0x8] sm:$0xff] }
 0x443   :  { %v2503_v6 = vrot.slane %v2404_v9, 1  ;;  %v2476_v41 = vmax.f32 %v2460_v61, %v2468_v14  ;;  %v2766_v57 = vld [vmem:[%s5571_s9] sm:$0xff] }
 0x444   :  { %v2527_v8 = vrot.slane %v2428_v37, 1  ;;  %v2550_v3 = vrot.slane %v2452_v42, 1  ;;  %2790 = vmatpush.msrb.mxu1 %v2777_v25  ;;  %v2814_v20 = vld [vmem:[%s5570_s8] ss:$0 sm:$0xff] }
 0x445   :  { %v2505_v62 = vsel %vm2504_vm10, %v2503_v6, %v2502_v33  ;;  %v2573_v54 = vrot.slane %v2476_v41, 1  ;;  %v2815_v55 = vld [vmem:[%s5572_s10] ss:$0 sm:$0xff] }
 0x446   :  { %2660 = vmatmul.f32.vlgmr.msra.gmra.mxu0 %v2505_v62  ;;  %v2528_v7 = vsel %vm2504_vm10, %v2527_v8, %v2526_v58  ;;  %v2551_v49 = vsel %vm2504_vm10, %v2550_v3, %v2549_v11  ;;  %2791 = vmatpush.msrb.mxu1 %v2776_v5 }
 0x447   :  { %2680 = vmatmul.f32.vlgmr.msra.gmra.mxu1 %v2528_v7  ;;  %2700 = vmatmul.f32.vlgmr.msra.gmra.mxu2 %v2551_v49  ;;  %v2574_v48 = vsel %vm2504_vm10, %v2573_v54, %v2572_v44 }
 0x448   :  { %2720 = vmatmul.f32.vlgmr.msra.gmra.mxu3 %v2574_v48  ;;  %2792 = vmatpush.msrb.mxu1 %v2775_v21 }
 0x44a   :  { %2793 = vmatpush.msrb.mxu1 %v2774_v1 }
 0x44c   :  { %2794 = vmatpush.msrb.mxu1 %v2773_v22 }
 0x44e   :  { %2795 = vmatpush.msrb.mxu1 %v2772_v40 }
 0x450   :  { %2796 = vmatpush.msrb.mxu1 %v2771_v12 }
 0x452   :  { %2797 = vmatpush.msrb.mxu1 %v2770_v46 }
 0x454   :  { %2798 = vmatpush.msrb.mxu1 %v2769_v19 }
 0x456   :  { %2799 = vmatpush.msrb.mxu1 %v2768_v30 }
 0x458   :  { %2800 = vmatpush.msrb.mxu1 %v2767_v59 }
 0x45a   :  { %2801 = vmatpush.msrb.mxu1 %v2766_v57 }
 0x4c3   :  { %v2661_v63 = vpop.f32.mrf.mxu0 }
 0x4c4   :  { %v2662_v0 = vadd.f32 %v2813_v15, %v2661_v63  ;;  %v2681_v43 = vpop.f32.mrf.mxu1 }
 0x4c6   :  { %v2682_v38 = vadd.f32 %v2681_v43, %v2662_v0 }
 0x4ca   :  { %v2701_v36 = vpop.f32.mrf.mxu2 }
 0x4cb   :  { %v2702_v13 = vadd.f32 %v2701_v36, %v2682_v38  ;;  %v2721_v29 = vpop.f32.mrf.mxu3 }
 0x4cd   :  { %v2722_v17 = vadd.f32 %v2721_v29, %v2702_v13 }
 0x4cf   :  { %v2724_v53 = vmax.f32 %v2722_v17, 0.0 }
 0x4d1   :  { %2761 = vmatmul.f32.vlgmr.msrb.gmra.mxu0 %v2724_v53 }
 0x54e   :  { %v2762_v39 = vpop.f32.mrf.mxu0 }
 0x54f   :  { %v2763_v9 = vadd.f32 %v2814_v20, %v2762_v39 }
 0x551   :  { %v2765_v50 = vmax.f32 %v2763_v9, 0.0 }
 0x553   :  { %2802 = vmatmul.f32.vlgmr.msrb.gmra.mxu1 %v2765_v50 }
 0x5d0   :  { %v2803_v24 = vpop.f32.mrf.mxu1 }
 0x5d1   :  { %v2804_v18 = vadd.f32 %v2815_v55, %v2803_v24 }
 0x5d3   :  { %2806 = vst [vmem:[%s5573_s11] sm:$0xff] %v2804_v18 }

</bundles_post_ra>
